<compile_context>
chip_gen: v7x
topology: tpu7x:2x2x1
jax: 0.10.0
libtpu: 0.0.40
codegen_flags: <defaults>
</compile_context>

<pallas_src>
import functools

import jax
import jax.numpy as jnp
from jax.experimental import pallas as pl
from jax.experimental.pallas import tpu as pltpu

_LRELU_SLOPE = 0.2


def _round_up(n, m):
    return ((n + m - 1) // m) * m


def _generator_kernel(x_ref, w1_ref, b1_ref, w2_ref, b2_ref,
                      w3_ref, b3_ref, w4_ref, b4_ref, o_ref):
    """Fused 4-layer MLP: bf16 MXU operands, f32 accumulation + activations,
    bf16 output writeback."""

    def lrelu(y):
        return jnp.where(y > 0, y, jnp.float32(_LRELU_SLOPE) * y)

    h = x_ref[...]                                                  # bf16 [tm, 128]
    y = jnp.dot(h, w1_ref[...], preferred_element_type=jnp.float32) + b1_ref[...]
    h = lrelu(y).astype(jnp.bfloat16)
    y = jnp.dot(h, w2_ref[...], preferred_element_type=jnp.float32) + b2_ref[...]
    h = lrelu(y).astype(jnp.bfloat16)
    y = jnp.dot(h, w3_ref[...], preferred_element_type=jnp.float32) + b3_ref[...]
    h = lrelu(y).astype(jnp.bfloat16)
    y = jnp.dot(h, w4_ref[...], preferred_element_type=jnp.float32) + b4_ref[...]
    o_ref[...] = jnp.tanh(y).astype(o_ref.dtype)                    # bf16 store


def _choose_tm(M):
    """Batch-tile size.

    * tiny batches: one tile, rounded to a multiple of 16 (bf16 sublane pack)
    * 256..1024 rows: split into >=2 tiles so both v7x TensorCores are used
    * larger: pick from {512, 256, 128} minimizing zero-row padding
    """
    m16 = _round_up(max(M, 16), 16)
    if m16 < 256:
        return m16
    if m16 <= 1024:
        return _round_up(pl.cdiv(m16, 2), 16)
    return min((512, 256, 128), key=lambda t: (_round_up(M, t) - M, -t))


def _fused_generator_call(x_pad, padded_params, tm):
    (w1, b1), (w2, b2), (w3, b3), (w4, b4) = padded_params
    M_pad, K_pad = x_pad.shape
    N_out = w4.shape[1]

    act_map = lambda i: (i, 0)      # activation / output tiles march over M
    fix_map = lambda i: (0, 0)      # weights & biases resident across M tiles

    # Advisory cost hint: lets XLA schedule the pad/cast/slice around this
    # custom call without serialization bubbles.
    mac_terms = sum(w.shape[0] * w.shape[1] for w, _ in padded_params)
    weight_bytes = sum(w.size * w.dtype.itemsize + b.size * b.dtype.itemsize
                       for w, b in padded_params)
    cost = pl.CostEstimate(
        flops=2 * M_pad * mac_terms,
        transcendentals=M_pad * N_out,                         # tanh
        bytes_accessed=(weight_bytes
                        + x_pad.size * x_pad.dtype.itemsize
                        + M_pad * N_out * 2))                  # bf16 output

    # Explicit scoped-VMEM budget (defaults: 16 MiB v5e / 32 MiB v6e,v7x).
    # Weights get double-buffered by the pipeliner even though their block
    # index never changes, so budget 2x for them; cap under v7x 64 MiB phys.
    # NOTE: relying on the explicit limit instead of pipeline_mode=Buffered(1)
    # for the resident weights keeps the lowering path conservative.
    io_bytes = 2 * tm * (K_pad + N_out) * 2                    # 2x-buffered bf16 tiles
    interm_bytes = 6 * tm * 1024 * 4                           # f32 temporaries (generous)
    vmem_limit = int(min(max(2 * weight_bytes + io_bytes + interm_bytes + (4 << 20),
                             32 << 20),
                         48 << 20))

    return pl.pallas_call(
        _generator_kernel,
        out_shape=jax.ShapeDtypeStruct((M_pad, N_out), jnp.bfloat16),
        grid=(M_pad // tm,),
        in_specs=[
            pl.BlockSpec((tm, K_pad), act_map),
            pl.BlockSpec(w1.shape, fix_map), pl.BlockSpec(b1.shape, fix_map),
            pl.BlockSpec(w2.shape, fix_map), pl.BlockSpec(b2.shape, fix_map),
            pl.BlockSpec(w3.shape, fix_map), pl.BlockSpec(b3.shape, fix_map),
            pl.BlockSpec(w4.shape, fix_map), pl.BlockSpec(b4.shape, fix_map),
        ],
        out_specs=pl.BlockSpec((tm, N_out), act_map),
        compiler_params=pltpu.CompilerParams(
            dimension_semantics=("parallel",),    # split M tiles across v7x TCs
            vmem_limit_bytes=vmem_limit),
        cost_estimate=cost,
    )(x_pad, w1, b1, w2, b2, w3, b3, w4, b4)


def init_generator_params(key, g_output_dim, dtype=jnp.float32):
    """nn.Linear-style U(-1/sqrt(fan_in), 1/sqrt(fan_in)) init (f32 master copy)."""
    dims = [100, 256, 512, 1024, g_output_dim]
    params = []
    for layer_idx in range(4):
        fan_in, fan_out = dims[layer_idx], dims[layer_idx + 1]
        key, kw, kb = jax.random.split(key, 3)
        bound = 1.0 / (fan_in ** 0.5)
        w = jax.random.uniform(kw, (fan_in, fan_out), dtype=dtype,
                               minval=-bound, maxval=bound)
        b = jax.random.uniform(kb, (fan_out,), dtype=dtype,
                               minval=-bound, maxval=bound)
        params.append((w, b))
    return params


def prepare_padded_params(params):
    """Cast weights to bf16 and zero-pad every feature dim up to a multiple of
    128 (lane-dense, unmasked loads); biases stay f32 as [1, N] rows."""
    padded = []
    k_pad = _round_up(params[0][0].shape[0], 128)       # 100 -> 128
    for w, b in params:
        k, n = w.shape
        n_pad = _round_up(n, 128)
        wp = jnp.pad(w.astype(jnp.float32),
                     ((0, k_pad - k), (0, n_pad - n))).astype(jnp.bfloat16)
        bp = jnp.pad(b.astype(jnp.float32), (0, n_pad - n)).reshape(1, n_pad)
        padded.append((wp, bp))
        k_pad = n_pad
    return padded


@functools.partial(jax.jit, static_argnames=("g_output_dim",))
def generator_forward(x, padded_params, g_output_dim):
    M, K = x.shape
    K_pad = padded_params[0][0].shape[0]
    tm = _choose_tm(M)
    M_pad = _round_up(M, tm)
    x_pad = jnp.pad(x.astype(jnp.bfloat16), ((0, M_pad - M), (0, K_pad - K)))
    out = _fused_generator_call(x_pad, padded_params, tm)
    # Output is bf16 (tanh is in [-1, 1]); consumers that can work on the
    # padded (M_pad, N_pad) buffer directly should use `out` and skip this
    # slice copy for very large batches.
    return out[:M, :g_output_dim]


def generator_reference(x, params):
    """Pure-JAX reference with matching numerics (bf16 operands, f32 accum)."""
    h = x.astype(jnp.bfloat16)
    y = None
    for i, (w, b) in enumerate(params):
        y = jnp.dot(h, w.astype(jnp.bfloat16),
                    preferred_element_type=jnp.float32) + b.astype(jnp.float32)
        if i < 3:
            y = jnp.where(y > 0, y, 0.2 * y)
            h = y.astype(jnp.bfloat16)
        else:
            y = jnp.tanh(y)
    return y


if __name__ == "__main__":
    key = jax.random.PRNGKey(0)
    key, kx = jax.random.split(key)

    g_output_dim = 784          # e.g. MNIST 28*28
    batch = 8
    x = jax.random.normal(kx, (batch, 100), dtype=jnp.float32)

    params = init_generator_params(key, g_output_dim)
    padded_params = prepare_padded_params(params)

    out = generator_forward(x, padded_params, g_output_dim)
    out = jax.block_until_ready(out)

    ref = generator_reference(x, params)
    assert out.shape == (batch, g_output_dim), out.shape
    assert out.dtype == jnp.bfloat16, out.dtype
    err = float(jnp.max(jnp.abs(out.astype(jnp.float32) - ref)))
    assert err < 2.5e-2, err

    print("KERNEL_OK")
</pallas_src>

<mosaic_0001>
module attributes {stable_mosaic.version = 11 : i64} {
  func.func @_generator_kernel(%arg0: i32, %arg1: memref<16x128xbf16, #tpu.memory_space<vmem>>, %arg2: memref<128x256xbf16, #tpu.memory_space<vmem>>, %arg3: memref<1x256xf32, #tpu.memory_space<vmem>>, %arg4: memref<256x512xbf16, #tpu.memory_space<vmem>>, %arg5: memref<1x512xf32, #tpu.memory_space<vmem>>, %arg6: memref<512x1024xbf16, #tpu.memory_space<vmem>>, %arg7: memref<1x1024xf32, #tpu.memory_space<vmem>>, %arg8: memref<1024x896xbf16, #tpu.memory_space<vmem>>, %arg9: memref<1x896xf32, #tpu.memory_space<vmem>>, %arg10: memref<16x896xbf16, #tpu.memory_space<vmem>>) attributes {dimension_semantics = [#tpu.dimension_semantics<parallel>], iteration_bounds = array<i64: 1>, scalar_prefetch = 0 : i64, scratch_operands = 0 : i64, tpu.core_type = #tpu.core_type<tc>, window_params = [{transform_indices = @transform_0, window_bounds = array<i64: 16, 128>}, {pipeline_mode = #tpu.pipeline_mode<synchronous>, transform_indices = @transform_1, window_bounds = array<i64: 128, 256>}, {pipeline_mode = #tpu.pipeline_mode<synchronous>, transform_indices = @transform_2, window_bounds = array<i64: 1, 256>}, {pipeline_mode = #tpu.pipeline_mode<synchronous>, transform_indices = @transform_3, window_bounds = array<i64: 256, 512>}, {pipeline_mode = #tpu.pipeline_mode<synchronous>, transform_indices = @transform_4, window_bounds = array<i64: 1, 512>}, {pipeline_mode = #tpu.pipeline_mode<synchronous>, transform_indices = @transform_5, window_bounds = array<i64: 512, 1024>}, {pipeline_mode = #tpu.pipeline_mode<synchronous>, transform_indices = @transform_6, window_bounds = array<i64: 1, 1024>}, {pipeline_mode = #tpu.pipeline_mode<synchronous>, transform_indices = @transform_7, window_bounds = array<i64: 1024, 896>}, {pipeline_mode = #tpu.pipeline_mode<synchronous>, transform_indices = @transform_8, window_bounds = array<i64: 1, 896>}, {transform_indices = @transform_9, window_bounds = array<i64: 16, 896>}]} {
    %c0 = arith.constant 0 : index
    %c0_0 = arith.constant 0 : index
    %0 = vector.load %arg1[%c0, %c0_0] : memref<16x128xbf16, #tpu.memory_space<vmem>>, vector<16x128xbf16>
    %c0_1 = arith.constant 0 : index
    %c0_2 = arith.constant 0 : index
    %1 = vector.load %arg2[%c0_1, %c0_2] : memref<128x256xbf16, #tpu.memory_space<vmem>>, vector<128x256xbf16>
    %cst = arith.constant dense<0.000000e+00> : vector<16x256xf32>
    %2 = tpu.matmul %0, %1, %cst {dimension_numbers = #tpu.dot_dimension_numbers<[1], [0], [0], [1], [0, 0, 1, 1], [], []>} : vector<16x128xbf16>, vector<128x256xbf16>, vector<16x256xf32> -> vector<16x256xf32>
    %c0_3 = arith.constant 0 : index
    %c0_4 = arith.constant 0 : index
    %3 = vector.load %arg3[%c0_3, %c0_4] : memref<1x256xf32, #tpu.memory_space<vmem>>, vector<1x256xf32>
    %4 = vector.broadcast %3 : vector<1x256xf32> to vector<16x256xf32>
    %5 = arith.addf %2, %4 : vector<16x256xf32>
    %cst_5 = arith.constant 0.000000e+00 : f32
    %6 = vector.broadcast %cst_5 : f32 to vector<16x256xf32>
    %7 = arith.cmpf ogt, %5, %6 : vector<16x256xf32>
    %cst_6 = arith.constant 2.000000e-01 : f32
    %8 = vector.broadcast %cst_6 : f32 to vector<16x256xf32>
    %9 = arith.mulf %8, %5 : vector<16x256xf32>
    %10 = arith.select %7, %5, %9 : vector<16x256xi1>, vector<16x256xf32>
    %11 = arith.truncf %10 : vector<16x256xf32> to vector<16x256xbf16>
    %c0_7 = arith.constant 0 : index
    %c0_8 = arith.constant 0 : index
    %12 = vector.load %arg4[%c0_7, %c0_8] : memref<256x512xbf16, #tpu.memory_space<vmem>>, vector<256x512xbf16>
    %cst_9 = arith.constant dense<0.000000e+00> : vector<16x512xf32>
    %13 = tpu.matmul %11, %12, %cst_9 {dimension_numbers = #tpu.dot_dimension_numbers<[1], [0], [0], [1], [0, 0, 1, 1], [], []>} : vector<16x256xbf16>, vector<256x512xbf16>, vector<16x512xf32> -> vector<16x512xf32>
    %c0_10 = arith.constant 0 : index
    %c0_11 = arith.constant 0 : index
    %14 = vector.load %arg5[%c0_10, %c0_11] : memref<1x512xf32, #tpu.memory_space<vmem>>, vector<1x512xf32>
    %15 = vector.broadcast %14 : vector<1x512xf32> to vector<16x512xf32>
    %16 = arith.addf %13, %15 : vector<16x512xf32>
    %cst_12 = arith.constant 0.000000e+00 : f32
    %17 = vector.broadcast %cst_12 : f32 to vector<16x512xf32>
    %18 = arith.cmpf ogt, %16, %17 : vector<16x512xf32>
    %cst_13 = arith.constant 2.000000e-01 : f32
    %19 = vector.broadcast %cst_13 : f32 to vector<16x512xf32>
    %20 = arith.mulf %19, %16 : vector<16x512xf32>
    %21 = arith.select %18, %16, %20 : vector<16x512xi1>, vector<16x512xf32>
    %22 = arith.truncf %21 : vector<16x512xf32> to vector<16x512xbf16>
    %c0_14 = arith.constant 0 : index
    %c0_15 = arith.constant 0 : index
    %23 = vector.load %arg6[%c0_14, %c0_15] : memref<512x1024xbf16, #tpu.memory_space<vmem>>, vector<512x1024xbf16>
    %cst_16 = arith.constant dense<0.000000e+00> : vector<16x1024xf32>
    %24 = tpu.matmul %22, %23, %cst_16 {dimension_numbers = #tpu.dot_dimension_numbers<[1], [0], [0], [1], [0, 0, 1, 1], [], []>} : vector<16x512xbf16>, vector<512x1024xbf16>, vector<16x1024xf32> -> vector<16x1024xf32>
    %c0_17 = arith.constant 0 : index
    %c0_18 = arith.constant 0 : index
    %25 = vector.load %arg7[%c0_17, %c0_18] : memref<1x1024xf32, #tpu.memory_space<vmem>>, vector<1x1024xf32>
    %26 = vector.broadcast %25 : vector<1x1024xf32> to vector<16x1024xf32>
    %27 = arith.addf %24, %26 : vector<16x1024xf32>
    %cst_19 = arith.constant 0.000000e+00 : f32
    %28 = vector.broadcast %cst_19 : f32 to vector<16x1024xf32>
    %29 = arith.cmpf ogt, %27, %28 : vector<16x1024xf32>
    %cst_20 = arith.constant 2.000000e-01 : f32
    %30 = vector.broadcast %cst_20 : f32 to vector<16x1024xf32>
    %31 = arith.mulf %30, %27 : vector<16x1024xf32>
    %32 = arith.select %29, %27, %31 : vector<16x1024xi1>, vector<16x1024xf32>
    %33 = arith.truncf %32 : vector<16x1024xf32> to vector<16x1024xbf16>
    %c0_21 = arith.constant 0 : index
    %c0_22 = arith.constant 0 : index
    %34 = vector.load %arg8[%c0_21, %c0_22] : memref<1024x896xbf16, #tpu.memory_space<vmem>>, vector<1024x896xbf16>
    %cst_23 = arith.constant dense<0.000000e+00> : vector<16x896xf32>
    %35 = tpu.matmul %33, %34, %cst_23 {dimension_numbers = #tpu.dot_dimension_numbers<[1], [0], [0], [1], [0, 0, 1, 1], [], []>} : vector<16x1024xbf16>, vector<1024x896xbf16>, vector<16x896xf32> -> vector<16x896xf32>
    %c0_24 = arith.constant 0 : index
    %c0_25 = arith.constant 0 : index
    %36 = vector.load %arg9[%c0_24, %c0_25] : memref<1x896xf32, #tpu.memory_space<vmem>>, vector<1x896xf32>
    %37 = vector.broadcast %36 : vector<1x896xf32> to vector<16x896xf32>
    %38 = arith.addf %35, %37 : vector<16x896xf32>
    %39 = math.tanh %38 : vector<16x896xf32>
    %40 = arith.truncf %39 : vector<16x896xf32> to vector<16x896xbf16>
    %c0_26 = arith.constant 0 : index
    %c0_27 = arith.constant 0 : index
    %41 = vector.load %arg10[%c0_26, %c0_27] : memref<16x896xbf16, #tpu.memory_space<vmem>>, vector<16x896xbf16>
    tpu.vector_store %arg10[%c0_26, %c0_27], %40 {strides = array<i32>} : memref<16x896xbf16, #tpu.memory_space<vmem>>, vector<16x896xbf16>,
    return
  }
  func.func @transform_0(%arg0: i32) -> (i32, i32) {
    %c0_i32 = arith.constant 0 : i32
    %c0_i32_0 = arith.constant 0 : i32
    return %arg0, %c0_i32 : i32, i32
  }
  func.func @transform_1(%arg0: i32) -> (i32, i32) {
    %c0_i32 = arith.constant 0 : i32
    %c0_i32_0 = arith.constant 0 : i32
    %c0_i32_1 = arith.constant 0 : i32
    return %c0_i32, %c0_i32_0 : i32, i32
  }
  func.func @transform_2(%arg0: i32) -> (i32, i32) {
    %c0_i32 = arith.constant 0 : i32
    %c0_i32_0 = arith.constant 0 : i32
    %c0_i32_1 = arith.constant 0 : i32
    return %c0_i32, %c0_i32_0 : i32, i32
  }
  func.func @transform_3(%arg0: i32) -> (i32, i32) {
    %c0_i32 = arith.constant 0 : i32
    %c0_i32_0 = arith.constant 0 : i32
    %c0_i32_1 = arith.constant 0 : i32
    return %c0_i32, %c0_i32_0 : i32, i32
  }
  func.func @transform_4(%arg0: i32) -> (i32, i32) {
    %c0_i32 = arith.constant 0 : i32
    %c0_i32_0 = arith.constant 0 : i32
    %c0_i32_1 = arith.constant 0 : i32
    return %c0_i32, %c0_i32_0 : i32, i32
  }
  func.func @transform_5(%arg0: i32) -> (i32, i32) {
    %c0_i32 = arith.constant 0 : i32
    %c0_i32_0 = arith.constant 0 : i32
    %c0_i32_1 = arith.constant 0 : i32
    return %c0_i32, %c0_i32_0 : i32, i32
  }
  func.func @transform_6(%arg0: i32) -> (i32, i32) {
    %c0_i32 = arith.constant 0 : i32
    %c0_i32_0 = arith.constant 0 : i32
    %c0_i32_1 = arith.constant 0 : i32
    return %c0_i32, %c0_i32_0 : i32, i32
  }
  func.func @transform_7(%arg0: i32) -> (i32, i32) {
    %c0_i32 = arith.constant 0 : i32
    %c0_i32_0 = arith.constant 0 : i32
    %c0_i32_1 = arith.constant 0 : i32
    return %c0_i32, %c0_i32_0 : i32, i32
  }
  func.func @transform_8(%arg0: i32) -> (i32, i32) {
    %c0_i32 = arith.constant 0 : i32
    %c0_i32_0 = arith.constant 0 : i32
    %c0_i32_1 = arith.constant 0 : i32
    return %c0_i32, %c0_i32_0 : i32, i32
  }
  func.func @transform_9(%arg0: i32) -> (i32, i32) {
    %c0_i32 = arith.constant 0 : i32
    %c0_i32_0 = arith.constant 0 : i32
    return %arg0, %c0_i32 : i32, i32
  }
}

</mosaic_0001>

<bundles_post_ra>
// kernel: generator_forward.1
= control target key start
LH: loop header
LB: loop body
LE: loop exit
PB: predicated region body
PF: predicated region fallthrough
CT: control target
= control target key end

     0   :  { %14 = vsyncpa [#allocation3], 0  ;;  %s8753_s0 = inlined_call_operand.vmem [shape: bf16[16,128], index: 0, kind: input, shape index: {}]   ;;  %s8754_s1 = inlined_call_operand.hbm [shape: bf16[128,256], index: 1, kind: input, shape index: {}]   ;;  %s8755_s2 = inlined_call_operand.hbm [shape: f32[1,256], index: 2, kind: input, shape index: {}]   ;;  %s8756_s3 = inlined_call_operand.hbm [shape: bf16[256,512], index: 3, kind: input, shape index: {}]   ;;  %s8757_s4 = inlined_call_operand.hbm [shape: f32[1,512], index: 4, kind: input, shape index: {}]   ;;  %s8758_s5 = inlined_call_operand.hbm [shape: bf16[512,1024], index: 5, kind: input, shape index: {}]   ;;  %s8759_s6 = inlined_call_operand.hbm [shape: f32[1,1024], index: 6, kind: input, shape index: {}]   ;;  %s8760_s7 = inlined_call_operand.hbm [shape: bf16[1024,896], index: 7, kind: input, shape index: {}]   ;;  %s8761_s8 = inlined_call_operand.hbm [shape: f32[1,896], index: 8, kind: input, shape index: {}]   ;;  %s8762_s9 = inlined_call_operand.vmem [shape: bf16[16,896], index: 9, kind: output, shape index: {}]  }
   0x1   :  { %15 = vsyncpa [#allocation5], 0 }
   0x2   :  { %16 = vsyncpa [#allocation8], 0 }
   0x3   :  { %17 = vsyncpa [#allocation11], 0 }
   0x4   :  { %18 = vsyncpa [#allocation14], 0  ;;  %s8374_s30 = smov [#allocation4]   ;;  %s8375_s11 = smov [#allocation7]  }
   0x5   :  { %s39_s10 = sshll.u32 %s8374_s30, 4  ;;  %s61_s12 = sshll.u32 %s8375_s11, 4  ;;  %s40_s10 = int_to_ptr.vmem [resolvable:$true] %s39_s10  ;;  %s62_s12 = int_to_ptr.vmem [resolvable:$true] %s61_s12 }
   0x6   :  { %s8188_s15 = scalar_lea.hbm %s8755_s2, 32 }
   0x7   :  { %p8189_p0 = scmp.ne.s32.totalorder %s8755_s2, %s8188_s15  ;;  %p8192_p1 = scmp.lt.u32.totalorder %s8188_s15, %s8755_s2 }
   0x9   :  { %p8194_p2 = pnand %p8192_p1, %p8189_p0 }
   0xb   :  { %8197 = shalt.err (!%p8194_p2)
}
   0xc   :  { %s8198_s20 = scalar_lea.vmem %s40_s10, 32  ;;  %p8203_p4 = scmp.lt.s32.totalorder %s40_s10, %s40_s10 }
   0xd   :  { %p8199_p3 = scmp.ne.s32.totalorder %s40_s10, %s8198_s20  ;;  %p8204_p5 = scmp.lt.s32.totalorder %s8198_s20, %s8198_s20 }
   0xf   :  { %p8205_p6 = por %p8204_p5, %p8203_p4 }
  0x11   :  { %p8206_p7 = pnand %p8205_p6, %p8199_p3 }
  0x13   :  { %8209 = shalt.err (!%p8206_p7)
}
  0x14   :  { %42 = dma.hbm_to_vmem [thread:$0]  %s8755_s2, 32, %s40_s10, [#allocation5]  }
  0x15   :  { %s8210_s25 = scalar_lea.hbm %s8757_s4, 64 }
  0x16   :  { %p8211_p8 = scmp.ne.s32.totalorder %s8757_s4, %s8210_s25  ;;  %p8214_p9 = scmp.lt.u32.totalorder %s8210_s25, %s8757_s4 }
  0x18   :  { %p8216_p10 = pnand %p8214_p9, %p8211_p8 }
  0x1a   :  { %8219 = shalt.err (!%p8216_p10)
}
  0x1b   :  { %s8220_s30 = scalar_lea.vmem %s62_s12, 64  ;;  %p8225_p12 = scmp.lt.s32.totalorder %s62_s12, %s62_s12 }
  0x1c   :  { %p8221_p11 = scmp.ne.s32.totalorder %s62_s12, %s8220_s30  ;;  %p8226_p13 = scmp.lt.s32.totalorder %s8220_s30, %s8220_s30 }
  0x1e   :  { %p8227_p0 = por %p8226_p13, %p8225_p12 }
  0x20   :  { %p8228_p1 = pnand %p8227_p0, %p8221_p11 }
  0x22   :  { %8231 = shalt.err (!%p8228_p1)
}
  0x23   :  { %64 = dma.hbm_to_vmem [thread:$0]  %s8757_s4, 64, %s62_s12, [#allocation8]  }
  0x24   :  { %s8376_s11 = smov [#allocation10]   ;;  %s8377_s14 = smov [#allocation2]  }
  0x25   :  { %s83_s13 = sshll.u32 %s8376_s11, 4  ;;  %s26_s15 = sshll.u32 %s8377_s14, 4  ;;  %s84_s13 = int_to_ptr.vmem [resolvable:$true] %s83_s13  ;;  %s8465_s15 = int_to_ptr.vmem [resolvable:$true] %s26_s15 }
  0x26   :  { %s8232_s18 = scalar_lea.hbm %s8759_s6, 128 }
  0x27   :  { %p8233_p2 = scmp.ne.s32.totalorder %s8759_s6, %s8232_s18  ;;  %p8236_p3 = scmp.lt.u32.totalorder %s8232_s18, %s8759_s6 }
  0x29   :  { %p8238_p4 = pnand %p8236_p3, %p8233_p2 }
  0x2b   :  { %8241 = shalt.err (!%p8238_p4)
}
  0x2c   :  { %s8242_s4 = scalar_lea.vmem %s84_s13, 128  ;;  %p8247_p6 = scmp.lt.s32.totalorder %s84_s13, %s84_s13 }
  0x2d   :  { %p8243_p5 = scmp.ne.s32.totalorder %s84_s13, %s8242_s4  ;;  %p8248_p7 = scmp.lt.s32.totalorder %s8242_s4, %s8242_s4 }
  0x2f   :  { %p8249_p8 = por %p8248_p7, %p8247_p6 }
  0x31   :  { %p8250_p9 = pnand %p8249_p8, %p8243_p5 }
  0x33   :  { %8253 = shalt.err (!%p8250_p9)
}
  0x34   :  { %86 = dma.hbm_to_vmem [thread:$0]  %s8759_s6, 128, %s84_s13, [#allocation11]  }
  0x35   :  { %s8254_s26 = scalar_lea.hbm %s8754_s1, 2048 }
  0x36   :  { %p8255_p10 = scmp.ne.s32.totalorder %s8754_s1, %s8254_s26  ;;  %p8258_p11 = scmp.lt.u32.totalorder %s8254_s26, %s8754_s1 }
  0x38   :  { %p8260_p12 = pnand %p8258_p11, %p8255_p10 }
  0x3a   :  { %8263 = shalt.err (!%p8260_p12)
}
  0x3b   :  { %s8264_s2 = scalar_lea.vmem %s8465_s15, 2048  ;;  %p8269_p0 = scmp.lt.s32.totalorder %s8465_s15, %s8465_s15 }
  0x3c   :  { %p8265_p13 = scmp.ne.s32.totalorder %s8465_s15, %s8264_s2  ;;  %p8270_p1 = scmp.lt.s32.totalorder %s8264_s2, %s8264_s2 }
  0x3e   :  { %p8271_p2 = por %p8270_p1, %p8269_p0 }
  0x40   :  { %p8272_p3 = pnand %p8271_p2, %p8265_p13 }
  0x42   :  { %8275 = shalt.err (!%p8272_p3)
}
  0x43   :  { %s8378_s6 = smov 128   ;;  %s8379_s10 = smov 8  }
  0x44   :  { %32 = dma.hbm_to_vmem [thread:$0]  %s8754_s1, 2048, %s8465_s15, [#allocation3], %s8378_s6, %s8378_s6, %s8379_s10  }
  0x45   :  { %s8380_s14 = smov [#allocation6]   ;;  %s8276_s19 = scalar_lea.hbm %s8756_s3, 8192 }
  0x46   :  { %s48_s16 = sshll.u32 %s8380_s14, 4  ;;  %p8277_p4 = scmp.ne.s32.totalorder %s8756_s3, %s8276_s19  ;;  %s49_s16 = int_to_ptr.vmem [resolvable:$true] %s48_s16 }
  0x47   :  { %p8280_p5 = scmp.lt.u32.totalorder %s8276_s19, %s8756_s3 }
  0x49   :  { %p8282_p6 = pnand %p8280_p5, %p8277_p4 }
  0x4b   :  { %8285 = shalt.err (!%p8282_p6)
}
  0x4c   :  { %s8286_s12 = scalar_lea.vmem %s49_s16, 8192  ;;  %p8291_p8 = scmp.lt.s32.totalorder %s49_s16, %s49_s16 }
  0x4d   :  { %p8287_p7 = scmp.ne.s32.totalorder %s49_s16, %s8286_s12  ;;  %p8292_p9 = scmp.lt.s32.totalorder %s8286_s12, %s8286_s12 }
  0x4f   :  { %p8293_p10 = por %p8292_p9, %p8291_p8 }
  0x51   :  { %p8294_p11 = pnand %p8293_p10, %p8287_p7 }
  0x53   :  { %8297 = shalt.err (!%p8294_p11)
}
  0x54   :  { %s8381_s1 = smov 256   ;;  %s8382_s15 = smov 16  }
  0x55   :  { %54 = dma.hbm_to_vmem [thread:$0]  %s8756_s3, 8192, %s49_s16, [#allocation5], %s8381_s1, %s8381_s1, %s8382_s15  }
  0x56   :  { %s8383_s25 = smov [#allocation9]   ;;  %s8298_s29 = scalar_lea.hbm %s8758_s5, 32768 }
  0x57   :  { %s70_s26 = sshll.u32 %s8383_s25, 4  ;;  %p8299_p12 = scmp.ne.s32.totalorder %s8758_s5, %s8298_s29  ;;  %s71_s26 = int_to_ptr.vmem [resolvable:$true] %s70_s26 }
  0x58   :  { %p8302_p13 = scmp.lt.u32.totalorder %s8298_s29, %s8758_s5 }
  0x5a   :  { %p8304_p0 = pnand %p8302_p13, %p8299_p12 }
  0x5c   :  { %8307 = shalt.err (!%p8304_p0)
}
  0x5d   :  { %s8308_s11 = scalar_lea.vmem %s71_s26, 32768  ;;  %p8313_p2 = scmp.lt.s32.totalorder %s71_s26, %s71_s26 }
  0x5e   :  { %p8309_p1 = scmp.ne.s32.totalorder %s71_s26, %s8308_s11  ;;  %p8314_p3 = scmp.lt.s32.totalorder %s8308_s11, %s8308_s11 }
  0x60   :  { %p8315_p4 = por %p8314_p3, %p8313_p2 }
  0x62   :  { %p8316_p5 = pnand %p8315_p4, %p8309_p1 }
  0x64   :  { %8319 = shalt.err (!%p8316_p5)
}
  0x65   :  { %s8384_s3 = smov 512   ;;  %s8385_s13 = smov 32  }
  0x66   :  { %76 = dma.hbm_to_vmem [thread:$0]  %s8758_s5, 32768, %s71_s26, [#allocation8], %s8384_s3, %s8384_s3, %s8385_s13  }
  0x67   :  { %s8386_s17 = smov [#allocation12]   ;;  %s8320_s21 = scalar_lea.hbm %s8760_s7, 57344 }
  0x68   :  { %s92_s18 = sshll.u32 %s8386_s17, 4  ;;  %p8321_p6 = scmp.ne.s32.totalorder %s8760_s7, %s8320_s21  ;;  %s93_s18 = int_to_ptr.vmem [resolvable:$true] %s92_s18 }
  0x69   :  { %p8324_p7 = scmp.lt.u32.totalorder %s8320_s21, %s8760_s7 }
  0x6b   :  { %p8326_p8 = pnand %p8324_p7, %p8321_p6 }
  0x6d   :  { %8329 = shalt.err (!%p8326_p8)
}
  0x6e   :  { %s8330_s15 = scalar_lea.vmem %s93_s18, 57344  ;;  %p8335_p10 = scmp.lt.s32.totalorder %s93_s18, %s93_s18 }
  0x6f   :  { %p8331_p9 = scmp.ne.s32.totalorder %s93_s18, %s8330_s15  ;;  %p8336_p11 = scmp.lt.s32.totalorder %s8330_s15, %s8330_s15 }
  0x71   :  { %p8337_p12 = por %p8336_p11, %p8335_p10 }
  0x73   :  { %p8338_p13 = pnand %p8337_p12, %p8331_p9 }
  0x75   :  { %8341 = shalt.err (!%p8338_p13)
}
  0x76   :  { %s8387_s5 = smov 448   ;;  %s8388_s23 = smov 28  }
  0x77   :  { %98 = dma.hbm_to_vmem [thread:$0]  %s8760_s7, 57344, %s93_s18, [#allocation11], %s8387_s5, %s8387_s5, %s8388_s23  }
  0x78   :  { %s8389_s26 = smov [#allocation13]   ;;  %s8342_s30 = scalar_lea.hbm %s8761_s8, 112 }
  0x79   :  { %s105_s27 = sshll.u32 %s8389_s26, 4  ;;  %p8343_p0 = scmp.ne.s32.totalorder %s8761_s8, %s8342_s30  ;;  %s106_s27 = int_to_ptr.vmem [resolvable:$true] %s105_s27 }
  0x7a   :  { %p8346_p1 = scmp.lt.u32.totalorder %s8342_s30, %s8761_s8 }
  0x7c   :  { %p8348_p2 = pnand %p8346_p1, %p8343_p0 }
  0x7e   :  { %8351 = shalt.err (!%p8348_p2)
}
  0x7f   :  { %s8352_s3 = scalar_lea.vmem %s106_s27, 112  ;;  %s8356_s7 = scalar_lea.vmem %s106_s27, 128 }
  0x80   :  { %p8353_p3 = scmp.ne.s32.totalorder %s106_s27, %s8352_s3  ;;  %p8357_p4 = scmp.lt.s32.totalorder %s106_s27, %s106_s27 }
  0x81   :  { %p8358_p5 = scmp.lt.s32.totalorder %s8356_s7, %s8352_s3 }
  0x83   :  { %p8359_p6 = por %p8358_p5, %p8357_p4 }
  0x85   :  { %p8360_p7 = pnand %p8359_p6, %p8353_p3 }
  0x87   :  { %8363 = shalt.err (!%p8360_p7)
}
  0x88   :  { %108 = dma.hbm_to_vmem [thread:$0]  %s8761_s8, 112, %s106_s27, [#allocation14]  }
  0x89   :  { %8364 = dma.done.wait [#allocation3], 2048  }
  0x8a   :  { %8365 = vsyncadd [#allocation3], 4294965248 }
  0x8b   :  { %8366 = dma.done.wait [#allocation5], 8224  }
  0x8c   :  { %8367 = vsyncadd [#allocation5], 4294959072 }
  0x8d   :  { %8368 = dma.done.wait [#allocation8], 32832  }
  0x8e   :  { %8369 = vsyncadd [#allocation8], 4294934464 }
  0x8f   :  { %8370 = dma.done.wait [#allocation11], 57472  }
  0x90   :  { %8371 = vsyncadd [#allocation11], 4294909824 }
  0x91   :  { %8372 = dma.done.wait [#allocation14], 112  }
  0x92   :  { %8373 = vsyncadd [#allocation14], 4294967184  ;;  %v8390_v0 = vmov 0   ;;  %v7399_v1 = vld [vmem:[#allocation2 + $0x4] ss:$8 sps:$4 sm:$0xff]  }
  0x93   :  { %282 = vmatprep.mubr.bf16.mxu0 %v8390_v0  ;;  %v7401_v2 = vld [vmem:[#allocation2] ss:$8 sps:$4 sm:$0xff]   ;;  %250 = vmatprep.subr.bf16.mxu0 %v7399_v1  ;;  %v7402_v3 = vld [vmem:[#allocation2 + $0x14] ss:$8 sps:$4 sm:$0xff]   ;;  %v7404_v4 = vld [vmem:[#allocation2 + $0x10] ss:$8 sps:$4 sm:$0xff]  }
  0x94   :  { %251 = vmatpush1.bf16.msra.mxu0 %v7401_v2  ;;  %v7405_v5 = vld [vmem:[#allocation2 + $0x24] ss:$8 sps:$4 sm:$0xff]   ;;  %v7407_v6 = vld [vmem:[#allocation2 + $0x20] ss:$8 sps:$4 sm:$0xff]   ;;  %v7408_v7 = vld [vmem:[#allocation2 + $0x34] ss:$8 sps:$4 sm:$0xff]  }
  0x95   :  { %252 = vmatprep.subr.bf16.mxu0 %v7402_v3  ;;  %v7410_v8 = vld [vmem:[#allocation2 + $0x30] ss:$8 sps:$4 sm:$0xff]   ;;  %v7411_v9 = vld [vmem:[#allocation2 + $0x44] ss:$8 sps:$4 sm:$0xff]   ;;  %v7413_v10 = vld [vmem:[#allocation2 + $0x40] ss:$8 sps:$4 sm:$0xff]  }
  0x96   :  { %v7414_v11 = vld [vmem:[#allocation2 + $0x54] ss:$8 sps:$4 sm:$0xff]   ;;  %v7416_v12 = vld [vmem:[#allocation2 + $0x50] ss:$8 sps:$4 sm:$0xff]   ;;  %v7417_v13 = vld [vmem:[#allocation2 + $0x64] ss:$8 sps:$4 sm:$0xff]  }
  0x97   :  { %v7419_v14 = vld [vmem:[#allocation2 + $0x60] ss:$8 sps:$4 sm:$0xff]   ;;  %v7420_v15 = vld [vmem:[#allocation2 + $0x74] ss:$8 sps:$4 sm:$0xff]   ;;  %v7422_v16 = vld [vmem:[#allocation2 + $0x70] ss:$8 sps:$4 sm:$0xff]  }
  0x98   :  { %253 = vmatpush1.bf16.msra.mxu0 %v7404_v4  ;;  %v7426_v17 = vld [vmem:[#allocation6 + $0x4] ss:$16 sps:$4 sm:$0xff]   ;;  %v7424_v19 = vld [vmem:[#allocation6] ss:$16 sps:$4 sm:$0xff]   ;;  %v7474_v50 = vld [vmem:[#allocation6 + $0xc] ss:$16 sps:$4 sm:$0xff]  }
  0x99   :  { %254 = vmatprep.subr.bf16.mxu0 %v7405_v5  ;;  %v7423_v18 = vld [vmem:[%s8753_s0] sm:$0xff]  }
  0x9a   :  { %v7429_v20 = vld [vmem:[#allocation6 + $0x24] ss:$16 sps:$4 sm:$0xff]   ;;  %v7427_v21 = vld [vmem:[#allocation6 + $0x20] ss:$16 sps:$4 sm:$0xff]  }
  0x9b   :  { %v7432_v22 = vld [vmem:[#allocation6 + $0x44] ss:$16 sps:$4 sm:$0xff]   ;;  %v7430_v23 = vld [vmem:[#allocation6 + $0x40] ss:$16 sps:$4 sm:$0xff]  }
  0x9c   :  { %255 = vmatpush1.bf16.msra.mxu0 %v7407_v6  ;;  %v7435_v24 = vld [vmem:[#allocation6 + $0x64] ss:$16 sps:$4 sm:$0xff]   ;;  %v7433_v25 = vld [vmem:[#allocation6 + $0x60] ss:$16 sps:$4 sm:$0xff]  }
  0x9d   :  { %256 = vmatprep.subr.bf16.mxu0 %v7408_v7  ;;  %v7438_v26 = vld [vmem:[#allocation6 + $0x84] ss:$16 sps:$4 sm:$0xff]   ;;  %v7436_v27 = vld [vmem:[#allocation6 + $0x80] ss:$16 sps:$4 sm:$0xff]  }
  0x9e   :  { %v7441_v28 = vld [vmem:[#allocation6 + $0xa4] ss:$16 sps:$4 sm:$0xff]   ;;  %v7439_v29 = vld [vmem:[#allocation6 + $0xa0] ss:$16 sps:$4 sm:$0xff]  }
  0x9f   :  { %v7444_v30 = vld [vmem:[#allocation6 + $0xc4] ss:$16 sps:$4 sm:$0xff]   ;;  %v7442_v31 = vld [vmem:[#allocation6 + $0xc0] ss:$16 sps:$4 sm:$0xff]  }
  0xa0   :  { %257 = vmatpush1.bf16.msra.mxu0 %v7410_v8  ;;  %v7447_v32 = vld [vmem:[#allocation6 + $0xe4] ss:$16 sps:$4 sm:$0xff]   ;;  %v7445_v33 = vld [vmem:[#allocation6 + $0xe0] ss:$16 sps:$4 sm:$0xff]  }
  0xa1   :  { %258 = vmatprep.subr.bf16.mxu0 %v7411_v9  ;;  %v7450_v34 = vld [vmem:[#allocation6 + $0x104] ss:$16 sps:$4 sm:$0xff]   ;;  %v7448_v35 = vld [vmem:[#allocation6 + $0x100] ss:$16 sps:$4 sm:$0xff]  }
  0xa2   :  { %v7453_v36 = vld [vmem:[#allocation6 + $0x124] ss:$16 sps:$4 sm:$0xff]   ;;  %v7451_v37 = vld [vmem:[#allocation6 + $0x120] ss:$16 sps:$4 sm:$0xff]  }
  0xa3   :  { %v7456_v38 = vld [vmem:[#allocation6 + $0x144] ss:$16 sps:$4 sm:$0xff]   ;;  %v7454_v39 = vld [vmem:[#allocation6 + $0x140] ss:$16 sps:$4 sm:$0xff]  }
  0xa4   :  { %259 = vmatpush1.bf16.msra.mxu0 %v7413_v10  ;;  %v7459_v40 = vld [vmem:[#allocation6 + $0x164] ss:$16 sps:$4 sm:$0xff]   ;;  %v7457_v41 = vld [vmem:[#allocation6 + $0x160] ss:$16 sps:$4 sm:$0xff]  }
  0xa5   :  { %260 = vmatprep.subr.bf16.mxu0 %v7414_v11  ;;  %v7462_v42 = vld [vmem:[#allocation6 + $0x184] ss:$16 sps:$4 sm:$0xff]   ;;  %v7460_v43 = vld [vmem:[#allocation6 + $0x180] ss:$16 sps:$4 sm:$0xff]  }
  0xa6   :  { %v7465_v44 = vld [vmem:[#allocation6 + $0x1a4] ss:$16 sps:$4 sm:$0xff]   ;;  %v7463_v45 = vld [vmem:[#allocation6 + $0x1a0] ss:$16 sps:$4 sm:$0xff]  }
  0xa7   :  { %v7468_v46 = vld [vmem:[#allocation6 + $0x1c4] ss:$16 sps:$4 sm:$0xff]   ;;  %v7466_v47 = vld [vmem:[#allocation6 + $0x1c0] ss:$16 sps:$4 sm:$0xff]  }
  0xa8   :  { %261 = vmatpush1.bf16.msra.mxu0 %v7416_v12  ;;  %v7471_v48 = vld [vmem:[#allocation6 + $0x1e4] ss:$16 sps:$4 sm:$0xff]   ;;  %v7469_v49 = vld [vmem:[#allocation6 + $0x1e0] ss:$16 sps:$4 sm:$0xff]  }
  0xa9   :  { %262 = vmatprep.subr.bf16.mxu0 %v7417_v13  ;;  %v827_v51 = vld [vmem:[#allocation9] sm:$0xff] }
  0xaa   :  { %v831_v52 = vld [vmem:[#allocation9 + $0x20] sm:$0xff] }
  0xab   :  { %v6495_v53 = vcombine.high %v827_v51, %v831_v52  ;;  %v6494_v54 = vcombine.low %v827_v51, %v831_v52  ;;  %v835_v55 = vld [vmem:[#allocation9 + $0x40] sm:$0xff] }
  0xac   :  { %263 = vmatpush1.bf16.msra.mxu0 %v7419_v14  ;;  %v839_v56 = vld [vmem:[#allocation9 + $0x60] sm:$0xff] }
  0xad   :  { %264 = vmatprep.subr.bf16.mxu0 %v7420_v15  ;;  %v6503_v57 = vcombine.high %v835_v55, %v839_v56  ;;  %2405 = vmatprep.subr.bf16.mxu1 %v6495_v53  ;;  %v6502_v58 = vcombine.low %v835_v55, %v839_v56  ;;  %v843_v59 = vld [vmem:[#allocation9 + $0x80] sm:$0xff] }
  0xae   :  { %2406 = vmatpush1.bf16.msra.mxu1 %v6494_v54  ;;  %v847_v60 = vld [vmem:[#allocation9 + $0xa0] sm:$0xff] }
  0xaf   :  { %2407 = vmatprep.subr.bf16.mxu1 %v6503_v57  ;;  %v6511_v61 = vcombine.high %v843_v59, %v847_v60  ;;  %v6510_v62 = vcombine.low %v843_v59, %v847_v60  ;;  %v851_v63 = vld [vmem:[#allocation9 + $0xc0] sm:$0xff] }
  0xb0   :  { %265 = vmatpush1.bf16.msra.mxu0 %v7422_v16  ;;  %v855_v0 = vld [vmem:[#allocation9 + $0xe0] sm:$0xff] }
  0xb1   :  { %713 = vmatprep.subr.bf16.mxu0 %v7426_v17  ;;  %v6519_v1 = vcombine.high %v851_v63, %v855_v0  ;;  %v6518_v2 = vcombine.low %v851_v63, %v855_v0  ;;  %v859_v3 = vld [vmem:[#allocation9 + $0x100] sm:$0xff] }
  0xb2   :  { %2408 = vmatpush1.bf16.msra.mxu1 %v6502_v58  ;;  %v863_v4 = vld [vmem:[#allocation9 + $0x120] sm:$0xff] }
  0xb3   :  { %283 = vmatmul.mubr.bf16.vlgmr.msra.gmra.mrb[0].mxu0 %v7423_v18  ;;  %2409 = vmatprep.subr.bf16.mxu1 %v6511_v61  ;;  %v6527_v5 = vcombine.high %v859_v3, %v863_v4  ;;  %v6526_v6 = vcombine.low %v859_v3, %v863_v4  ;;  %v867_v7 = vld [vmem:[#allocation9 + $0x140] sm:$0xff]  ;;  %v7477_v4 = vld [vmem:[#allocation6 + $0x2c] ss:$16 sps:$4 sm:$0xff]  }
  0xb4   :  { %714 = vmatpush1.bf16.msra.mxu0 %v7424_v19  ;;  %v871_v8 = vld [vmem:[#allocation9 + $0x160] sm:$0xff] }
  0xb5   :  { %715 = vmatprep.subr.bf16.mxu0 %v7429_v20  ;;  %v6535_v9 = vcombine.high %v867_v7, %v871_v8  ;;  %v6534_v10 = vcombine.low %v867_v7, %v871_v8  ;;  %v875_v11 = vld [vmem:[#allocation9 + $0x180] sm:$0xff]  ;;  %v7483_v8 = vld [vmem:[#allocation6 + $0x6c] ss:$16 sps:$4 sm:$0xff]  }
  0xb6   :  { %2410 = vmatpush1.bf16.msra.mxu1 %v6510_v62  ;;  %v879_v12 = vld [vmem:[#allocation9 + $0x1a0] sm:$0xff] }
  0xb7   :  { %2411 = vmatprep.subr.bf16.mxu1 %v6519_v1  ;;  %v6543_v13 = vcombine.high %v875_v11, %v879_v12  ;;  %v6542_v14 = vcombine.low %v875_v11, %v879_v12  ;;  %v883_v15 = vld [vmem:[#allocation9 + $0x1c0] sm:$0xff]  ;;  %v7489_v12 = vld [vmem:[#allocation6 + $0xac] ss:$16 sps:$4 sm:$0xff]  }
  0xb8   :  { %716 = vmatpush1.bf16.msra.mxu0 %v7427_v21  ;;  %v887_v16 = vld [vmem:[#allocation9 + $0x1e0] sm:$0xff] }
  0xb9   :  { %717 = vmatprep.subr.bf16.mxu0 %v7432_v22  ;;  %v6551_v17 = vcombine.high %v883_v15, %v887_v16  ;;  %v6550_v18 = vcombine.low %v883_v15, %v887_v16  ;;  %v891_v19 = vld [vmem:[#allocation9 + $0x200] sm:$0xff]  ;;  %v7495_v16 = vld [vmem:[#allocation6 + $0xec] ss:$16 sps:$4 sm:$0xff]  }
  0xba   :  { %2412 = vmatpush1.bf16.msra.mxu1 %v6518_v2  ;;  %v895_v20 = vld [vmem:[#allocation9 + $0x220] sm:$0xff] }
  0xbb   :  { %2413 = vmatprep.subr.bf16.mxu1 %v6527_v5  ;;  %v6559_v21 = vcombine.high %v891_v19, %v895_v20  ;;  %v6558_v22 = vcombine.low %v891_v19, %v895_v20  ;;  %v7472_v3 = vld [vmem:[#allocation6 + $0x8] ss:$16 sps:$4 sm:$0xff]   ;;  %v7501_v20 = vld [vmem:[#allocation6 + $0x12c] ss:$16 sps:$4 sm:$0xff]  }
  0xbc   :  { %718 = vmatpush1.bf16.msra.mxu0 %v7430_v23  ;;  %v899_v23 = vld [vmem:[#allocation9 + $0x240] sm:$0xff] }
  0xbd   :  { %719 = vmatprep.subr.bf16.mxu0 %v7435_v24  ;;  %v903_v24 = vld [vmem:[#allocation9 + $0x260] sm:$0xff] }
  0xbe   :  { %2414 = vmatpush1.bf16.msra.mxu1 %v6526_v6  ;;  %v7475_v5 = vld [vmem:[#allocation6 + $0x28] ss:$16 sps:$4 sm:$0xff]   ;;  %v7480_v6 = vld [vmem:[#allocation6 + $0x4c] ss:$16 sps:$4 sm:$0xff]  }
  0xbf   :  { %2415 = vmatprep.subr.bf16.mxu1 %v6535_v9  ;;  %v7478_v7 = vld [vmem:[#allocation6 + $0x48] ss:$16 sps:$4 sm:$0xff]  }
  0xc0   :  { %720 = vmatpush1.bf16.msra.mxu0 %v7433_v25  ;;  %v6567_v25 = vcombine.high %v899_v23, %v903_v24  ;;  %v7481_v9 = vld [vmem:[#allocation6 + $0x68] ss:$16 sps:$4 sm:$0xff]  }
  0xc1   :  { %721 = vmatprep.subr.bf16.mxu0 %v7438_v26  ;;  %v6566_v26 = vcombine.low %v899_v23, %v903_v24  ;;  %v7484_v11 = vld [vmem:[#allocation6 + $0x88] ss:$16 sps:$4 sm:$0xff]   ;;  %v7507_v24 = vld [vmem:[#allocation6 + $0x16c] ss:$16 sps:$4 sm:$0xff]  }
  0xc2   :  { %2416 = vmatpush1.bf16.msra.mxu1 %v6534_v10  ;;  %v7486_v10 = vld [vmem:[#allocation6 + $0x8c] ss:$16 sps:$4 sm:$0xff]   ;;  %v7490_v15 = vld [vmem:[#allocation6 + $0xc8] ss:$16 sps:$4 sm:$0xff]  }
  0xc3   :  { %2417 = vmatprep.subr.bf16.mxu1 %v6543_v13  ;;  %v7487_v13 = vld [vmem:[#allocation6 + $0xa8] ss:$16 sps:$4 sm:$0xff]  }
  0xc4   :  { %722 = vmatpush1.bf16.msra.mxu0 %v7436_v27  ;;  %v154_v27 = vlaneseq  ;;  %v7496_v19 = vld [vmem:[#allocation6 + $0x108] ss:$16 sps:$4 sm:$0xff]  }
  0xc5   :  { %723 = vmatprep.subr.bf16.mxu0 %v7441_v28  ;;  %v907_v28 = vld [vmem:[#allocation9 + $0x280] sm:$0xff] }
  0xc6   :  { %2418 = vmatpush1.bf16.msra.mxu1 %v6542_v14  ;;  %v7492_v14 = vld [vmem:[#allocation6 + $0xcc] ss:$16 sps:$4 sm:$0xff]   ;;  %v7502_v23 = vld [vmem:[#allocation6 + $0x148] ss:$16 sps:$4 sm:$0xff]  }
  0xc7   :  { %2419 = vmatprep.subr.bf16.mxu1 %v6551_v17  ;;  %v7493_v17 = vld [vmem:[#allocation6 + $0xe8] ss:$16 sps:$4 sm:$0xff]  }
  0xc8   :  { %724 = vmatpush1.bf16.msra.mxu0 %v7439_v29  ;;  %v911_v29 = vld [vmem:[#allocation9 + $0x2a0] sm:$0xff] }
  0xc9   :  { %725 = vmatprep.subr.bf16.mxu0 %v7444_v30  ;;  %v6575_v30 = vcombine.high %v907_v28, %v911_v29 }
  0xca   :  { %2420 = vmatpush1.bf16.msra.mxu1 %v6550_v18  ;;  %v7498_v18 = vld [vmem:[#allocation6 + $0x10c] ss:$16 sps:$4 sm:$0xff]  }
  0xcb   :  { %2421 = vmatprep.subr.bf16.mxu1 %v6559_v21  ;;  %v7499_v21 = vld [vmem:[#allocation6 + $0x128] ss:$16 sps:$4 sm:$0xff]  }
  0xcc   :  { %726 = vmatpush1.bf16.msra.mxu0 %v7442_v31  ;;  %v6574_v31 = vcombine.low %v907_v28, %v911_v29  ;;  %v7513_v28 = vld [vmem:[#allocation6 + $0x1ac] ss:$16 sps:$4 sm:$0xff]   ;;  %v7511_v29 = vld [vmem:[#allocation6 + $0x1a8] ss:$16 sps:$4 sm:$0xff]  }
  0xcd   :  { %727 = vmatprep.subr.bf16.mxu0 %v7447_v32  ;;  %v8547_v32 = vshrl.u32 %v154_v27, 7  ;;  %v7508_v27 = vld [vmem:[#allocation6 + $0x188] ss:$16 sps:$4 sm:$0xff]  }
  0xce   :  { %2422 = vmatpush1.bf16.msra.mxu1 %v6558_v22  ;;  %v7504_v22 = vld [vmem:[#allocation6 + $0x14c] ss:$16 sps:$4 sm:$0xff]  }
  0xcf   :  { %2423 = vmatprep.subr.bf16.mxu1 %v6567_v25  ;;  %v7505_v25 = vld [vmem:[#allocation6 + $0x168] ss:$16 sps:$4 sm:$0xff]  }
  0xd0   :  { %728 = vmatpush1.bf16.msra.mxu0 %v7445_v33  ;;  %v915_v33 = vld [vmem:[#allocation9 + $0x2c0] sm:$0xff] }
  0xd1   :  { %729 = vmatprep.subr.bf16.mxu0 %v7450_v34  ;;  %v919_v34 = vld [vmem:[#allocation9 + $0x2e0] sm:$0xff] }
  0xd2   :  { %2424 = vmatpush1.bf16.msra.mxu1 %v6566_v26  ;;  %v7510_v26 = vld [vmem:[#allocation6 + $0x18c] ss:$16 sps:$4 sm:$0xff]  }
  0xd3   :  { %2425 = vmatprep.subr.bf16.mxu1 %v6575_v30  ;;  %v7516_v30 = vld [vmem:[#allocation6 + $0x1cc] ss:$16 sps:$4 sm:$0xff]  }
  0xd4   :  { %730 = vmatpush1.bf16.msra.mxu0 %v7448_v35  ;;  %v6583_v35 = vcombine.high %v915_v33, %v919_v34 }
  0xd5   :  { %731 = vmatprep.subr.bf16.mxu0 %v7453_v36  ;;  %v6582_v36 = vcombine.low %v915_v33, %v919_v34  ;;  %v7519_v33 = vld [vmem:[#allocation6 + $0x1ec] ss:$16 sps:$4 sm:$0xff]  }
  0xd6   :  { %2426 = vmatpush1.bf16.msra.mxu1 %v6574_v31  ;;  %v7514_v31 = vld [vmem:[#allocation6 + $0x1c8] ss:$16 sps:$4 sm:$0xff]   ;;  %v828_v34 = vld [vmem:[#allocation9 + $0x8] sm:$0xff] }
  0xd7   :  { %2427 = vmatprep.subr.bf16.mxu1 %v6583_v35  ;;  %v832_v35 = vld [vmem:[#allocation9 + $0x28] sm:$0xff] }
  0xd8   :  { %732 = vmatpush1.bf16.msra.mxu0 %v7451_v37  ;;  %v8550_v37 = vsub.s32 0, %v8547_v32 }
  0xd9   :  { %733 = vmatprep.subr.bf16.mxu0 %v7456_v38  ;;  %v923_v38 = vld [vmem:[#allocation9 + $0x300] sm:$0xff] }
  0xda   :  { %2428 = vmatpush1.bf16.msra.mxu1 %v6582_v36  ;;  %v7517_v36 = vld [vmem:[#allocation6 + $0x1e8] ss:$16 sps:$4 sm:$0xff]  }
  0xdc   :  { %734 = vmatpush1.bf16.msra.mxu0 %v7454_v39  ;;  %v927_v39 = vld [vmem:[#allocation9 + $0x320] sm:$0xff] }
  0xdd   :  { %735 = vmatprep.subr.bf16.mxu0 %v7459_v40  ;;  %v152_v40 = vld [vmem:[#allocation4] sm:$0x3] }
  0xe0   :  { %736 = vmatpush1.bf16.msra.mxu0 %v7457_v41  ;;  %v8553_v41 = vsub.s32 1, %v8547_v32 }
  0xe1   :  { %737 = vmatprep.subr.bf16.mxu0 %v7462_v42  ;;  %v6591_v42 = vcombine.high %v923_v38, %v927_v39 }
  0xe3   :  { %2429 = vmatprep.subr.bf16.mxu1 %v6591_v42  ;;  %v6496_v42 = vcombine.low %v828_v34, %v832_v35 }
  0xe4   :  { %738 = vmatpush1.bf16.msra.mxu0 %v7460_v43  ;;  %v6590_v43 = vcombine.low %v923_v38, %v927_v39  ;;  %v6497_v38 = vcombine.high %v828_v34, %v832_v35  ;;  %v836_v39 = vld [vmem:[#allocation9 + $0x48] sm:$0xff] }
  0xe5   :  { %739 = vmatprep.subr.bf16.mxu0 %v7465_v44  ;;  %v157_v44 = vrot.slane %v152_v40, %v8550_v37  ;;  %v920_v34 = vld [vmem:[#allocation9 + $0x2e8] sm:$0xff] }
  0xe6   :  { %2430 = vmatpush1.bf16.msra.mxu1 %v6590_v43 }
  0xe8   :  { %740 = vmatpush1.bf16.msra.mxu0 %v7463_v45  ;;  %v8556_v45 = vld [vmem:[#allocation9 + $0x340] sm:$0xff] }
  0xe9   :  { %741 = vmatprep.subr.bf16.mxu0 %v7468_v46  ;;  %v8558_v46 = vld [vmem:[#allocation9 + $0x360] sm:$0xff] }
  0xec   :  { %742 = vmatpush1.bf16.msra.mxu0 %v7466_v47  ;;  %v161_v47 = vrot.slane %v152_v40, %v8553_v41  ;;  %v840_v40 = vld [vmem:[#allocation9 + $0x68] sm:$0xff] }
  0xed   :  { %743 = vmatprep.subr.bf16.mxu0 %v7471_v48  ;;  %v6599_v48 = vcombine.high %v8556_v45, %v8558_v46  ;;  %v6505_v43 = vcombine.high %v836_v39, %v840_v40 }
  0xef   :  { %2431 = vmatprep.subr.bf16.mxu1 %v6599_v48  ;;  %v6504_v48 = vcombine.low %v836_v39, %v840_v40  ;;  %v928_v39 = vld [vmem:[#allocation9 + $0x328] sm:$0xff] }
  0xf0   :  { %744 = vmatpush1.bf16.msra.mxu0 %v7469_v49 }
  0xf1   :  { %756 = vmatprep.subr.bf16.mxu0 %v7474_v50 }
 0x186   :  { %v284_v49 = vpop.f32.mrb[0].mxu0 }
 0x187   :  { %v285_v50 = vadd.f32 %v284_v49, %v157_v44  ;;  %v286_v51 = vpop.f32.mrb[1].mxu0 }
 0x188   :  { %v287_v52 = vadd.f32 %v286_v51, %v161_v47  ;;  %v288_v53 = vpop.f32.mrb[2].mxu0  ;;  %v856_v51 = vld [vmem:[#allocation9 + $0xe8] sm:$0xff] }
 0x189   :  { %v297_v54 = vmul.f32 0.2, %v285_v50  ;;  %v289_v55 = vadd.f32 %v288_v53, %v157_v44  ;;  %v290_v56 = vpop.f32.mrb[3].mxu0  ;;  %vm293_vm0 = vcmp.gt.f32.partialorder %v285_v50, 0.0  ;;  %v844_v44 = vld [vmem:[#allocation9 + $0x88] sm:$0xff] }
 0x18a   :  { %v298_v57 = vmul.f32 0.2, %v287_v52  ;;  %v291_v58 = vadd.f32 %v290_v56, %v161_v47  ;;  %vm294_vm1 = vcmp.gt.f32.partialorder %v287_v52, 0.0  ;;  %v848_v47 = vld [vmem:[#allocation9 + $0xa8] sm:$0xff] }
 0x18b   :  { %vm295_vm2 = vcmp.gt.f32.partialorder %v289_v55, 0.0  ;;  %v299_v59 = vmul.f32 0.2, %v289_v55  ;;  %v301_v61 = vsel %vm293_vm0, %v285_v50, %v297_v54  ;;  %v6513_v49 = vcombine.high %v844_v44, %v848_v47  ;;  %v852_v50 = vld [vmem:[#allocation9 + $0xc8] sm:$0xff] }
 0x18c   :  { %vm296_vm3 = vcmp.gt.f32.partialorder %v291_v58, 0.0  ;;  %v300_v60 = vmul.f32 0.2, %v291_v58  ;;  %v302_v0 = vsel %vm294_vm1, %v287_v52, %v298_v57  ;;  %v6512_v52 = vcombine.low %v844_v44, %v848_v47  ;;  %v860_v54 = vld [vmem:[#allocation9 + $0x108] sm:$0xff] }
 0x18d   :  { %v303_v62 = vsel %vm295_vm2, %v289_v55, %v299_v59  ;;  %v6521_v53 = vcombine.high %v852_v50, %v856_v51  ;;  %v864_v55 = vld [vmem:[#allocation9 + $0x128] sm:$0xff]  ;;  %v6520_v56 = vcombine.low %v852_v50, %v856_v51 }
 0x18e   :  { %v8563_v63 = vpack.c.bf16 %v303_v62, %v301_v61  ;;  %v304_v1 = vsel %vm296_vm3, %v291_v58, %v300_v60  ;;  %v6529_v57 = vcombine.high %v860_v54, %v864_v55  ;;  %v868_v58 = vld [vmem:[#allocation9 + $0x148] sm:$0xff]  ;;  %v6528_v60 = vcombine.low %v860_v54, %v864_v55 }
 0x18f   :  { %v306_v2 = vpack.c.bf16 %v304_v1, %v302_v0  ;;  %v872_v59 = vld [vmem:[#allocation9 + $0x168] sm:$0xff] }
 0x190   :  { %v6537_v61 = vcombine.high %v868_v58, %v872_v59  ;;  %v876_v62 = vld [vmem:[#allocation9 + $0x188] sm:$0xff]  ;;  %v6536_v0 = vcombine.low %v868_v58, %v872_v59  ;;  %v8585_v59 = vld [vmem:[#allocation7] sm:$0xf] }
 0x191   :  { %745 = vmatprep.mubr.bf16.mxu0 %v306_v2  ;;  %v936_v44 = vld [vmem:[#allocation9 + $0x368] sm:$0xff] }
 0x192   :  { %746 = vmatmul.mubr.bf16.vlgmr.msra.gmra.mrb[4].mxu0 %v8563_v63  ;;  %v944_v50 = vld [vmem:[#allocation9 + $0x3a8] sm:$0xff] }
 0x193   :  { %757 = vmatpush1.bf16.msra.mxu0 %v7472_v3  ;;  %788 = vmatprep.mubr.bf16.mxu0 %v306_v2  ;;  %v6598_v2 = vcombine.low %v8556_v45, %v8558_v46  ;;  %v884_v3 = vld [vmem:[#allocation9 + $0x1c8] sm:$0xff] }
 0x194   :  { %758 = vmatprep.subr.bf16.mxu0 %v7477_v4  ;;  %v888_v4 = vld [vmem:[#allocation9 + $0x1e8] sm:$0xff] }
 0x195   :  { %2432 = vmatpush1.bf16.msra.mxu1 %v6598_v2  ;;  %v952_v54 = vld [vmem:[#allocation9 + $0x3e8] sm:$0xff] }
 0x197   :  { %759 = vmatpush1.bf16.msra.mxu0 %v7475_v5  ;;  %v939_v5 = vld [vmem:[#allocation9 + $0x380] sm:$0xff] }
 0x198   :  { %760 = vmatprep.subr.bf16.mxu0 %v7480_v6  ;;  %v943_v6 = vld [vmem:[#allocation9 + $0x3a0] sm:$0xff] }
 0x19b   :  { %761 = vmatpush1.bf16.msra.mxu0 %v7478_v7 }
 0x19c   :  { %762 = vmatprep.subr.bf16.mxu0 %v7483_v8  ;;  %v6607_v8 = vcombine.high %v939_v5, %v943_v6 }
 0x19e   :  { %2433 = vmatprep.subr.bf16.mxu1 %v6607_v8 }
 0x19f   :  { %763 = vmatpush1.bf16.msra.mxu0 %v7481_v9  ;;  %v6553_v9 = vcombine.high %v884_v3, %v888_v4 }
 0x1a0   :  { %764 = vmatprep.subr.bf16.mxu0 %v7486_v10  ;;  %v6606_v10 = vcombine.low %v939_v5, %v943_v6 }
 0x1a2   :  { %2434 = vmatpush1.bf16.msra.mxu1 %v6606_v10  ;;  %v963_v10 = vld [vmem:[#allocation9 + $0x440] sm:$0xff] }
 0x1a3   :  { %765 = vmatpush1.bf16.msra.mxu0 %v7484_v11  ;;  %v892_v11 = vld [vmem:[#allocation9 + $0x208] sm:$0xff] }
 0x1a4   :  { %766 = vmatprep.subr.bf16.mxu0 %v7489_v12  ;;  %v896_v12 = vld [vmem:[#allocation9 + $0x228] sm:$0xff] }
 0x1a5   :  { %v6561_v46 = vcombine.high %v892_v11, %v896_v12 }
 0x1a7   :  { %767 = vmatpush1.bf16.msra.mxu0 %v7487_v13  ;;  %v947_v13 = vld [vmem:[#allocation9 + $0x3c0] sm:$0xff] }
 0x1a8   :  { %768 = vmatprep.subr.bf16.mxu0 %v7492_v14  ;;  %v951_v14 = vld [vmem:[#allocation9 + $0x3e0] sm:$0xff] }
 0x1a9   :  { %v6615_v45 = vcombine.high %v947_v13, %v951_v14 }
 0x1ab   :  { %769 = vmatpush1.bf16.msra.mxu0 %v7490_v15  ;;  %v6552_v15 = vcombine.low %v884_v3, %v888_v4  ;;  %2435 = vmatprep.subr.bf16.mxu1 %v6615_v45 }
 0x1ac   :  { %770 = vmatprep.subr.bf16.mxu0 %v7495_v16  ;;  %v6614_v16 = vcombine.low %v947_v13, %v951_v14  ;;  %v967_v13 = vld [vmem:[#allocation9 + $0x460] sm:$0xff]  ;;  %v964_v14 = vld [vmem:[#allocation9 + $0x448] sm:$0xff] }
 0x1ae   :  { %2436 = vmatpush1.bf16.msra.mxu1 %v6614_v16 }
 0x1af   :  { %771 = vmatpush1.bf16.msra.mxu0 %v7493_v17  ;;  %v900_v17 = vld [vmem:[#allocation9 + $0x248] sm:$0xff] }
 0x1b0   :  { %772 = vmatprep.subr.bf16.mxu0 %v7498_v18  ;;  %v904_v18 = vld [vmem:[#allocation9 + $0x268] sm:$0xff] }
 0x1b3   :  { %773 = vmatpush1.bf16.msra.mxu0 %v7496_v19  ;;  %v8569_v19 = vld [vmem:[#allocation9 + $0x400] sm:$0xff] }
 0x1b4   :  { %774 = vmatprep.subr.bf16.mxu0 %v7501_v20  ;;  %v8571_v20 = vld [vmem:[#allocation9 + $0x420] sm:$0xff] }
 0x1b7   :  { %775 = vmatpush1.bf16.msra.mxu0 %v7499_v21  ;;  %v8573_v21 = vld [vmem:[#allocation9 + $0x408] sm:$0xff] }
 0x1b8   :  { %776 = vmatprep.subr.bf16.mxu0 %v7504_v22  ;;  %v6560_v22 = vcombine.low %v892_v11, %v896_v12 }
 0x1bb   :  { %777 = vmatpush1.bf16.msra.mxu0 %v7502_v23  ;;  %v6623_v23 = vcombine.high %v8569_v19, %v8571_v20 }
 0x1bc   :  { %778 = vmatprep.subr.bf16.mxu0 %v7507_v24  ;;  %v8577_v24 = vld [vmem:[#allocation9 + $0x428] sm:$0xff] }
 0x1bd   :  { %2448 = vmatprep.subr.bf16.mxu1 %v6623_v23  ;;  %v6625_v58 = vcombine.high %v8573_v21, %v8577_v24  ;;  %v971_v23 = vld [vmem:[#allocation9 + $0x480] sm:$0xff] }
 0x1bf   :  { %779 = vmatpush1.bf16.msra.mxu0 %v7505_v25  ;;  %v6569_v25 = vcombine.high %v900_v17, %v904_v18 }
 0x1c0   :  { %780 = vmatprep.subr.bf16.mxu0 %v7510_v26  ;;  %v6622_v26 = vcombine.low %v8569_v19, %v8571_v20 }
 0x1c3   :  { %781 = vmatpush1.bf16.msra.mxu0 %v7508_v27  ;;  %v6624_v27 = vcombine.low %v8573_v21, %v8577_v24  ;;  %v987_v21 = vld [vmem:[#allocation9 + $0x500] sm:$0xff] }
 0x1c4   :  { %782 = vmatprep.subr.bf16.mxu0 %v7513_v28  ;;  %v908_v28 = vld [vmem:[#allocation9 + $0x288] sm:$0xff]  ;;  %v991_v24 = vld [vmem:[#allocation9 + $0x520] sm:$0xff] }
 0x1c7   :  { %783 = vmatpush1.bf16.msra.mxu0 %v7511_v29  ;;  %v912_v29 = vld [vmem:[#allocation9 + $0x2a8] sm:$0xff] }
 0x1c8   :  { %784 = vmatprep.subr.bf16.mxu0 %v7516_v30  ;;  %v6568_v30 = vcombine.low %v900_v17, %v904_v18  ;;  %v6576_v35 = vcombine.low %v908_v28, %v912_v29  ;;  %v6631_v18 = vcombine.high %v963_v10, %v967_v13 }
 0x1cb   :  { %785 = vmatpush1.bf16.msra.mxu0 %v7514_v31  ;;  %v6577_v31 = vcombine.high %v908_v28, %v912_v29  ;;  %v972_v28 = vld [vmem:[#allocation9 + $0x488] sm:$0xff] }
 0x1cc   :  { %786 = vmatprep.subr.bf16.mxu0 %v7519_v33  ;;  %v916_v33 = vld [vmem:[#allocation9 + $0x2c8] sm:$0xff] }
 0x1cd   :  { %v6584_v40 = vcombine.low %v916_v33, %v920_v34  ;;  %v976_v29 = vld [vmem:[#allocation9 + $0x4a8] sm:$0xff] }
 0x1cf   :  { %787 = vmatpush1.bf16.msra.mxu0 %v7517_v36  ;;  %v6585_v36 = vcombine.high %v916_v33, %v920_v34  ;;  %v6641_v34 = vcombine.high %v972_v28, %v976_v29 }
 0x1d0   :  { %2491 = vmatprep.subr.bf16.mxu0 %v6497_v38  ;;  %v924_v38 = vld [vmem:[#allocation9 + $0x308] sm:$0xff] }
 0x1d1   :  { %v6592_v47 = vcombine.low %v924_v38, %v928_v39 }
 0x1d2   :  { %789 = vmatmul.mubr.bf16.vlgmr.msra.gmra.mrb[8].mxu0 %v8563_v63  ;;  %v880_v63 = vld [vmem:[#allocation9 + $0x1a8] sm:$0xff] }
 0x1d3   :  { %2492 = vmatpush1.bf16.msra.mxu0 %v6496_v42  ;;  %v6545_v1 = vcombine.high %v876_v62, %v880_v63  ;;  %v6544_v7 = vcombine.low %v876_v62, %v880_v63  ;;  %v6593_v42 = vcombine.high %v924_v38, %v928_v39  ;;  %v980_v38 = vld [vmem:[#allocation9 + $0x4c8] sm:$0xff] }
 0x1d4   :  { %2493 = vmatprep.subr.bf16.mxu0 %v6505_v43  ;;  %v932_v43 = vld [vmem:[#allocation9 + $0x348] sm:$0xff] }
 0x1d5   :  { %v6600_v51 = vcombine.low %v932_v43, %v936_v44  ;;  %v984_v39 = vld [vmem:[#allocation9 + $0x4e8] sm:$0xff] }
 0x1d6   :  { %v6649_v20 = vcombine.high %v980_v38, %v984_v39 }
 0x1d7   :  { %2494 = vmatpush1.bf16.msra.mxu0 %v6504_v48  ;;  %v6601_v48 = vcombine.high %v932_v43, %v936_v44  ;;  %v6648_v44 = vcombine.low %v980_v38, %v984_v39 }
 0x1d8   :  { %2495 = vmatprep.subr.bf16.mxu0 %v6513_v49  ;;  %v940_v49 = vld [vmem:[#allocation9 + $0x388] sm:$0xff] }
 0x1d9   :  { %v6608_v55 = vcombine.low %v940_v49, %v944_v50 }
 0x1db   :  { %2496 = vmatpush1.bf16.msra.mxu0 %v6512_v52  ;;  %v6609_v52 = vcombine.high %v940_v49, %v944_v50  ;;  %v995_v49 = vld [vmem:[#allocation9 + $0x540] sm:$0xff] }
 0x1dc   :  { %2497 = vmatprep.subr.bf16.mxu0 %v6521_v53  ;;  %v948_v53 = vld [vmem:[#allocation9 + $0x3c8] sm:$0xff]  ;;  %v999_v50 = vld [vmem:[#allocation9 + $0x560] sm:$0xff] }
 0x1df   :  { %2498 = vmatpush1.bf16.msra.mxu0 %v6520_v56  ;;  %v6617_v56 = vcombine.high %v948_v53, %v952_v54 }
 0x1e0   :  { %2499 = vmatprep.subr.bf16.mxu0 %v6529_v57  ;;  %v6616_v57 = vcombine.low %v948_v53, %v952_v54  ;;  %v6654_v53 = vcombine.low %v987_v21, %v991_v24 }
 0x1e3   :  { %2500 = vmatpush1.bf16.msra.mxu0 %v6528_v60  ;;  %v376_v60 = vrot.slane %v8585_v59, %v8550_v37 }
 0x1e4   :  { %2501 = vmatprep.subr.bf16.mxu0 %v6537_v61  ;;  %v380_v61 = vrot.slane %v8585_v59, %v8553_v41 }
 0x1e7   :  { %2502 = vmatpush1.bf16.msra.mxu0 %v6536_v0 }
 0x1e8   :  { %2503 = vmatprep.subr.bf16.mxu0 %v6545_v1 }
 0x1eb   :  { %2504 = vmatpush1.bf16.msra.mxu0 %v6544_v7 }
 0x1ec   :  { %2505 = vmatprep.subr.bf16.mxu0 %v6553_v9 }
 0x1ef   :  { %2506 = vmatpush1.bf16.msra.mxu0 %v6552_v15  ;;  %v968_v15 = vld [vmem:[#allocation9 + $0x468] sm:$0xff] }
 0x1f0   :  { %2507 = vmatprep.subr.bf16.mxu0 %v6561_v46 }
 0x1f3   :  { %2508 = vmatpush1.bf16.msra.mxu0 %v6560_v22  ;;  %v6633_v22 = vcombine.high %v964_v14, %v968_v15 }
 0x1f4   :  { %2509 = vmatprep.subr.bf16.mxu0 %v6569_v25  ;;  %v975_v25 = vld [vmem:[#allocation9 + $0x4a0] sm:$0xff] }
 0x1f5   :  { %v6639_v33 = vcombine.high %v971_v23, %v975_v25 }
 0x1f7   :  { %2510 = vmatpush1.bf16.msra.mxu0 %v6568_v30  ;;  %v6630_v30 = vcombine.low %v963_v10, %v967_v13  ;;  %v1019_v10 = vld [vmem:[#allocation9 + $0x600] sm:$0xff]  ;;  %v1024_v13 = vld [vmem:[#allocation9 + $0x628] sm:$0xff] }
 0x1f8   :  { %2511 = vmatprep.subr.bf16.mxu0 %v6577_v31  ;;  %v6632_v31 = vcombine.low %v964_v14, %v968_v15 }
 0x1fb   :  { %2512 = vmatpush1.bf16.msra.mxu0 %v6576_v35  ;;  %v979_v35 = vld [vmem:[#allocation9 + $0x4c0] sm:$0xff] }
 0x1fc   :  { %2513 = vmatprep.subr.bf16.mxu0 %v6585_v36  ;;  %v983_v36 = vld [vmem:[#allocation9 + $0x4e0] sm:$0xff] }
 0x1fd   :  { %v6647_v19 = vcombine.high %v979_v35, %v983_v36  ;;  %v6646_v43 = vcombine.low %v979_v35, %v983_v36  ;;  %v1036_v35 = vld [vmem:[#allocation9 + $0x688] sm:$0xff] }
 0x1fe   :  { %v1040_v36 = vld [vmem:[#allocation9 + $0x6a8] sm:$0xff] }
 0x1ff   :  { %2514 = vmatpush1.bf16.msra.mxu0 %v6584_v40  ;;  %v6638_v40 = vcombine.low %v971_v23, %v975_v25  ;;  %v1028_v23 = vld [vmem:[#allocation9 + $0x648] sm:$0xff] }
 0x200   :  { %2515 = vmatprep.subr.bf16.mxu0 %v6593_v42  ;;  %v6640_v42 = vcombine.low %v972_v28, %v976_v29  ;;  %v1032_v25 = vld [vmem:[#allocation9 + $0x668] sm:$0xff] }
 0x201   :  { %v6696_v39 = vcombine.low %v1028_v23, %v1032_v25 }
 0x203   :  { %2516 = vmatpush1.bf16.msra.mxu0 %v6592_v47  ;;  %v6655_v47 = vcombine.high %v987_v21, %v991_v24  ;;  %v1044_v21 = vld [vmem:[#allocation9 + $0x6c8] sm:$0xff] }
 0x204   :  { %2517 = vmatprep.subr.bf16.mxu0 %v6601_v48  ;;  %v1048_v24 = vld [vmem:[#allocation9 + $0x6e8] sm:$0xff] }
 0x207   :  { %2518 = vmatpush1.bf16.msra.mxu0 %v6600_v51  ;;  %v996_v51 = vld [vmem:[#allocation9 + $0x548] sm:$0xff] }
 0x208   :  { %2519 = vmatprep.subr.bf16.mxu0 %v6609_v52  ;;  %v1000_v52 = vld [vmem:[#allocation9 + $0x568] sm:$0xff] }
 0x20b   :  { %2520 = vmatpush1.bf16.msra.mxu0 %v6608_v55  ;;  %v6663_v55 = vcombine.high %v995_v49, %v999_v50 }
 0x20c   :  { %2521 = vmatprep.subr.bf16.mxu0 %v6617_v56  ;;  %v6665_v56 = vcombine.high %v996_v51, %v1000_v52 }
 0x20f   :  { %2522 = vmatpush1.bf16.msra.mxu0 %v6616_v57  ;;  %v1003_v57 = vld [vmem:[#allocation9 + $0x580] sm:$0xff] }
 0x210   :  { %2534 = vmatprep.subr.bf16.mxu0 %v6625_v58  ;;  %v1007_v58 = vld [vmem:[#allocation9 + $0x5a0] sm:$0xff] }
 0x265   :  { %v747_v62 = vpop.f32.mrb[4].mxu0 }
 0x266   :  { %v748_v63 = vadd.f32 %v747_v62, %v376_v60  ;;  %v749_v0 = vpop.f32.mrb[5].mxu0  ;;  %v6662_v62 = vcombine.low %v995_v49, %v999_v50  ;;  %v1052_v49 = vld [vmem:[#allocation9 + $0x708] sm:$0xff] }
 0x267   :  { %v750_v1 = vadd.f32 %v749_v0, %v380_v61  ;;  %v751_v2 = vpop.f32.mrb[6].mxu0  ;;  %v6671_v0 = vcombine.high %v1003_v57, %v1007_v58  ;;  %v1056_v50 = vld [vmem:[#allocation9 + $0x728] sm:$0xff] }
 0x268   :  { %v807_v3 = vmul.f32 0.2, %v748_v63  ;;  %v752_v4 = vadd.f32 %v751_v2, %v376_v60  ;;  %v753_v5 = vpop.f32.mrb[7].mxu0  ;;  %vm799_vm4 = vcmp.gt.f32.partialorder %v748_v63, 0.0  ;;  %v1004_v60 = vld [vmem:[#allocation9 + $0x588] sm:$0xff]  ;;  %v1011_v2 = vld [vmem:[#allocation9 + $0x5c0] sm:$0xff] }
 0x269   :  { %v808_v6 = vmul.f32 0.2, %v750_v1  ;;  %v754_v7 = vadd.f32 %v753_v5, %v380_v61  ;;  %vm800_vm5 = vcmp.gt.f32.partialorder %v750_v1, 0.0  ;;  %v1008_v61 = vld [vmem:[#allocation9 + $0x5a8] sm:$0xff] }
 0x26a   :  { %vm803_vm6 = vcmp.gt.f32.partialorder %v752_v4, 0.0  ;;  %v811_v8 = vmul.f32 0.2, %v752_v4  ;;  %v815_v11 = vsel %vm799_vm4, %v748_v63, %v807_v3  ;;  %v6664_v63 = vcombine.low %v996_v51, %v1000_v52  ;;  %v1015_v3 = vld [vmem:[#allocation9 + $0x5e0] sm:$0xff]  ;;  %v1016_v5 = vld [vmem:[#allocation9 + $0x5e8] sm:$0xff] }
 0x26b   :  { %vm804_vm7 = vcmp.gt.f32.partialorder %v754_v7, 0.0  ;;  %v812_v9 = vmul.f32 0.2, %v754_v7  ;;  %v816_v45 = vsel %vm800_vm5, %v750_v1, %v808_v6  ;;  %v6673_v1 = vcombine.high %v1004_v60, %v1008_v61 }
 0x26c   :  { %v819_v12 = vsel %vm803_vm6, %v752_v4, %v811_v8  ;;  %v1012_v4 = vld [vmem:[#allocation9 + $0x5c8] sm:$0xff]  ;;  %v6670_v6 = vcombine.low %v1003_v57, %v1007_v58  ;;  %v6679_v8 = vcombine.high %v1011_v2, %v1015_v3  ;;  %v6678_v14 = vcombine.low %v1011_v2, %v1015_v3  ;;  %v1067_v2 = vld [vmem:[#allocation9 + $0x780] sm:$0xff] }
 0x26d   :  { %v8591_v46 = vpack.c.bf16 %v819_v12, %v815_v11  ;;  %v820_v16 = vsel %vm804_vm7, %v754_v7, %v812_v9  ;;  %v6672_v7 = vcombine.low %v1004_v60, %v1008_v61  ;;  %v6681_v9 = vcombine.high %v1012_v4, %v1016_v5  ;;  %v1023_v11 = vld [vmem:[#allocation9 + $0x620] sm:$0xff]  ;;  %v1020_v12 = vld [vmem:[#allocation9 + $0x608] sm:$0xff] }
 0x26e   :  { %v8593_v17 = vpack.c.bf16 %v820_v16, %v816_v45  ;;  %v6680_v15 = vcombine.low %v1012_v4, %v1016_v5  ;;  %v6687_v45 = vcombine.high %v1019_v10, %v1023_v11  ;;  %v6689_v16 = vcombine.high %v1020_v12, %v1024_v13  ;;  %v1060_v57 = vld [vmem:[#allocation9 + $0x748] sm:$0xff]  ;;  %v1071_v3 = vld [vmem:[#allocation9 + $0x7a0] sm:$0xff] }
 0x26f   :  { %v6686_v28 = vcombine.low %v1019_v10, %v1023_v11  ;;  %v6688_v29 = vcombine.low %v1020_v12, %v1024_v13  ;;  %v6712_v52 = vcombine.low %v1044_v21, %v1048_v24  ;;  %v1064_v58 = vld [vmem:[#allocation9 + $0x768] sm:$0xff]  ;;  %v6720_v61 = vcombine.low %v1052_v49, %v1056_v50  ;;  %v1075_v12 = vld [vmem:[#allocation9 + $0x7c0] sm:$0xff] }
 0x270   :  { %2437 = vmatprep.mubr.bf16.mxu1 %v8593_v17  ;;  %2523 = vmatprep.mubr.bf16.mxu0 %v8593_v17  ;;  %v1068_v4 = vld [vmem:[#allocation9 + $0x788] sm:$0xff]  ;;  %v6735_v10 = vcombine.high %v1067_v2, %v1071_v3  ;;  %v1079_v13 = vld [vmem:[#allocation9 + $0x7e0] sm:$0xff] }
 0x271   :  { %2438 = vmatmul.mubr.bf16.vlgmr.msra.gmra.mrb[0].mxu1 %v8591_v46  ;;  %2524 = vmatmul.mubr.bf16.vlgmr.msra.gmra.mrb[12].mxu0 %v8591_v46  ;;  %v1072_v5 = vld [vmem:[#allocation9 + $0x7a8] sm:$0xff] }
 0x272   :  { %2449 = vmatpush1.bf16.msra.mxu1 %v6622_v26  ;;  %2535 = vmatpush1.bf16.msra.mxu0 %v6624_v27  ;;  %v988_v26 = vld [vmem:[#allocation9 + $0x508] sm:$0xff]  ;;  %v6737_v11 = vcombine.high %v1068_v4, %v1072_v5 }
 0x273   :  { %2450 = vmatprep.subr.bf16.mxu1 %v6631_v18  ;;  %2536 = vmatprep.subr.bf16.mxu0 %v6633_v22  ;;  %v992_v27 = vld [vmem:[#allocation9 + $0x528] sm:$0xff]  ;;  %v1027_v18 = vld [vmem:[#allocation9 + $0x640] sm:$0xff] }
 0x274   :  { %v6657_v48 = vcombine.high %v988_v26, %v992_v27  ;;  %v6656_v54 = vcombine.low %v988_v26, %v992_v27  ;;  %v1031_v22 = vld [vmem:[#allocation9 + $0x660] sm:$0xff]  ;;  %v6704_v27 = vcombine.low %v1036_v35, %v1040_v36 }
 0x275   :  { %v6694_v38 = vcombine.low %v1027_v18, %v1031_v22 }
 0x276   :  { %2451 = vmatpush1.bf16.msra.mxu1 %v6630_v30  ;;  %2537 = vmatpush1.bf16.msra.mxu0 %v6632_v31  ;;  %v6695_v30 = vcombine.high %v1027_v18, %v1031_v22  ;;  %v6697_v31 = vcombine.high %v1028_v23, %v1032_v25  ;;  %v6734_v22 = vcombine.low %v1067_v2, %v1071_v3 }
 0x277   :  { %2452 = vmatprep.subr.bf16.mxu1 %v6639_v33  ;;  %2538 = vmatprep.subr.bf16.mxu0 %v6641_v34  ;;  %v1035_v33 = vld [vmem:[#allocation9 + $0x680] sm:$0xff]  ;;  %v6736_v23 = vcombine.low %v1068_v4, %v1072_v5  ;;  %v853_v5 = vld [vmem:[#allocation9 + $0xd0] sm:$0xff] }
 0x278   :  { %v1039_v34 = vld [vmem:[#allocation9 + $0x6a0] sm:$0xff] }
 0x279   :  { %v6702_v26 = vcombine.low %v1035_v33, %v1039_v34 }
 0x27a   :  { %2453 = vmatpush1.bf16.msra.mxu1 %v6638_v40  ;;  %2539 = vmatpush1.bf16.msra.mxu0 %v6640_v42  ;;  %v6703_v40 = vcombine.high %v1035_v33, %v1039_v34  ;;  %v6705_v42 = vcombine.high %v1036_v35, %v1040_v36  ;;  %v833_v35 = vld [vmem:[#allocation9 + $0x30] sm:$0xff]  ;;  %v830_v36 = vld [vmem:[#allocation9 + $0x18] sm:$0xff] }
 0x27b   :  { %2454 = vmatprep.subr.bf16.mxu1 %v6647_v19  ;;  %2540 = vmatprep.subr.bf16.mxu0 %v6649_v20  ;;  %v1043_v19 = vld [vmem:[#allocation9 + $0x6c0] sm:$0xff] }
 0x27c   :  { %v1047_v20 = vld [vmem:[#allocation9 + $0x6e0] sm:$0xff] }
 0x27d   :  { %v6710_v51 = vcombine.low %v1043_v19, %v1047_v20 }
 0x27e   :  { %2455 = vmatpush1.bf16.msra.mxu1 %v6646_v43  ;;  %2541 = vmatpush1.bf16.msra.mxu0 %v6648_v44  ;;  %v6711_v43 = vcombine.high %v1043_v19, %v1047_v20  ;;  %v6713_v44 = vcombine.high %v1044_v21, %v1048_v24 }
 0x27f   :  { %2456 = vmatprep.subr.bf16.mxu1 %v6655_v47  ;;  %2542 = vmatprep.subr.bf16.mxu0 %v6657_v48  ;;  %v1051_v47 = vld [vmem:[#allocation9 + $0x700] sm:$0xff] }
 0x280   :  { %v1055_v48 = vld [vmem:[#allocation9 + $0x720] sm:$0xff] }
 0x281   :  { %v6718_v60 = vcombine.low %v1051_v47, %v1055_v48 }
 0x282   :  { %2457 = vmatpush1.bf16.msra.mxu1 %v6654_v53  ;;  %2543 = vmatpush1.bf16.msra.mxu0 %v6656_v54  ;;  %v6719_v53 = vcombine.high %v1051_v47, %v1055_v48  ;;  %v6721_v54 = vcombine.high %v1052_v49, %v1056_v50  ;;  %v841_v50 = vld [vmem:[#allocation9 + $0x70] sm:$0xff] }
 0x283   :  { %2458 = vmatprep.subr.bf16.mxu1 %v6663_v55  ;;  %2544 = vmatprep.subr.bf16.mxu0 %v6665_v56  ;;  %v1059_v55 = vld [vmem:[#allocation9 + $0x740] sm:$0xff] }
 0x284   :  { %v1063_v56 = vld [vmem:[#allocation9 + $0x760] sm:$0xff] }
 0x286   :  { %2459 = vmatpush1.bf16.msra.mxu1 %v6662_v62  ;;  %2545 = vmatpush1.bf16.msra.mxu0 %v6664_v63  ;;  %v8606_v62 = vsub.s32 2, %v8547_v32  ;;  %v6727_v63 = vcombine.high %v1059_v55, %v1063_v56 }
 0x287   :  { %2460 = vmatprep.subr.bf16.mxu1 %v6671_v0  ;;  %2546 = vmatprep.subr.bf16.mxu0 %v6673_v1  ;;  %v6729_v0 = vcombine.high %v1060_v57, %v1064_v58  ;;  %v8609_v1 = vsub.s32 3, %v8547_v32 }
 0x28a   :  { %2461 = vmatpush1.bf16.msra.mxu1 %v6670_v6  ;;  %2547 = vmatpush1.bf16.msra.mxu0 %v6672_v7  ;;  %v384_v6 = vrot.slane %v8585_v59, %v8606_v62  ;;  %v6726_v7 = vcombine.low %v1059_v55, %v1063_v56 }
 0x28b   :  { %2462 = vmatprep.subr.bf16.mxu1 %v6679_v8  ;;  %2548 = vmatprep.subr.bf16.mxu0 %v6681_v9  ;;  %v6728_v8 = vcombine.low %v1060_v57, %v1064_v58  ;;  %v388_v9 = vrot.slane %v8585_v59, %v8609_v1  ;;  %v829_v59 = vld [vmem:[#allocation9 + $0x10] sm:$0xff] }
 0x28c   :  { %v6499_v24 = vcombine.high %v829_v59, %v833_v35  ;;  %v845_v58 = vld [vmem:[#allocation9 + $0x90] sm:$0xff] }
 0x28e   :  { %2463 = vmatpush1.bf16.msra.mxu1 %v6678_v14  ;;  %2549 = vmatpush1.bf16.msra.mxu0 %v6680_v15  ;;  %v1076_v14 = vld [vmem:[#allocation9 + $0x7c8] sm:$0xff] }
 0x28f   :  { %2464 = vmatprep.subr.bf16.mxu1 %v6687_v45  ;;  %2550 = vmatprep.subr.bf16.mxu0 %v6689_v16  ;;  %v1080_v15 = vld [vmem:[#allocation9 + $0x7e8] sm:$0xff] }
 0x290   :  { %v6744_v20 = vcombine.low %v1076_v14, %v1080_v15 }
 0x292   :  { %2465 = vmatpush1.bf16.msra.mxu1 %v6686_v28  ;;  %2551 = vmatpush1.bf16.msra.mxu0 %v6688_v29  ;;  %v6743_v29 = vcombine.high %v1075_v12, %v1079_v13 }
 0x293   :  { %2466 = vmatprep.subr.bf16.mxu1 %v6695_v30  ;;  %2552 = vmatprep.subr.bf16.mxu0 %v6697_v31  ;;  %v6745_v30 = vcombine.high %v1076_v14, %v1080_v15  ;;  %v865_v14 = vld [vmem:[#allocation9 + $0x130] sm:$0xff]  ;;  %v866_v15 = vld [vmem:[#allocation9 + $0x138] sm:$0xff] }
 0x296   :  { %2467 = vmatpush1.bf16.msra.mxu1 %v6694_v38  ;;  %2553 = vmatpush1.bf16.msra.mxu0 %v6696_v39  ;;  %v834_v38 = vld [vmem:[#allocation9 + $0x38] sm:$0xff] }
 0x297   :  { %2468 = vmatprep.subr.bf16.mxu1 %v6703_v40  ;;  %2554 = vmatprep.subr.bf16.mxu0 %v6705_v42  ;;  %v6742_v42 = vcombine.low %v1075_v12, %v1079_v13  ;;  %v6500_v55 = vcombine.low %v830_v36, %v834_v38  ;;  %v861_v13 = vld [vmem:[#allocation9 + $0x110] sm:$0xff] }
 0x29a   :  { %2469 = vmatpush1.bf16.msra.mxu1 %v6702_v26  ;;  %2555 = vmatpush1.bf16.msra.mxu0 %v6704_v27  ;;  %v6501_v26 = vcombine.high %v830_v36, %v834_v38  ;;  %v878_v36 = vld [vmem:[#allocation9 + $0x198] sm:$0xff] }
 0x29b   :  { %2470 = vmatprep.subr.bf16.mxu1 %v6711_v43  ;;  %2556 = vmatprep.subr.bf16.mxu0 %v6713_v44  ;;  %v837_v44 = vld [vmem:[#allocation9 + $0x50] sm:$0xff]  ;;  %v882_v38 = vld [vmem:[#allocation9 + $0x1b8] sm:$0xff] }
 0x29c   :  { %v6507_v56 = vcombine.high %v837_v44, %v841_v50 }
 0x29e   :  { %2471 = vmatpush1.bf16.msra.mxu1 %v6710_v51  ;;  %2557 = vmatpush1.bf16.msra.mxu0 %v6712_v52  ;;  %v838_v51 = vld [vmem:[#allocation9 + $0x58] sm:$0xff] }
 0x29f   :  { %2472 = vmatprep.subr.bf16.mxu1 %v6719_v53  ;;  %2558 = vmatprep.subr.bf16.mxu0 %v6721_v54  ;;  %v842_v52 = vld [vmem:[#allocation9 + $0x78] sm:$0xff]  ;;  %v6498_v54 = vcombine.low %v829_v59, %v833_v35  ;;  %v881_v35 = vld [vmem:[#allocation9 + $0x1b0] sm:$0xff] }
 0x2a0   :  { %v6509_v57 = vcombine.high %v838_v51, %v842_v52  ;;  %v6508_v2 = vcombine.low %v838_v51, %v842_v52  ;;  %v894_v51 = vld [vmem:[#allocation9 + $0x218] sm:$0xff] }
 0x2a1   :  { %v898_v52 = vld [vmem:[#allocation9 + $0x238] sm:$0xff] }
 0x2a2   :  { %2473 = vmatpush1.bf16.msra.mxu1 %v6718_v60  ;;  %2559 = vmatpush1.bf16.msra.mxu0 %v6720_v61  ;;  %v849_v60 = vld [vmem:[#allocation9 + $0xb0] sm:$0xff]  ;;  %v846_v61 = vld [vmem:[#allocation9 + $0x98] sm:$0xff] }
 0x2a3   :  { %2474 = vmatprep.subr.bf16.mxu1 %v6727_v63  ;;  %2560 = vmatprep.subr.bf16.mxu0 %v6729_v0  ;;  %v850_v63 = vld [vmem:[#allocation9 + $0xb8] sm:$0xff]  ;;  %v6506_v0 = vcombine.low %v837_v44, %v841_v50  ;;  %v6515_v3 = vcombine.high %v845_v58, %v849_v60  ;;  %v897_v50 = vld [vmem:[#allocation9 + $0x230] sm:$0xff] }
 0x2a4   :  { %v6517_v4 = vcombine.high %v846_v61, %v850_v63 }
 0x2a5   :  { %v790_v45 = vpop.f32.mrb[8].mxu0 }
 0x2a6   :  { %v791_v16 = vadd.f32 %v790_v45, %v384_v6  ;;  %v792_v18 = vpop.f32.mrb[9].mxu0  ;;  %2475 = vmatpush1.bf16.msra.mxu1 %v6726_v7  ;;  %2561 = vmatpush1.bf16.msra.mxu0 %v6728_v8  ;;  %v854_v7 = vld [vmem:[#allocation9 + $0xd8] sm:$0xff] }
 0x2a7   :  { %v793_v25 = vadd.f32 %v792_v18, %v388_v9  ;;  %v794_v28 = vpop.f32.mrb[10].mxu0  ;;  %2476 = vmatprep.subr.bf16.mxu1 %v6735_v10  ;;  %2562 = vmatprep.subr.bf16.mxu0 %v6737_v11  ;;  %v858_v8 = vld [vmem:[#allocation9 + $0xf8] sm:$0xff]  ;;  %v6516_v10 = vcombine.low %v846_v61, %v850_v63  ;;  %v6531_v18 = vcombine.high %v861_v13, %v865_v14 }
 0x2a8   :  { %v809_v31 = vmul.f32 0.2, %v791_v16  ;;  %v795_v33 = vadd.f32 %v794_v28, %v384_v6  ;;  %v796_v34 = vpop.f32.mrb[11].mxu0  ;;  %vm801_vm8 = vcmp.gt.f32.partialorder %v791_v16, 0.0  ;;  %v857_v6 = vld [vmem:[#allocation9 + $0xf0] sm:$0xff]  ;;  %v6525_v12 = vcombine.high %v854_v7, %v858_v8  ;;  %v870_v28 = vld [vmem:[#allocation9 + $0x158] sm:$0xff] }
 0x2a9   :  { %v810_v39 = vmul.f32 0.2, %v793_v25  ;;  %v797_v40 = vadd.f32 %v796_v34, %v388_v9  ;;  %vm802_vm9 = vcmp.gt.f32.partialorder %v793_v25, 0.0  ;;  %v6514_v9 = vcombine.low %v845_v58, %v849_v60  ;;  %v877_v34 = vld [vmem:[#allocation9 + $0x190] sm:$0xff]  ;;  %v902_v61 = vld [vmem:[#allocation9 + $0x258] sm:$0xff] }
 0x2aa   :  { %vm805_vm10 = vcmp.gt.f32.partialorder %v795_v33, 0.0  ;;  %v813_v19 = vmul.f32 0.2, %v795_v33  ;;  %2477 = vmatpush1.bf16.msra.mxu1 %v6734_v22  ;;  %2563 = vmatpush1.bf16.msra.mxu0 %v6736_v23  ;;  %v817_v27 = vsel %vm801_vm8, %v791_v16, %v809_v31  ;;  %v6523_v11 = vcombine.high %v853_v5, %v857_v6  ;;  %v869_v23 = vld [vmem:[#allocation9 + $0x150] sm:$0xff]  ;;  %v906_v63 = vld [vmem:[#allocation9 + $0x278] sm:$0xff] }
 0x2ab   :  { %vm806_vm11 = vcmp.gt.f32.partialorder %v797_v40, 0.0  ;;  %v814_v21 = vmul.f32 0.2, %v797_v40  ;;  %2478 = vmatprep.subr.bf16.mxu1 %v6743_v29  ;;  %2564 = vmatprep.subr.bf16.mxu0 %v6745_v30  ;;  %v818_v47 = vsel %vm802_vm9, %v793_v25, %v810_v39  ;;  %v6522_v45 = vcombine.low %v853_v5, %v857_v6  ;;  %v873_v25 = vld [vmem:[#allocation9 + $0x170] sm:$0xff]  ;;  %v874_v29 = vld [vmem:[#allocation9 + $0x178] sm:$0xff] }
 0x2ac   :  { %v821_v43 = vsel %vm805_vm10, %v795_v33, %v813_v19  ;;  %v6524_v16 = vcombine.low %v854_v7, %v858_v8  ;;  %v6530_v30 = vcombine.low %v861_v13, %v865_v14  ;;  %v6539_v31 = vcombine.high %v869_v23, %v873_v25  ;;  %v901_v58 = vld [vmem:[#allocation9 + $0x250] sm:$0xff]  ;;  %v910_v7 = vld [vmem:[#allocation9 + $0x298] sm:$0xff] }
 0x2ad   :  { %v8616_v48 = vpack.c.bf16 %v821_v43, %v817_v27  ;;  %v822_v49 = vsel %vm806_vm11, %v797_v40, %v814_v21  ;;  %v6541_v33 = vcombine.high %v870_v28, %v874_v29  ;;  %v6538_v39 = vcombine.low %v869_v23, %v873_v25  ;;  %v889_v21 = vld [vmem:[#allocation9 + $0x1f0] sm:$0xff]  ;;  %v914_v8 = vld [vmem:[#allocation9 + $0x2b8] sm:$0xff] }
 0x2ae   :  { %v8618_v53 = vpack.c.bf16 %v822_v49, %v818_v47  ;;  %2479 = vmatpush1.bf16.msra.mxu1 %v6742_v42  ;;  %2565 = vmatpush1.bf16.msra.mxu0 %v6744_v20  ;;  %v6540_v40 = vcombine.low %v870_v28, %v874_v29  ;;  %v6547_v42 = vcombine.high %v877_v34, %v881_v35  ;;  %v885_v20 = vld [vmem:[#allocation9 + $0x1d0] sm:$0xff]  ;;  %v926_v28 = vld [vmem:[#allocation9 + $0x318] sm:$0xff] }
 0x2af   :  { %2577 = vmatprep.subr.bf16.mxu1 %v6499_v24  ;;  %2663 = vmatprep.subr.bf16.mxu0 %v6501_v26  ;;  %v6549_v19 = vcombine.high %v878_v36, %v882_v38  ;;  %v886_v24 = vld [vmem:[#allocation9 + $0x1d8] sm:$0xff]  ;;  %v6546_v27 = vcombine.low %v877_v34, %v881_v35  ;;  %v6548_v43 = vcombine.low %v878_v36, %v882_v38  ;;  %v893_v49 = vld [vmem:[#allocation9 + $0x210] sm:$0xff] }
 0x2b0   :  { %2480 = vmatprep.mubr.bf16.mxu1 %v8618_v53  ;;  %2566 = vmatprep.mubr.bf16.mxu0 %v8618_v53  ;;  %v890_v26 = vld [vmem:[#allocation9 + $0x1f8] sm:$0xff]  ;;  %v6555_v44 = vcombine.high %v885_v20, %v889_v21  ;;  %v905_v60 = vld [vmem:[#allocation9 + $0x270] sm:$0xff] }
 0x2b1   :  { %2481 = vmatmul.mubr.bf16.vlgmr.msra.gmra.mrb[0].mxu1 %v8616_v48  ;;  %2567 = vmatmul.mubr.bf16.vlgmr.msra.gmra.mrb[12].mxu0 %v8616_v48  ;;  %v6557_v47 = vcombine.high %v886_v24, %v890_v26  ;;  %v909_v5 = vld [vmem:[#allocation9 + $0x290] sm:$0xff]  ;;  %v930_v29 = vld [vmem:[#allocation9 + $0x338] sm:$0xff] }
 0x2b2   :  { %2578 = vmatpush1.bf16.msra.mxu1 %v6498_v54  ;;  %2609 = vmatprep.mubr.bf16.mxu1 %v8593_v17  ;;  %v6554_v54 = vcombine.low %v885_v20, %v889_v21  ;;  %v913_v6 = vld [vmem:[#allocation9 + $0x2b0] sm:$0xff]  ;;  %v934_v36 = vld [vmem:[#allocation9 + $0x358] sm:$0xff] }
 0x2b3   :  { %2664 = vmatpush1.bf16.msra.mxu0 %v6500_v55  ;;  %2695 = vmatprep.mubr.bf16.mxu0 %v8593_v17  ;;  %v862_v17 = vld [vmem:[#allocation9 + $0x118] sm:$0xff]  ;;  %v6556_v55 = vcombine.low %v886_v24, %v890_v26  ;;  %v917_v13 = vld [vmem:[#allocation9 + $0x2d0] sm:$0xff] }
 0x2b4   :  { %2579 = vmatprep.subr.bf16.mxu1 %v6507_v56  ;;  %2665 = vmatprep.subr.bf16.mxu0 %v6509_v57  ;;  %v6533_v22 = vcombine.high %v862_v17, %v866_v15  ;;  %v6532_v59 = vcombine.low %v862_v17, %v866_v15  ;;  %v6563_v56 = vcombine.high %v893_v49, %v897_v50  ;;  %v921_v14 = vld [vmem:[#allocation9 + $0x2f0] sm:$0xff]  ;;  %v918_v17 = vld [vmem:[#allocation9 + $0x2d8] sm:$0xff] }
 0x2b5   :  { %v6565_v57 = vcombine.high %v894_v51, %v898_v52  ;;  %v922_v15 = vld [vmem:[#allocation9 + $0x2f8] sm:$0xff]  ;;  %v925_v23 = vld [vmem:[#allocation9 + $0x310] sm:$0xff] }
 0x2b6   :  { %2580 = vmatpush1.bf16.msra.mxu1 %v6506_v0  ;;  %v6562_v0 = vcombine.low %v893_v49, %v897_v50  ;;  %v929_v25 = vld [vmem:[#allocation9 + $0x330] sm:$0xff]  ;;  %v938_v38 = vld [vmem:[#allocation9 + $0x378] sm:$0xff] }
 0x2b7   :  { %2666 = vmatpush1.bf16.msra.mxu0 %v6508_v2  ;;  %2581 = vmatprep.subr.bf16.mxu1 %v6515_v3  ;;  %v6564_v2 = vcombine.low %v894_v51, %v898_v52  ;;  %v6571_v3 = vcombine.high %v901_v58, %v905_v60  ;;  %v933_v34 = vld [vmem:[#allocation9 + $0x350] sm:$0xff]  ;;  %v942_v24 = vld [vmem:[#allocation9 + $0x398] sm:$0xff] }
 0x2b8   :  { %2667 = vmatprep.subr.bf16.mxu0 %v6517_v4  ;;  %v6573_v4 = vcombine.high %v902_v61, %v906_v63  ;;  %v937_v35 = vld [vmem:[#allocation9 + $0x370] sm:$0xff]  ;;  %v946_v26 = vld [vmem:[#allocation9 + $0x3b8] sm:$0xff] }
 0x2b9   :  { %v941_v20 = vld [vmem:[#allocation9 + $0x390] sm:$0xff]  ;;  %v950_v51 = vld [vmem:[#allocation9 + $0x3d8] sm:$0xff] }
 0x2ba   :  { %2582 = vmatpush1.bf16.msra.mxu1 %v6514_v9  ;;  %v6570_v9 = vcombine.low %v901_v58, %v905_v60  ;;  %v945_v21 = vld [vmem:[#allocation9 + $0x3b0] sm:$0xff]  ;;  %v954_v52 = vld [vmem:[#allocation9 + $0x3f8] sm:$0xff] }
 0x2bb   :  { %2668 = vmatpush1.bf16.msra.mxu0 %v6516_v10  ;;  %2583 = vmatprep.subr.bf16.mxu1 %v6523_v11  ;;  %v6572_v10 = vcombine.low %v902_v61, %v906_v63  ;;  %v6579_v11 = vcombine.high %v909_v5, %v913_v6  ;;  %v949_v49 = vld [vmem:[#allocation9 + $0x3d0] sm:$0xff]  ;;  %v958_v61 = vld [vmem:[#allocation9 + $0x418] sm:$0xff] }
 0x2bc   :  { %2669 = vmatprep.subr.bf16.mxu0 %v6525_v12  ;;  %v6581_v12 = vcombine.high %v910_v7, %v914_v8  ;;  %v953_v50 = vld [vmem:[#allocation9 + $0x3f0] sm:$0xff]  ;;  %v962_v63 = vld [vmem:[#allocation9 + $0x438] sm:$0xff] }
 0x2bd   :  { %v957_v58 = vld [vmem:[#allocation9 + $0x410] sm:$0xff] }
 0x2be   :  { %2584 = vmatpush1.bf16.msra.mxu1 %v6522_v45  ;;  %v6578_v45 = vcombine.low %v909_v5, %v913_v6  ;;  %v961_v60 = vld [vmem:[#allocation9 + $0x430] sm:$0xff] }
 0x2bf   :  { %2670 = vmatpush1.bf16.msra.mxu0 %v6524_v16  ;;  %2585 = vmatprep.subr.bf16.mxu1 %v6531_v18  ;;  %v6580_v16 = vcombine.low %v910_v7, %v914_v8  ;;  %v6587_v18 = vcombine.high %v917_v13, %v921_v14  ;;  %v965_v5 = vld [vmem:[#allocation9 + $0x450] sm:$0xff]  ;;  %v6626_v7 = vcombine.low %v957_v58, %v961_v60  ;;  %v966_v8 = vld [vmem:[#allocation9 + $0x458] sm:$0xff] }
 0x2c0   :  { %2671 = vmatprep.subr.bf16.mxu0 %v6533_v22  ;;  %v6589_v22 = vcombine.high %v918_v17, %v922_v15  ;;  %v969_v6 = vld [vmem:[#allocation9 + $0x470] sm:$0xff] }
 0x2c2   :  { %2586 = vmatpush1.bf16.msra.mxu1 %v6530_v30  ;;  %v6586_v30 = vcombine.low %v917_v13, %v921_v14  ;;  %v977_v13 = vld [vmem:[#allocation9 + $0x4b0] sm:$0xff] }
 0x2c3   :  { %2672 = vmatpush1.bf16.msra.mxu0 %v6532_v59  ;;  %2587 = vmatprep.subr.bf16.mxu1 %v6539_v31  ;;  %v6588_v59 = vcombine.low %v918_v17, %v922_v15  ;;  %v6595_v31 = vcombine.high %v925_v23, %v929_v25  ;;  %v974_v17 = vld [vmem:[#allocation9 + $0x498] sm:$0xff] }
 0x2c4   :  { %2673 = vmatprep.subr.bf16.mxu0 %v6541_v33  ;;  %v6597_v33 = vcombine.high %v926_v28, %v930_v29  ;;  %v978_v15 = vld [vmem:[#allocation9 + $0x4b8] sm:$0xff] }
 0x2c6   :  { %2588 = vmatpush1.bf16.msra.mxu1 %v6538_v39  ;;  %v6594_v39 = vcombine.low %v925_v23, %v929_v25  ;;  %v981_v23 = vld [vmem:[#allocation9 + $0x4d0] sm:$0xff] }
 0x2c7   :  { %2674 = vmatpush1.bf16.msra.mxu0 %v6540_v40  ;;  %2589 = vmatprep.subr.bf16.mxu1 %v6547_v42  ;;  %v6596_v40 = vcombine.low %v926_v28, %v930_v29  ;;  %v6603_v42 = vcombine.high %v933_v34, %v937_v35  ;;  %v985_v25 = vld [vmem:[#allocation9 + $0x4f0] sm:$0xff]  ;;  %v982_v28 = vld [vmem:[#allocation9 + $0x4d8] sm:$0xff] }
 0x2c8   :  { %2675 = vmatprep.subr.bf16.mxu0 %v6549_v19  ;;  %v6605_v19 = vcombine.high %v934_v36, %v938_v38  ;;  %v986_v29 = vld [vmem:[#allocation9 + $0x4f8] sm:$0xff] }
 0x2ca   :  { %2590 = vmatpush1.bf16.msra.mxu1 %v6546_v27  ;;  %v6602_v27 = vcombine.low %v933_v34, %v937_v35  ;;  %v993_v34 = vld [vmem:[#allocation9 + $0x530] sm:$0xff]  ;;  %v990_v35 = vld [vmem:[#allocation9 + $0x518] sm:$0xff] }
 0x2cb   :  { %2676 = vmatpush1.bf16.msra.mxu0 %v6548_v43  ;;  %2591 = vmatprep.subr.bf16.mxu1 %v6555_v44  ;;  %v6604_v43 = vcombine.low %v934_v36, %v938_v38  ;;  %v6611_v44 = vcombine.high %v941_v20, %v945_v21  ;;  %v994_v36 = vld [vmem:[#allocation9 + $0x538] sm:$0xff]  ;;  %v6652_v38 = vcombine.low %v982_v28, %v986_v29 }
 0x2cc   :  { %2677 = vmatprep.subr.bf16.mxu0 %v6557_v47  ;;  %v6613_v47 = vcombine.high %v942_v24, %v946_v26 }
 0x2ce   :  { %2592 = vmatpush1.bf16.msra.mxu1 %v6554_v54  ;;  %v6610_v54 = vcombine.low %v941_v20, %v945_v21  ;;  %v998_v20 = vld [vmem:[#allocation9 + $0x558] sm:$0xff] }
 0x2cf   :  { %2678 = vmatpush1.bf16.msra.mxu0 %v6556_v55  ;;  %2593 = vmatprep.subr.bf16.mxu1 %v6563_v56  ;;  %v6612_v55 = vcombine.low %v942_v24, %v946_v26  ;;  %v6619_v56 = vcombine.high %v949_v49, %v953_v50  ;;  %v1002_v21 = vld [vmem:[#allocation9 + $0x578] sm:$0xff]  ;;  %v6660_v26 = vcombine.low %v990_v35, %v994_v36 }
 0x2d0   :  { %2679 = vmatprep.subr.bf16.mxu0 %v6565_v57  ;;  %v6621_v57 = vcombine.high %v950_v51, %v954_v52 }
 0x2d2   :  { %2594 = vmatpush1.bf16.msra.mxu1 %v6562_v0  ;;  %v6618_v0 = vcombine.low %v949_v49, %v953_v50  ;;  %v1006_v49 = vld [vmem:[#allocation9 + $0x598] sm:$0xff] }
 0x2d3   :  { %2680 = vmatpush1.bf16.msra.mxu0 %v6564_v2  ;;  %2595 = vmatprep.subr.bf16.mxu1 %v6571_v3  ;;  %v6620_v2 = vcombine.low %v950_v51, %v954_v52  ;;  %v6627_v3 = vcombine.high %v957_v58, %v961_v60  ;;  %v1010_v50 = vld [vmem:[#allocation9 + $0x5b8] sm:$0xff]  ;;  %v6668_v52 = vcombine.low %v998_v20, %v1002_v21 }
 0x2d4   :  { %2681 = vmatprep.subr.bf16.mxu0 %v6573_v4  ;;  %v6629_v4 = vcombine.high %v958_v61, %v962_v63  ;;  %v1014_v58 = vld [vmem:[#allocation9 + $0x5d8] sm:$0xff] }
 0x2d5   :  { %v1018_v60 = vld [vmem:[#allocation9 + $0x5f8] sm:$0xff] }
 0x2d6   :  { %2596 = vmatpush1.bf16.msra.mxu1 %v6570_v9  ;;  %v970_v9 = vld [vmem:[#allocation9 + $0x478] sm:$0xff] }
 0x2d7   :  { %2682 = vmatpush1.bf16.msra.mxu0 %v6572_v10  ;;  %2597 = vmatprep.subr.bf16.mxu1 %v6579_v11  ;;  %v6628_v10 = vcombine.low %v958_v61, %v962_v63  ;;  %v6635_v11 = vcombine.high %v965_v5, %v969_v6  ;;  %v6637_v14 = vcombine.high %v966_v8, %v970_v9 }
 0x2d8   :  { %2683 = vmatprep.subr.bf16.mxu0 %v6581_v12  ;;  %v973_v12 = vld [vmem:[#allocation9 + $0x490] sm:$0xff]  ;;  %v6676_v63 = vcombine.low %v1006_v49, %v1010_v50 }
 0x2da   :  { %2598 = vmatpush1.bf16.msra.mxu1 %v6578_v45  ;;  %v6634_v45 = vcombine.low %v965_v5, %v969_v6  ;;  %v1022_v5 = vld [vmem:[#allocation9 + $0x618] sm:$0xff] }
 0x2db   :  { %2684 = vmatpush1.bf16.msra.mxu0 %v6580_v16  ;;  %2599 = vmatprep.subr.bf16.mxu1 %v6587_v18  ;;  %v6636_v16 = vcombine.low %v966_v8, %v970_v9  ;;  %v6643_v18 = vcombine.high %v973_v12, %v977_v13  ;;  %v1026_v6 = vld [vmem:[#allocation9 + $0x638] sm:$0xff]  ;;  %v6684_v8 = vcombine.low %v1014_v58, %v1018_v60 }
 0x2dc   :  { %2685 = vmatprep.subr.bf16.mxu0 %v6589_v22  ;;  %v6645_v22 = vcombine.high %v974_v17, %v978_v15 }
 0x2de   :  { %2600 = vmatpush1.bf16.msra.mxu1 %v6586_v30  ;;  %v6642_v30 = vcombine.low %v973_v12, %v977_v13  ;;  %v1033_v12 = vld [vmem:[#allocation9 + $0x670] sm:$0xff]  ;;  %v1030_v13 = vld [vmem:[#allocation9 + $0x658] sm:$0xff] }
 0x2df   :  { %2686 = vmatpush1.bf16.msra.mxu0 %v6588_v59  ;;  %2601 = vmatprep.subr.bf16.mxu1 %v6595_v31  ;;  %v6651_v59 = vcombine.high %v981_v23, %v985_v25  ;;  %v6653_v31 = vcombine.high %v982_v28, %v986_v29 }
 0x2e0   :  { %2687 = vmatprep.subr.bf16.mxu0 %v6597_v33  ;;  %v989_v33 = vld [vmem:[#allocation9 + $0x510] sm:$0xff] }
 0x2e1   :  { %v6658_v24 = vcombine.low %v989_v33, %v993_v34 }
 0x2e2   :  { %2602 = vmatpush1.bf16.msra.mxu1 %v6594_v39  ;;  %v6659_v39 = vcombine.high %v989_v33, %v993_v34  ;;  %v1046_v33 = vld [vmem:[#allocation9 + $0x6d8] sm:$0xff] }
 0x2e3   :  { %2688 = vmatpush1.bf16.msra.mxu0 %v6596_v40  ;;  %2603 = vmatprep.subr.bf16.mxu1 %v6603_v42  ;;  %v6661_v40 = vcombine.high %v990_v35, %v994_v36  ;;  %v997_v42 = vld [vmem:[#allocation9 + $0x550] sm:$0xff]  ;;  %v1050_v34 = vld [vmem:[#allocation9 + $0x6f8] sm:$0xff] }
 0x2e4   :  { %2689 = vmatprep.subr.bf16.mxu0 %v6605_v19  ;;  %v1001_v19 = vld [vmem:[#allocation9 + $0x570] sm:$0xff] }
 0x2e5   :  { %v6666_v51 = vcombine.low %v997_v42, %v1001_v19 }
 0x2e6   :  { %2604 = vmatpush1.bf16.msra.mxu1 %v6602_v27  ;;  %v6667_v27 = vcombine.high %v997_v42, %v1001_v19  ;;  %v1054_v42 = vld [vmem:[#allocation9 + $0x718] sm:$0xff] }
 0x2e7   :  { %2690 = vmatpush1.bf16.msra.mxu0 %v6604_v43  ;;  %2605 = vmatprep.subr.bf16.mxu1 %v6611_v44  ;;  %v6669_v43 = vcombine.high %v998_v20, %v1002_v21  ;;  %v1005_v44 = vld [vmem:[#allocation9 + $0x590] sm:$0xff]  ;;  %v1058_v19 = vld [vmem:[#allocation9 + $0x738] sm:$0xff]  ;;  %v6716_v21 = vcombine.low %v1046_v33, %v1050_v34 }
 0x2e8   :  { %2691 = vmatprep.subr.bf16.mxu0 %v6613_v47  ;;  %v1009_v47 = vld [vmem:[#allocation9 + $0x5b0] sm:$0xff] }
 0x2e9   :  { %v6674_v61 = vcombine.low %v1005_v44, %v1009_v47 }
 0x2ea   :  { %2606 = vmatpush1.bf16.msra.mxu1 %v6610_v54  ;;  %v6675_v54 = vcombine.high %v1005_v44, %v1009_v47  ;;  %v1062_v44 = vld [vmem:[#allocation9 + $0x758] sm:$0xff] }
 0x2eb   :  { %2692 = vmatpush1.bf16.msra.mxu0 %v6612_v55  ;;  %2607 = vmatprep.subr.bf16.mxu1 %v6619_v56  ;;  %v6677_v55 = vcombine.high %v1006_v49, %v1010_v50  ;;  %v1013_v56 = vld [vmem:[#allocation9 + $0x5d0] sm:$0xff]  ;;  %v1066_v47 = vld [vmem:[#allocation9 + $0x778] sm:$0xff]  ;;  %v6724_v50 = vcombine.low %v1054_v42, %v1058_v19 }
 0x2ec   :  { %2693 = vmatprep.subr.bf16.mxu0 %v6621_v57  ;;  %v1017_v57 = vld [vmem:[#allocation9 + $0x5f0] sm:$0xff] }
 0x2ee   :  { %2608 = vmatpush1.bf16.msra.mxu1 %v6618_v0  ;;  %v6683_v0 = vcombine.high %v1013_v56, %v1017_v57 }
 0x2ef   :  { %2694 = vmatpush1.bf16.msra.mxu0 %v6620_v2  ;;  %2620 = vmatprep.subr.bf16.mxu1 %v6627_v3  ;;  %v6685_v2 = vcombine.high %v1014_v58, %v1018_v60  ;;  %v1021_v3 = vld [vmem:[#allocation9 + $0x610] sm:$0xff]  ;;  %v6732_v60 = vcombine.low %v1062_v44, %v1066_v47 }
 0x2f0   :  { %2706 = vmatprep.subr.bf16.mxu0 %v6629_v4  ;;  %v1025_v4 = vld [vmem:[#allocation9 + $0x630] sm:$0xff] }
 0x2f1   :  { %2610 = vmatmul.mubr.bf16.vlgmr.msra.gmra.mrb[4].mxu1 %v8591_v46  ;;  %v6691_v9 = vcombine.high %v1021_v3, %v1025_v4 }
 0x2f2   :  { %2696 = vmatmul.mubr.bf16.vlgmr.msra.gmra.mrb[16].mxu0 %v8591_v46  ;;  %2621 = vmatpush1.bf16.msra.mxu1 %v6626_v7  ;;  %v6644_v46 = vcombine.low %v974_v17, %v978_v15  ;;  %v6682_v7 = vcombine.low %v1013_v56, %v1017_v57  ;;  %v6690_v17 = vcombine.low %v1021_v3, %v1025_v4  ;;  %v1070_v56 = vld [vmem:[#allocation9 + $0x798] sm:$0xff] }
 0x2f3   :  { %2652 = vmatprep.mubr.bf16.mxu1 %v8618_v53  ;;  %2707 = vmatpush1.bf16.msra.mxu0 %v6628_v10  ;;  %v6693_v10 = vcombine.high %v1022_v5, %v1026_v6  ;;  %v6692_v15 = vcombine.low %v1022_v5, %v1026_v6  ;;  %v1074_v57 = vld [vmem:[#allocation9 + $0x7b8] sm:$0xff] }
 0x2f4   :  { %2738 = vmatprep.mubr.bf16.mxu0 %v8618_v53  ;;  %2622 = vmatprep.subr.bf16.mxu1 %v6635_v11  ;;  %v6650_v53 = vcombine.low %v981_v23, %v985_v25  ;;  %v1029_v11 = vld [vmem:[#allocation9 + $0x650] sm:$0xff]  ;;  %v1038_v23 = vld [vmem:[#allocation9 + $0x698] sm:$0xff]  ;;  %v6740_v6 = vcombine.low %v1070_v56, %v1074_v57 }
 0x2f5   :  { %2708 = vmatprep.subr.bf16.mxu0 %v6637_v14  ;;  %v1034_v14 = vld [vmem:[#allocation9 + $0x678] sm:$0xff]  ;;  %v6698_v28 = vcombine.low %v1029_v11, %v1033_v12 }
 0x2f6   :  { %2623 = vmatpush1.bf16.msra.mxu1 %v6634_v45  ;;  %v6699_v45 = vcombine.high %v1029_v11, %v1033_v12  ;;  %v1042_v25 = vld [vmem:[#allocation9 + $0x6b8] sm:$0xff]  ;;  %v6700_v29 = vcombine.low %v1030_v13, %v1034_v14  ;;  %v7522_v11 = vld [vmem:[#allocation12 + $0x4] ss:$28 sps:$4 sm:$0xff]   ;;  %v7525_v12 = vld [vmem:[#allocation12 + $0xc] ss:$28 sps:$4 sm:$0xff]  }
 0x2f7   :  { %2709 = vmatpush1.bf16.msra.mxu0 %v6636_v16  ;;  %2624 = vmatprep.subr.bf16.mxu1 %v6643_v18  ;;  %v6701_v16 = vcombine.high %v1030_v13, %v1034_v14  ;;  %v1037_v18 = vld [vmem:[#allocation9 + $0x690] sm:$0xff]  ;;  %v6708_v36 = vcombine.low %v1038_v23, %v1042_v25  ;;  %v1078_v3 = vld [vmem:[#allocation9 + $0x7d8] sm:$0xff]  ;;  %v7520_v13 = vld [vmem:[#allocation12] ss:$28 sps:$4 sm:$0xff]  }
 0x2f8   :  { %2710 = vmatprep.subr.bf16.mxu0 %v6645_v22  ;;  %v1041_v22 = vld [vmem:[#allocation9 + $0x6b0] sm:$0xff]  ;;  %v1082_v4 = vld [vmem:[#allocation9 + $0x7f8] sm:$0xff] }
 0x2f9   :  { %v6706_v35 = vcombine.low %v1037_v18, %v1041_v22  ;;  %v7523_v14 = vld [vmem:[#allocation12 + $0x8] ss:$28 sps:$4 sm:$0xff]  }
 0x2fa   :  { %2625 = vmatpush1.bf16.msra.mxu1 %v6642_v30  ;;  %v6707_v30 = vcombine.high %v1037_v18, %v1041_v22  ;;  %v7534_v18 = vld [vmem:[#allocation12 + $0x74] ss:$28 sps:$4 sm:$0xff]   ;;  %v7537_v22 = vld [vmem:[#allocation12 + $0x7c] ss:$28 sps:$4 sm:$0xff]  }
 0x2fb   :  { %2711 = vmatpush1.bf16.msra.mxu0 %v6644_v46  ;;  %2626 = vmatprep.subr.bf16.mxu1 %v6651_v59  ;;  %v6709_v46 = vcombine.high %v1038_v23, %v1042_v25  ;;  %v1045_v59 = vld [vmem:[#allocation9 + $0x6d0] sm:$0xff]  ;;  %v7535_v25 = vld [vmem:[#allocation12 + $0x78] ss:$28 sps:$4 sm:$0xff]  }
 0x2fc   :  { %2712 = vmatprep.subr.bf16.mxu0 %v6653_v31  ;;  %v1049_v31 = vld [vmem:[#allocation9 + $0x6f0] sm:$0xff] }
 0x2fd   :  { %v6714_v20 = vcombine.low %v1045_v59, %v1049_v31  ;;  %v7532_v23 = vld [vmem:[#allocation12 + $0x70] ss:$28 sps:$4 sm:$0xff]  }
 0x2fe   :  { %2627 = vmatpush1.bf16.msra.mxu1 %v6650_v53  ;;  %v6715_v53 = vcombine.high %v1045_v59, %v1049_v31  ;;  %v7549_v59 = vld [vmem:[#allocation12 + $0xec] ss:$28 sps:$4 sm:$0xff]   ;;  %v7544_v31 = vld [vmem:[#allocation12 + $0xe0] ss:$28 sps:$4 sm:$0xff]  }
 0x2ff   :  { %2713 = vmatpush1.bf16.msra.mxu0 %v6652_v38  ;;  %2628 = vmatprep.subr.bf16.mxu1 %v6659_v39  ;;  %v6717_v38 = vcombine.high %v1046_v33, %v1050_v34  ;;  %v1053_v39 = vld [vmem:[#allocation9 + $0x710] sm:$0xff]  ;;  %v7552_v34 = vld [vmem:[#allocation12 + $0x11c] ss:$28 sps:$4 sm:$0xff]  }
 0x300   :  { %2714 = vmatprep.subr.bf16.mxu0 %v6661_v40  ;;  %v1057_v40 = vld [vmem:[#allocation9 + $0x730] sm:$0xff] }
 0x301   :  { %v6722_v49 = vcombine.low %v1053_v39, %v1057_v40  ;;  %v7547_v33 = vld [vmem:[#allocation12 + $0xe8] ss:$28 sps:$4 sm:$0xff]  }
 0x302   :  { %2629 = vmatpush1.bf16.msra.mxu1 %v6658_v24  ;;  %v6723_v24 = vcombine.high %v1053_v39, %v1057_v40  ;;  %v7561_v39 = vld [vmem:[#allocation12 + $0x15c] ss:$28 sps:$4 sm:$0xff]   ;;  %v7556_v40 = vld [vmem:[#allocation12 + $0x150] ss:$28 sps:$4 sm:$0xff]  }
 0x303   :  { %2715 = vmatpush1.bf16.msra.mxu0 %v6660_v26  ;;  %2630 = vmatprep.subr.bf16.mxu1 %v6667_v27  ;;  %v6725_v26 = vcombine.high %v1054_v42, %v1058_v19  ;;  %v1061_v27 = vld [vmem:[#allocation9 + $0x750] sm:$0xff]  ;;  %v7559_v42 = vld [vmem:[#allocation12 + $0x158] ss:$28 sps:$4 sm:$0xff]  }
 0x304   :  { %2716 = vmatprep.subr.bf16.mxu0 %v6669_v43  ;;  %v1065_v43 = vld [vmem:[#allocation9 + $0x770] sm:$0xff] }
 0x305   :  { %v6730_v58 = vcombine.low %v1061_v27, %v1065_v43  ;;  %v7564_v19 = vld [vmem:[#allocation12 + $0x18c] ss:$28 sps:$4 sm:$0xff]  }
 0x306   :  { %2631 = vmatpush1.bf16.msra.mxu1 %v6666_v51  ;;  %v6731_v51 = vcombine.high %v1061_v27, %v1065_v43  ;;  %v7573_v27 = vld [vmem:[#allocation12 + $0x1cc] ss:$28 sps:$4 sm:$0xff]   ;;  %v7568_v43 = vld [vmem:[#allocation12 + $0x1c0] ss:$28 sps:$4 sm:$0xff]  }
 0x307   :  { %2717 = vmatpush1.bf16.msra.mxu0 %v6668_v52  ;;  %2632 = vmatprep.subr.bf16.mxu1 %v6675_v54  ;;  %v6733_v52 = vcombine.high %v1062_v44, %v1066_v47  ;;  %v1069_v54 = vld [vmem:[#allocation9 + $0x790] sm:$0xff]  ;;  %v7576_v47 = vld [vmem:[#allocation12 + $0x1fc] ss:$28 sps:$4 sm:$0xff]  }
 0x308   :  { %2718 = vmatprep.subr.bf16.mxu0 %v6677_v55  ;;  %v1073_v55 = vld [vmem:[#allocation9 + $0x7b0] sm:$0xff] }
 0x309   :  { %v6738_v5 = vcombine.low %v1069_v54, %v1073_v55  ;;  %v7571_v44 = vld [vmem:[#allocation12 + $0x1c8] ss:$28 sps:$4 sm:$0xff]  }
 0x30a   :  { %2633 = vmatpush1.bf16.msra.mxu1 %v6674_v61  ;;  %v6739_v61 = vcombine.high %v1069_v54, %v1073_v55  ;;  %v7585_v54 = vld [vmem:[#allocation12 + $0x23c] ss:$28 sps:$4 sm:$0xff]   ;;  %v7580_v55 = vld [vmem:[#allocation12 + $0x230] ss:$28 sps:$4 sm:$0xff]  }
 0x30b   :  { %2719 = vmatpush1.bf16.msra.mxu0 %v6676_v63  ;;  %2634 = vmatprep.subr.bf16.mxu1 %v6683_v0  ;;  %v6741_v63 = vcombine.high %v1070_v56, %v1074_v57  ;;  %v1077_v0 = vld [vmem:[#allocation9 + $0x7d0] sm:$0xff]  ;;  %v7583_v56 = vld [vmem:[#allocation12 + $0x238] ss:$28 sps:$4 sm:$0xff]  }
 0x30c   :  { %2720 = vmatprep.subr.bf16.mxu0 %v6685_v2  ;;  %v1081_v2 = vld [vmem:[#allocation9 + $0x7f0] sm:$0xff] }
 0x30d   :  { %v7588_v57 = vld [vmem:[#allocation12 + $0x26c] ss:$28 sps:$4 sm:$0xff]  }
 0x30e   :  { %2635 = vmatpush1.bf16.msra.mxu1 %v6682_v7  ;;  %v6747_v7 = vcombine.high %v1077_v0, %v1081_v2 }
 0x30f   :  { %2721 = vmatpush1.bf16.msra.mxu0 %v6684_v8  ;;  %2636 = vmatprep.subr.bf16.mxu1 %v6691_v9  ;;  %v6749_v8 = vcombine.high %v1078_v3, %v1082_v4  ;;  %v6746_v9 = vcombine.low %v1077_v0, %v1081_v2  ;;  %v7597_v0 = vld [vmem:[#allocation12 + $0x2ac] ss:$28 sps:$4 sm:$0xff]   ;;  %v7592_v2 = vld [vmem:[#allocation12 + $0x2a0] ss:$28 sps:$4 sm:$0xff]  }
 0x310   :  { %2722 = vmatprep.subr.bf16.mxu0 %v6693_v10  ;;  %v6748_v10 = vcombine.low %v1078_v3, %v1082_v4  ;;  %v7595_v3 = vld [vmem:[#allocation12 + $0x2a8] ss:$28 sps:$4 sm:$0xff]   ;;  %v7600_v4 = vld [vmem:[#allocation12 + $0x2dc] ss:$28 sps:$4 sm:$0xff]  }
 0x312   :  { %2637 = vmatpush1.bf16.msra.mxu1 %v6690_v17  ;;  %v7528_v17 = vld [vmem:[#allocation12 + $0x3c] ss:$28 sps:$4 sm:$0xff]  }
 0x313   :  { %2723 = vmatpush1.bf16.msra.mxu0 %v6692_v15  ;;  %2638 = vmatprep.subr.bf16.mxu1 %v6699_v45  ;;  %v7531_v15 = vld [vmem:[#allocation12 + $0x44] ss:$28 sps:$4 sm:$0xff]   ;;  %v7526_v45 = vld [vmem:[#allocation12 + $0x38] ss:$28 sps:$4 sm:$0xff]  }
 0x314   :  { %2724 = vmatprep.subr.bf16.mxu0 %v6701_v16  ;;  %v7529_v16 = vld [vmem:[#allocation12 + $0x40] ss:$28 sps:$4 sm:$0xff]  }
 0x316   :  { %2639 = vmatpush1.bf16.msra.mxu1 %v6698_v28  ;;  %v7540_v28 = vld [vmem:[#allocation12 + $0xac] ss:$28 sps:$4 sm:$0xff]  }
 0x317   :  { %2725 = vmatpush1.bf16.msra.mxu0 %v6700_v29  ;;  %2640 = vmatprep.subr.bf16.mxu1 %v6707_v30  ;;  %v7543_v29 = vld [vmem:[#allocation12 + $0xb4] ss:$28 sps:$4 sm:$0xff]   ;;  %v7538_v30 = vld [vmem:[#allocation12 + $0xa8] ss:$28 sps:$4 sm:$0xff]  }
 0x318   :  { %2726 = vmatprep.subr.bf16.mxu0 %v6709_v46  ;;  %v7546_v46 = vld [vmem:[#allocation12 + $0xe4] ss:$28 sps:$4 sm:$0xff]  }
 0x31a   :  { %2641 = vmatpush1.bf16.msra.mxu1 %v6706_v35  ;;  %v7555_v35 = vld [vmem:[#allocation12 + $0x124] ss:$28 sps:$4 sm:$0xff]  }
 0x31b   :  { %2727 = vmatpush1.bf16.msra.mxu0 %v6708_v36  ;;  %2642 = vmatprep.subr.bf16.mxu1 %v6715_v53  ;;  %v7550_v36 = vld [vmem:[#allocation12 + $0x118] ss:$28 sps:$4 sm:$0xff]   ;;  %v7553_v53 = vld [vmem:[#allocation12 + $0x120] ss:$28 sps:$4 sm:$0xff]  }
 0x31c   :  { %2728 = vmatprep.subr.bf16.mxu0 %v6717_v38  ;;  %v7558_v38 = vld [vmem:[#allocation12 + $0x154] ss:$28 sps:$4 sm:$0xff]  }
 0x31e   :  { %2643 = vmatpush1.bf16.msra.mxu1 %v6714_v20  ;;  %v7567_v20 = vld [vmem:[#allocation12 + $0x194] ss:$28 sps:$4 sm:$0xff]  }
 0x31f   :  { %2729 = vmatpush1.bf16.msra.mxu0 %v6716_v21  ;;  %2644 = vmatprep.subr.bf16.mxu1 %v6723_v24  ;;  %v7562_v21 = vld [vmem:[#allocation12 + $0x188] ss:$28 sps:$4 sm:$0xff]   ;;  %v7565_v24 = vld [vmem:[#allocation12 + $0x190] ss:$28 sps:$4 sm:$0xff]  }
 0x320   :  { %2730 = vmatprep.subr.bf16.mxu0 %v6725_v26  ;;  %v7570_v26 = vld [vmem:[#allocation12 + $0x1c4] ss:$28 sps:$4 sm:$0xff]  }
 0x322   :  { %2645 = vmatpush1.bf16.msra.mxu1 %v6722_v49  ;;  %v7579_v49 = vld [vmem:[#allocation12 + $0x204] ss:$28 sps:$4 sm:$0xff]  }
 0x323   :  { %2731 = vmatpush1.bf16.msra.mxu0 %v6724_v50  ;;  %2646 = vmatprep.subr.bf16.mxu1 %v6731_v51  ;;  %v7574_v50 = vld [vmem:[#allocation12 + $0x1f8] ss:$28 sps:$4 sm:$0xff]   ;;  %v7577_v51 = vld [vmem:[#allocation12 + $0x200] ss:$28 sps:$4 sm:$0xff]  }
 0x324   :  { %2732 = vmatprep.subr.bf16.mxu0 %v6733_v52  ;;  %v7582_v52 = vld [vmem:[#allocation12 + $0x234] ss:$28 sps:$4 sm:$0xff]  }
 0x326   :  { %2647 = vmatpush1.bf16.msra.mxu1 %v6730_v58  ;;  %v7591_v58 = vld [vmem:[#allocation12 + $0x274] ss:$28 sps:$4 sm:$0xff]  }
 0x327   :  { %2733 = vmatpush1.bf16.msra.mxu0 %v6732_v60  ;;  %2648 = vmatprep.subr.bf16.mxu1 %v6739_v61  ;;  %v7586_v60 = vld [vmem:[#allocation12 + $0x268] ss:$28 sps:$4 sm:$0xff]   ;;  %v7589_v61 = vld [vmem:[#allocation12 + $0x270] ss:$28 sps:$4 sm:$0xff]  }
 0x328   :  { %2734 = vmatprep.subr.bf16.mxu0 %v6741_v63  ;;  %v7594_v63 = vld [vmem:[#allocation12 + $0x2a4] ss:$28 sps:$4 sm:$0xff]  }
 0x32a   :  { %2649 = vmatpush1.bf16.msra.mxu1 %v6738_v5  ;;  %v7603_v5 = vld [vmem:[#allocation12 + $0x2e4] ss:$28 sps:$4 sm:$0xff]  }
 0x32b   :  { %2735 = vmatpush1.bf16.msra.mxu0 %v6740_v6  ;;  %2650 = vmatprep.subr.bf16.mxu1 %v6747_v7  ;;  %v7598_v6 = vld [vmem:[#allocation12 + $0x2d8] ss:$28 sps:$4 sm:$0xff]   ;;  %v7601_v7 = vld [vmem:[#allocation12 + $0x2e0] ss:$28 sps:$4 sm:$0xff]  }
 0x32c   :  { %2736 = vmatprep.subr.bf16.mxu0 %v6749_v8  ;;  %v7606_v8 = vld [vmem:[#allocation12 + $0x314] ss:$28 sps:$4 sm:$0xff]  }
 0x32e   :  { %2651 = vmatpush1.bf16.msra.mxu1 %v6746_v9  ;;  %v7609_v9 = vld [vmem:[#allocation12 + $0x31c] ss:$28 sps:$4 sm:$0xff]  }
 0x32f   :  { %2737 = vmatpush1.bf16.msra.mxu0 %v6748_v10  ;;  %5658 = vmatprep.subr.bf16.mxu1 %v7522_v11  ;;  %v7604_v10 = vld [vmem:[#allocation12 + $0x310] ss:$28 sps:$4 sm:$0xff]   ;;  %v7607_v11 = vld [vmem:[#allocation12 + $0x318] ss:$28 sps:$4 sm:$0xff]  }
 0x330   :  { %5830 = vmatprep.subr.bf16.mxu0 %v7525_v12  ;;  %v7612_v12 = vld [vmem:[#allocation12 + $0x34c] ss:$28 sps:$4 sm:$0xff]  }
 0x331   :  { %2653 = vmatmul.mubr.bf16.vlgmr.msra.gmra.mrb[4].mxu1 %v8616_v48 }
 0x332   :  { %2739 = vmatmul.mubr.bf16.vlgmr.msra.gmra.mrb[16].mxu0 %v8616_v48  ;;  %5659 = vmatpush1.bf16.msra.mxu1 %v7520_v13  ;;  %v7541_v48 = vld [vmem:[#allocation12 + $0xb0] ss:$28 sps:$4 sm:$0xff]  }
 0x333   :  { %5831 = vmatpush1.bf16.msra.mxu0 %v7523_v14  ;;  %5660 = vmatprep.subr.bf16.mxu1 %v7528_v17  ;;  %v7615_v13 = vld [vmem:[#allocation12 + $0x354] ss:$28 sps:$4 sm:$0xff]   ;;  %v7610_v14 = vld [vmem:[#allocation12 + $0x348] ss:$28 sps:$4 sm:$0xff]  }
 0x334   :  { %5832 = vmatprep.subr.bf16.mxu0 %v7531_v15  ;;  %v7613_v17 = vld [vmem:[#allocation12 + $0x350] ss:$28 sps:$4 sm:$0xff]   ;;  %v7618_v15 = vld [vmem:[#allocation12 + $0x384] ss:$28 sps:$4 sm:$0xff]  }
 0x336   :  { %5661 = vmatpush1.bf16.msra.mxu1 %v7526_v45  ;;  %v7621_v45 = vld [vmem:[#allocation12 + $0x38c] ss:$28 sps:$4 sm:$0xff]  }
 0x337   :  { %5833 = vmatpush1.bf16.msra.mxu0 %v7529_v16  ;;  %5662 = vmatprep.subr.bf16.mxu1 %v7534_v18  ;;  %v8632_v16 = vld [vmem:[#allocation10] sm:$0xff] }
 0x338   :  { %5834 = vmatprep.subr.bf16.mxu0 %v7537_v22  ;;  %v1088_v18 = vrot.slane %v8632_v16, %v8550_v37  ;;  %v1096_v22 = vrot.slane %v8632_v16, %v8606_v62 }
 0x33a   :  { %5663 = vmatpush1.bf16.msra.mxu1 %v7532_v23  ;;  %v1092_v23 = vrot.slane %v8632_v16, %v8553_v41 }
 0x33b   :  { %5835 = vmatpush1.bf16.msra.mxu0 %v7535_v25  ;;  %5664 = vmatprep.subr.bf16.mxu1 %v7540_v28  ;;  %v1100_v25 = vrot.slane %v8632_v16, %v8609_v1 }
 0x33c   :  { %5836 = vmatprep.subr.bf16.mxu0 %v7543_v29 }
 0x33e   :  { %5665 = vmatpush1.bf16.msra.mxu1 %v7538_v30 }
 0x33f   :  { %5837 = vmatpush1.bf16.msra.mxu0 %v7541_v48  ;;  %5666 = vmatprep.subr.bf16.mxu1 %v7546_v46 }
 0x340   :  { %5838 = vmatprep.subr.bf16.mxu0 %v7549_v59 }
 0x342   :  { %5667 = vmatpush1.bf16.msra.mxu1 %v7544_v31 }
 0x343   :  { %5839 = vmatpush1.bf16.msra.mxu0 %v7547_v33  ;;  %5668 = vmatprep.subr.bf16.mxu1 %v7552_v34 }
 0x344   :  { %5840 = vmatprep.subr.bf16.mxu0 %v7555_v35 }
 0x346   :  { %5669 = vmatpush1.bf16.msra.mxu1 %v7550_v36 }
 0x347   :  { %5841 = vmatpush1.bf16.msra.mxu0 %v7553_v53  ;;  %5670 = vmatprep.subr.bf16.mxu1 %v7558_v38 }
 0x348   :  { %5842 = vmatprep.subr.bf16.mxu0 %v7561_v39 }
 0x34a   :  { %5671 = vmatpush1.bf16.msra.mxu1 %v7556_v40 }
 0x34b   :  { %5843 = vmatpush1.bf16.msra.mxu0 %v7559_v42  ;;  %5672 = vmatprep.subr.bf16.mxu1 %v7564_v19 }
 0x34c   :  { %5844 = vmatprep.subr.bf16.mxu0 %v7567_v20 }
 0x34e   :  { %5673 = vmatpush1.bf16.msra.mxu1 %v7562_v21 }
 0x34f   :  { %5845 = vmatpush1.bf16.msra.mxu0 %v7565_v24  ;;  %5674 = vmatprep.subr.bf16.mxu1 %v7570_v26 }
 0x350   :  { %5846 = vmatprep.subr.bf16.mxu0 %v7573_v27 }
 0x352   :  { %5675 = vmatpush1.bf16.msra.mxu1 %v7568_v43 }
 0x353   :  { %5847 = vmatpush1.bf16.msra.mxu0 %v7571_v44  ;;  %5676 = vmatprep.subr.bf16.mxu1 %v7576_v47 }
 0x354   :  { %5848 = vmatprep.subr.bf16.mxu0 %v7579_v49 }
 0x356   :  { %5677 = vmatpush1.bf16.msra.mxu1 %v7574_v50 }
 0x357   :  { %5849 = vmatpush1.bf16.msra.mxu0 %v7577_v51  ;;  %5678 = vmatprep.subr.bf16.mxu1 %v7582_v52 }
 0x358   :  { %5850 = vmatprep.subr.bf16.mxu0 %v7585_v54 }
 0x35a   :  { %5679 = vmatpush1.bf16.msra.mxu1 %v7580_v55 }
 0x35b   :  { %5851 = vmatpush1.bf16.msra.mxu0 %v7583_v56  ;;  %5680 = vmatprep.subr.bf16.mxu1 %v7588_v57 }
 0x35c   :  { %5852 = vmatprep.subr.bf16.mxu0 %v7591_v58 }
 0x35e   :  { %5681 = vmatpush1.bf16.msra.mxu1 %v7586_v60 }
 0x35f   :  { %5853 = vmatpush1.bf16.msra.mxu0 %v7589_v61  ;;  %5682 = vmatprep.subr.bf16.mxu1 %v7594_v63  ;;  %v7616_v63 = vld [vmem:[#allocation12 + $0x380] ss:$28 sps:$4 sm:$0xff]  }
 0x360   :  { %5854 = vmatprep.subr.bf16.mxu0 %v7597_v0  ;;  %v7619_v0 = vld [vmem:[#allocation12 + $0x388] ss:$28 sps:$4 sm:$0xff]  }
 0x362   :  { %5683 = vmatpush1.bf16.msra.mxu1 %v7592_v2  ;;  %v7624_v2 = vld [vmem:[#allocation12 + $0x3bc] ss:$28 sps:$4 sm:$0xff]  }
 0x363   :  { %5855 = vmatpush1.bf16.msra.mxu0 %v7595_v3  ;;  %5684 = vmatprep.subr.bf16.mxu1 %v7600_v4  ;;  %v7627_v3 = vld [vmem:[#allocation12 + $0x3c4] ss:$28 sps:$4 sm:$0xff]   ;;  %v7622_v4 = vld [vmem:[#allocation12 + $0x3b8] ss:$28 sps:$4 sm:$0xff]  }
 0x364   :  { %5856 = vmatprep.subr.bf16.mxu0 %v7603_v5  ;;  %v7625_v5 = vld [vmem:[#allocation12 + $0x3c0] ss:$28 sps:$4 sm:$0xff]  }
 0x366   :  { %5685 = vmatpush1.bf16.msra.mxu1 %v7598_v6  ;;  %v7630_v6 = vld [vmem:[#allocation12 + $0x3f4] ss:$28 sps:$4 sm:$0xff]  }
 0x367   :  { %5857 = vmatpush1.bf16.msra.mxu0 %v7601_v7  ;;  %5686 = vmatprep.subr.bf16.mxu1 %v7606_v8  ;;  %v7633_v7 = vld [vmem:[#allocation12 + $0x3fc] ss:$28 sps:$4 sm:$0xff]   ;;  %v7628_v8 = vld [vmem:[#allocation12 + $0x3f0] ss:$28 sps:$4 sm:$0xff]  }
 0x368   :  { %5858 = vmatprep.subr.bf16.mxu0 %v7609_v9  ;;  %v7631_v9 = vld [vmem:[#allocation12 + $0x3f8] ss:$28 sps:$4 sm:$0xff]  }
 0x36a   :  { %5687 = vmatpush1.bf16.msra.mxu1 %v7604_v10  ;;  %v7636_v10 = vld [vmem:[#allocation12 + $0x42c] ss:$28 sps:$4 sm:$0xff]  }
 0x36b   :  { %5859 = vmatpush1.bf16.msra.mxu0 %v7607_v11  ;;  %5688 = vmatprep.subr.bf16.mxu1 %v7612_v12  ;;  %v7639_v11 = vld [vmem:[#allocation12 + $0x434] ss:$28 sps:$4 sm:$0xff]   ;;  %v7634_v12 = vld [vmem:[#allocation12 + $0x428] ss:$28 sps:$4 sm:$0xff]  }
 0x36c   :  { %5860 = vmatprep.subr.bf16.mxu0 %v7615_v13  ;;  %v7637_v13 = vld [vmem:[#allocation12 + $0x430] ss:$28 sps:$4 sm:$0xff]  }
 0x36e   :  { %5689 = vmatpush1.bf16.msra.mxu1 %v7610_v14  ;;  %v7642_v14 = vld [vmem:[#allocation12 + $0x464] ss:$28 sps:$4 sm:$0xff]  }
 0x36f   :  { %5861 = vmatpush1.bf16.msra.mxu0 %v7613_v17  ;;  %5701 = vmatprep.subr.bf16.mxu1 %v7618_v15  ;;  %v7645_v17 = vld [vmem:[#allocation12 + $0x46c] ss:$28 sps:$4 sm:$0xff]   ;;  %v7640_v15 = vld [vmem:[#allocation12 + $0x460] ss:$28 sps:$4 sm:$0xff]  }
 0x370   :  { %5873 = vmatprep.subr.bf16.mxu0 %v7621_v45  ;;  %v7643_v45 = vld [vmem:[#allocation12 + $0x468] ss:$28 sps:$4 sm:$0xff]  }
 0x384   :  { %v2482_v28 = vpop.f32.mrb[0].mxu1  ;;  %v2568_v29 = vpop.f32.mrb[12].mxu0 }
 0x385   :  { %v7302_v30 = vadd.f32 %v2482_v28, %v1088_v18  ;;  %v7306_v48 = vadd.f32 %v2568_v29, %v1096_v22  ;;  %v2484_v46 = vpop.f32.mrb[1].mxu1  ;;  %v2570_v59 = vpop.f32.mrb[13].mxu0  ;;  %v7654_v28 = vld [vmem:[#allocation12 + $0x4d4] ss:$28 sps:$4 sm:$0xff]   ;;  %v7657_v29 = vld [vmem:[#allocation12 + $0x4dc] ss:$28 sps:$4 sm:$0xff]  }
 0x386   :  { %v7303_v31 = vadd.f32 %v2484_v46, %v1092_v23  ;;  %v7307_v33 = vadd.f32 %v2570_v59, %v1100_v25  ;;  %v2486_v34 = vpop.f32.mrb[2].mxu1  ;;  %v2572_v35 = vpop.f32.mrb[14].mxu0  ;;  %v7660_v46 = vld [vmem:[#allocation12 + $0x50c] ss:$28 sps:$4 sm:$0xff]   ;;  %v7663_v59 = vld [vmem:[#allocation12 + $0x514] ss:$28 sps:$4 sm:$0xff]  }
 0x387   :  { %vm2749_vm12 = vcmp.gt.f32.partialorder %v7302_v30, 0.0  ;;  %v2765_v36 = vmul.f32 0.2, %v7302_v30  ;;  %vm2751_vm13 = vcmp.gt.f32.partialorder %v7306_v48, 0.0  ;;  %v2767_v53 = vmul.f32 0.2, %v7306_v48 }
 0x388   :  { %vm2750_vm14 = vcmp.gt.f32.partialorder %v7303_v31, 0.0  ;;  %v2766_v38 = vmul.f32 0.2, %v7303_v31  ;;  %vm2752_vm15 = vcmp.gt.f32.partialorder %v7307_v33, 0.0  ;;  %v2768_v39 = vmul.f32 0.2, %v7307_v33 }
 0x389   :  { %v7304_v40 = vadd.f32 %v2486_v34, %v1088_v18  ;;  %v7308_v42 = vadd.f32 %v2572_v35, %v1096_v22  ;;  %v2488_v19 = vpop.f32.mrb[3].mxu1  ;;  %v2574_v20 = vpop.f32.mrb[15].mxu0  ;;  %v2781_v21 = vsel %vm2749_vm12, %v7302_v30, %v2765_v36  ;;  %v2783_v24 = vsel %vm2751_vm13, %v7306_v48, %v2767_v53  ;;  %v7648_v18 = vld [vmem:[#allocation12 + $0x49c] ss:$28 sps:$4 sm:$0xff]   ;;  %v7651_v22 = vld [vmem:[#allocation12 + $0x4a4] ss:$28 sps:$4 sm:$0xff]  }
 0x38a   :  { %v7305_v26 = vadd.f32 %v2488_v19, %v1092_v23  ;;  %v7309_v27 = vadd.f32 %v2574_v20, %v1100_v25  ;;  %v2782_v50 = vsel %vm2750_vm14, %v7303_v31, %v2766_v38  ;;  %v2784_v51 = vsel %vm2752_vm15, %v7307_v33, %v2768_v39  ;;  %v7646_v23 = vld [vmem:[#allocation12 + $0x498] ss:$28 sps:$4 sm:$0xff]   ;;  %v7649_v25 = vld [vmem:[#allocation12 + $0x4a0] ss:$28 sps:$4 sm:$0xff]   ;;  %v7652_v30 = vld [vmem:[#allocation12 + $0x4d0] ss:$28 sps:$4 sm:$0xff]  }
 0x38b   :  { %vm2757_vm0 = vcmp.gt.f32.partialorder %v7304_v40, 0.0  ;;  %v2773_v43 = vmul.f32 0.2, %v7304_v40  ;;  %vm2759_vm1 = vcmp.gt.f32.partialorder %v7308_v42, 0.0  ;;  %v2775_v44 = vmul.f32 0.2, %v7308_v42 }
 0x38c   :  { %vm2758_vm2 = vcmp.gt.f32.partialorder %v7305_v26, 0.0  ;;  %v2774_v47 = vmul.f32 0.2, %v7305_v26  ;;  %vm2760_vm3 = vcmp.gt.f32.partialorder %v7309_v27, 0.0  ;;  %v2776_v49 = vmul.f32 0.2, %v7309_v27 }
 0x38d   :  { %v2789_v52 = vsel %vm2757_vm0, %v7304_v40, %v2773_v43  ;;  %v2791_v54 = vsel %vm2759_vm1, %v7308_v42, %v2775_v44  ;;  %v7655_v48 = vld [vmem:[#allocation12 + $0x4d8] ss:$28 sps:$4 sm:$0xff]   ;;  %v7658_v31 = vld [vmem:[#allocation12 + $0x508] ss:$28 sps:$4 sm:$0xff]   ;;  %v7661_v33 = vld [vmem:[#allocation12 + $0x510] ss:$28 sps:$4 sm:$0xff]  }
 0x38e   :  { %v8644_v55 = vpack.c.bf16 %v2789_v52, %v2781_v21  ;;  %v8646_v56 = vpack.c.bf16 %v2791_v54, %v2783_v24  ;;  %v2790_v57 = vsel %vm2758_vm2, %v7305_v26, %v2774_v47  ;;  %v2792_v58 = vsel %vm2760_vm3, %v7309_v27, %v2776_v49  ;;  %v7666_v34 = vld [vmem:[#allocation12 + $0x544] ss:$28 sps:$4 sm:$0xff]   ;;  %v7669_v35 = vld [vmem:[#allocation12 + $0x54c] ss:$28 sps:$4 sm:$0xff]   ;;  %v7672_v38 = vld [vmem:[#allocation12 + $0x57c] ss:$28 sps:$4 sm:$0xff]  }
 0x38f   :  { %v8648_v60 = vpack.c.bf16 %v2790_v57, %v2782_v50  ;;  %v8650_v61 = vpack.c.bf16 %v2792_v58, %v2784_v51  ;;  %v7664_v36 = vld [vmem:[#allocation12 + $0x540] ss:$28 sps:$4 sm:$0xff]   ;;  %v7667_v53 = vld [vmem:[#allocation12 + $0x548] ss:$28 sps:$4 sm:$0xff]   ;;  %v7670_v40 = vld [vmem:[#allocation12 + $0x578] ss:$28 sps:$4 sm:$0xff]  }
 0x390   :  { %v7675_v39 = vld [vmem:[#allocation12 + $0x584] ss:$28 sps:$4 sm:$0xff]   ;;  %v7678_v19 = vld [vmem:[#allocation12 + $0x5b4] ss:$28 sps:$4 sm:$0xff]   ;;  %v7681_v20 = vld [vmem:[#allocation12 + $0x5bc] ss:$28 sps:$4 sm:$0xff]  }
 0x391   :  { %5690 = vmatprep.mubr.bf16.mxu1 %v8648_v60  ;;  %5862 = vmatprep.mubr.bf16.mxu0 %v8648_v60  ;;  %v7673_v42 = vld [vmem:[#allocation12 + $0x580] ss:$28 sps:$4 sm:$0xff]   ;;  %v7676_v21 = vld [vmem:[#allocation12 + $0x5b0] ss:$28 sps:$4 sm:$0xff]   ;;  %v7679_v24 = vld [vmem:[#allocation12 + $0x5b8] ss:$28 sps:$4 sm:$0xff]  }
 0x392   :  { %5691 = vmatmul.mubr.bf16.vlgmr.msra.gmra.mrb[8].mxu1 %v8644_v55  ;;  %5863 = vmatmul.mubr.bf16.vlgmr.msra.gmra.mrb[20].mxu0 %v8644_v55  ;;  %v7684_v26 = vld [vmem:[#allocation12 + $0x5ec] ss:$28 sps:$4 sm:$0xff]   ;;  %v7687_v27 = vld [vmem:[#allocation12 + $0x5f4] ss:$28 sps:$4 sm:$0xff]   ;;  %v7690_v47 = vld [vmem:[#allocation12 + $0x624] ss:$28 sps:$4 sm:$0xff]  }
 0x393   :  { %5702 = vmatpush1.bf16.msra.mxu1 %v7616_v63  ;;  %5874 = vmatpush1.bf16.msra.mxu0 %v7619_v0  ;;  %v7682_v43 = vld [vmem:[#allocation12 + $0x5e8] ss:$28 sps:$4 sm:$0xff]   ;;  %v7685_v44 = vld [vmem:[#allocation12 + $0x5f0] ss:$28 sps:$4 sm:$0xff]   ;;  %v7688_v50 = vld [vmem:[#allocation12 + $0x620] ss:$28 sps:$4 sm:$0xff]  }
 0x394   :  { %5733 = vmatprep.mubr.bf16.mxu1 %v8650_v61  ;;  %5905 = vmatprep.mubr.bf16.mxu0 %v8650_v61  ;;  %v7693_v49 = vld [vmem:[#allocation12 + $0x62c] ss:$28 sps:$4 sm:$0xff]   ;;  %v7696_v52 = vld [vmem:[#allocation12 + $0x65c] ss:$28 sps:$4 sm:$0xff]   ;;  %v7699_v54 = vld [vmem:[#allocation12 + $0x664] ss:$28 sps:$4 sm:$0xff]  }
 0x395   :  { %5703 = vmatprep.subr.bf16.mxu1 %v7624_v2  ;;  %5875 = vmatprep.subr.bf16.mxu0 %v7627_v3  ;;  %v7691_v51 = vld [vmem:[#allocation12 + $0x628] ss:$28 sps:$4 sm:$0xff]   ;;  %v7694_v57 = vld [vmem:[#allocation12 + $0x658] ss:$28 sps:$4 sm:$0xff]   ;;  %v7697_v58 = vld [vmem:[#allocation12 + $0x660] ss:$28 sps:$4 sm:$0xff]  }
 0x396   :  { %v7702_v63 = vld [vmem:[#allocation12 + $0x694] ss:$28 sps:$4 sm:$0xff]   ;;  %v7705_v0 = vld [vmem:[#allocation12 + $0x69c] ss:$28 sps:$4 sm:$0xff]  }
 0x397   :  { %5704 = vmatpush1.bf16.msra.mxu1 %v7622_v4  ;;  %5876 = vmatpush1.bf16.msra.mxu0 %v7625_v5  ;;  %v7700_v2 = vld [vmem:[#allocation12 + $0x690] ss:$28 sps:$4 sm:$0xff]   ;;  %v7703_v3 = vld [vmem:[#allocation12 + $0x698] ss:$28 sps:$4 sm:$0xff]  }
 0x398   :  { %5705 = vmatprep.subr.bf16.mxu1 %v7630_v6  ;;  %5877 = vmatprep.subr.bf16.mxu0 %v7633_v7  ;;  %v7708_v4 = vld [vmem:[#allocation12 + $0x6cc] ss:$28 sps:$4 sm:$0xff]   ;;  %v7711_v5 = vld [vmem:[#allocation12 + $0x6d4] ss:$28 sps:$4 sm:$0xff]  }
 0x399   :  { %v7706_v6 = vld [vmem:[#allocation12 + $0x6c8] ss:$28 sps:$4 sm:$0xff]   ;;  %v7709_v7 = vld [vmem:[#allocation12 + $0x6d0] ss:$28 sps:$4 sm:$0xff]  }
 0x39b   :  { %5706 = vmatpush1.bf16.msra.mxu1 %v7628_v8  ;;  %5878 = vmatpush1.bf16.msra.mxu0 %v7631_v9  ;;  %v7714_v8 = vld [vmem:[#allocation12 + $0x704] ss:$28 sps:$4 sm:$0xff]   ;;  %v7717_v9 = vld [vmem:[#allocation12 + $0x70c] ss:$28 sps:$4 sm:$0xff]  }
 0x39c   :  { %5707 = vmatprep.subr.bf16.mxu1 %v7636_v10  ;;  %5879 = vmatprep.subr.bf16.mxu0 %v7639_v11  ;;  %v7712_v10 = vld [vmem:[#allocation12 + $0x700] ss:$28 sps:$4 sm:$0xff]   ;;  %v7715_v11 = vld [vmem:[#allocation12 + $0x708] ss:$28 sps:$4 sm:$0xff]  }
 0x39f   :  { %5708 = vmatpush1.bf16.msra.mxu1 %v7634_v12  ;;  %5880 = vmatpush1.bf16.msra.mxu0 %v7637_v13  ;;  %v7720_v12 = vld [vmem:[#allocation12 + $0x73c] ss:$28 sps:$4 sm:$0xff]   ;;  %v7723_v13 = vld [vmem:[#allocation12 + $0x744] ss:$28 sps:$4 sm:$0xff]  }
 0x3a0   :  { %5709 = vmatprep.subr.bf16.mxu1 %v7642_v14  ;;  %5881 = vmatprep.subr.bf16.mxu0 %v7645_v17  ;;  %v7718_v14 = vld [vmem:[#allocation12 + $0x738] ss:$28 sps:$4 sm:$0xff]   ;;  %v7721_v17 = vld [vmem:[#allocation12 + $0x740] ss:$28 sps:$4 sm:$0xff]  }
 0x3a3   :  { %5710 = vmatpush1.bf16.msra.mxu1 %v7640_v15  ;;  %5882 = vmatpush1.bf16.msra.mxu0 %v7643_v45  ;;  %v7726_v15 = vld [vmem:[#allocation12 + $0x774] ss:$28 sps:$4 sm:$0xff]   ;;  %v7729_v45 = vld [vmem:[#allocation12 + $0x77c] ss:$28 sps:$4 sm:$0xff]  }
 0x3a4   :  { %5711 = vmatprep.subr.bf16.mxu1 %v7648_v18  ;;  %5883 = vmatprep.subr.bf16.mxu0 %v7651_v22  ;;  %v7724_v18 = vld [vmem:[#allocation12 + $0x770] ss:$28 sps:$4 sm:$0xff]   ;;  %v7727_v22 = vld [vmem:[#allocation12 + $0x778] ss:$28 sps:$4 sm:$0xff]  }
 0x3a7   :  { %5712 = vmatpush1.bf16.msra.mxu1 %v7646_v23  ;;  %5884 = vmatpush1.bf16.msra.mxu0 %v7649_v25  ;;  %v7732_v23 = vld [vmem:[#allocation12 + $0x7ac] ss:$28 sps:$4 sm:$0xff]   ;;  %v7735_v25 = vld [vmem:[#allocation12 + $0x7b4] ss:$28 sps:$4 sm:$0xff]  }
 0x3a8   :  { %5713 = vmatprep.subr.bf16.mxu1 %v7654_v28  ;;  %5885 = vmatprep.subr.bf16.mxu0 %v7657_v29  ;;  %v7730_v28 = vld [vmem:[#allocation12 + $0x7a8] ss:$28 sps:$4 sm:$0xff]   ;;  %v7733_v29 = vld [vmem:[#allocation12 + $0x7b0] ss:$28 sps:$4 sm:$0xff]  }
 0x3ab   :  { %5714 = vmatpush1.bf16.msra.mxu1 %v7652_v30  ;;  %5886 = vmatpush1.bf16.msra.mxu0 %v7655_v48  ;;  %v7738_v30 = vld [vmem:[#allocation12 + $0x7e4] ss:$28 sps:$4 sm:$0xff]   ;;  %v7741_v48 = vld [vmem:[#allocation12 + $0x7ec] ss:$28 sps:$4 sm:$0xff]  }
 0x3ac   :  { %5715 = vmatprep.subr.bf16.mxu1 %v7660_v46  ;;  %5887 = vmatprep.subr.bf16.mxu0 %v7663_v59  ;;  %v7736_v46 = vld [vmem:[#allocation12 + $0x7e0] ss:$28 sps:$4 sm:$0xff]   ;;  %v7739_v59 = vld [vmem:[#allocation12 + $0x7e8] ss:$28 sps:$4 sm:$0xff]  }
 0x3af   :  { %5716 = vmatpush1.bf16.msra.mxu1 %v7658_v31  ;;  %5888 = vmatpush1.bf16.msra.mxu0 %v7661_v33  ;;  %v7744_v31 = vld [vmem:[#allocation12 + $0x81c] ss:$28 sps:$4 sm:$0xff]   ;;  %v7747_v33 = vld [vmem:[#allocation12 + $0x824] ss:$28 sps:$4 sm:$0xff]  }
 0x3b0   :  { %5717 = vmatprep.subr.bf16.mxu1 %v7666_v34  ;;  %5889 = vmatprep.subr.bf16.mxu0 %v7669_v35  ;;  %v7742_v34 = vld [vmem:[#allocation12 + $0x818] ss:$28 sps:$4 sm:$0xff]   ;;  %v7745_v35 = vld [vmem:[#allocation12 + $0x820] ss:$28 sps:$4 sm:$0xff]  }
 0x3b3   :  { %5718 = vmatpush1.bf16.msra.mxu1 %v7664_v36  ;;  %5890 = vmatpush1.bf16.msra.mxu0 %v7667_v53  ;;  %v7750_v36 = vld [vmem:[#allocation12 + $0x854] ss:$28 sps:$4 sm:$0xff]   ;;  %v7753_v53 = vld [vmem:[#allocation12 + $0x85c] ss:$28 sps:$4 sm:$0xff]  }
 0x3b4   :  { %5719 = vmatprep.subr.bf16.mxu1 %v7672_v38  ;;  %5891 = vmatprep.subr.bf16.mxu0 %v7675_v39  ;;  %v7748_v38 = vld [vmem:[#allocation12 + $0x850] ss:$28 sps:$4 sm:$0xff]   ;;  %v7751_v39 = vld [vmem:[#allocation12 + $0x858] ss:$28 sps:$4 sm:$0xff]  }
 0x3b7   :  { %5720 = vmatpush1.bf16.msra.mxu1 %v7670_v40  ;;  %5892 = vmatpush1.bf16.msra.mxu0 %v7673_v42  ;;  %v7756_v40 = vld [vmem:[#allocation12 + $0x88c] ss:$28 sps:$4 sm:$0xff]   ;;  %v7759_v42 = vld [vmem:[#allocation12 + $0x894] ss:$28 sps:$4 sm:$0xff]  }
 0x3b8   :  { %5721 = vmatprep.subr.bf16.mxu1 %v7678_v19  ;;  %5893 = vmatprep.subr.bf16.mxu0 %v7681_v20  ;;  %v7754_v19 = vld [vmem:[#allocation12 + $0x888] ss:$28 sps:$4 sm:$0xff]   ;;  %v7757_v20 = vld [vmem:[#allocation12 + $0x890] ss:$28 sps:$4 sm:$0xff]  }
 0x3bb   :  { %5722 = vmatpush1.bf16.msra.mxu1 %v7676_v21  ;;  %5894 = vmatpush1.bf16.msra.mxu0 %v7679_v24  ;;  %v7762_v21 = vld [vmem:[#allocation12 + $0x8c4] ss:$28 sps:$4 sm:$0xff]   ;;  %v7765_v24 = vld [vmem:[#allocation12 + $0x8cc] ss:$28 sps:$4 sm:$0xff]  }
 0x3bc   :  { %5723 = vmatprep.subr.bf16.mxu1 %v7684_v26  ;;  %5895 = vmatprep.subr.bf16.mxu0 %v7687_v27  ;;  %v7760_v26 = vld [vmem:[#allocation12 + $0x8c0] ss:$28 sps:$4 sm:$0xff]   ;;  %v7763_v27 = vld [vmem:[#allocation12 + $0x8c8] ss:$28 sps:$4 sm:$0xff]  }
 0x3bf   :  { %5724 = vmatpush1.bf16.msra.mxu1 %v7682_v43  ;;  %5896 = vmatpush1.bf16.msra.mxu0 %v7685_v44  ;;  %v7768_v43 = vld [vmem:[#allocation12 + $0x8fc] ss:$28 sps:$4 sm:$0xff]   ;;  %v7771_v44 = vld [vmem:[#allocation12 + $0x904] ss:$28 sps:$4 sm:$0xff]  }
 0x3c0   :  { %5725 = vmatprep.subr.bf16.mxu1 %v7690_v47  ;;  %5897 = vmatprep.subr.bf16.mxu0 %v7693_v49  ;;  %v7766_v47 = vld [vmem:[#allocation12 + $0x8f8] ss:$28 sps:$4 sm:$0xff]   ;;  %v7769_v49 = vld [vmem:[#allocation12 + $0x900] ss:$28 sps:$4 sm:$0xff]  }
 0x3c3   :  { %5726 = vmatpush1.bf16.msra.mxu1 %v7688_v50  ;;  %5898 = vmatpush1.bf16.msra.mxu0 %v7691_v51  ;;  %v7774_v50 = vld [vmem:[#allocation12 + $0x934] ss:$28 sps:$4 sm:$0xff]   ;;  %v7777_v51 = vld [vmem:[#allocation12 + $0x93c] ss:$28 sps:$4 sm:$0xff]  }
 0x3c4   :  { %5727 = vmatprep.subr.bf16.mxu1 %v7696_v52  ;;  %5899 = vmatprep.subr.bf16.mxu0 %v7699_v54  ;;  %v7772_v52 = vld [vmem:[#allocation12 + $0x930] ss:$28 sps:$4 sm:$0xff]   ;;  %v7775_v54 = vld [vmem:[#allocation12 + $0x938] ss:$28 sps:$4 sm:$0xff]  }
 0x3c7   :  { %5728 = vmatpush1.bf16.msra.mxu1 %v7694_v57  ;;  %5900 = vmatpush1.bf16.msra.mxu0 %v7697_v58  ;;  %v7780_v57 = vld [vmem:[#allocation12 + $0x96c] ss:$28 sps:$4 sm:$0xff]   ;;  %v7783_v58 = vld [vmem:[#allocation12 + $0x974] ss:$28 sps:$4 sm:$0xff]  }
 0x3c8   :  { %5729 = vmatprep.subr.bf16.mxu1 %v7702_v63  ;;  %5901 = vmatprep.subr.bf16.mxu0 %v7705_v0  ;;  %v7778_v63 = vld [vmem:[#allocation12 + $0x968] ss:$28 sps:$4 sm:$0xff]   ;;  %v7781_v0 = vld [vmem:[#allocation12 + $0x970] ss:$28 sps:$4 sm:$0xff]  }
 0x3cb   :  { %5730 = vmatpush1.bf16.msra.mxu1 %v7700_v2  ;;  %5902 = vmatpush1.bf16.msra.mxu0 %v7703_v3  ;;  %v7786_v2 = vld [vmem:[#allocation12 + $0x9a4] ss:$28 sps:$4 sm:$0xff]   ;;  %v7789_v3 = vld [vmem:[#allocation12 + $0x9ac] ss:$28 sps:$4 sm:$0xff]  }
 0x3cc   :  { %5731 = vmatprep.subr.bf16.mxu1 %v7708_v4  ;;  %5903 = vmatprep.subr.bf16.mxu0 %v7711_v5  ;;  %v1103_v4 = vsub.s32 4, %v8547_v32  ;;  %v1111_v5 = vsub.s32 6, %v8547_v32 }
 0x3cf   :  { %5732 = vmatpush1.bf16.msra.mxu1 %v7706_v6  ;;  %5904 = vmatpush1.bf16.msra.mxu0 %v7709_v7  ;;  %v1107_v6 = vsub.s32 5, %v8547_v32  ;;  %v7784_v7 = vld [vmem:[#allocation12 + $0x9a0] ss:$28 sps:$4 sm:$0xff]  }
 0x3d0   :  { %5744 = vmatprep.subr.bf16.mxu1 %v7714_v8  ;;  %5916 = vmatprep.subr.bf16.mxu0 %v7717_v9  ;;  %v7787_v8 = vld [vmem:[#allocation12 + $0x9a8] ss:$28 sps:$4 sm:$0xff]   ;;  %v1115_v9 = vsub.s32 7, %v8547_v32 }
 0x3d2   :  { %5734 = vmatmul.mubr.bf16.vlgmr.msra.gmra.mrb[8].mxu1 %v8646_v56  ;;  %5906 = vmatmul.mubr.bf16.vlgmr.msra.gmra.mrb[20].mxu0 %v8646_v56 }
 0x3d3   :  { %5745 = vmatpush1.bf16.msra.mxu1 %v7712_v10  ;;  %5917 = vmatpush1.bf16.msra.mxu0 %v7715_v11  ;;  %v7792_v10 = vld [vmem:[#allocation12 + $0x9dc] ss:$28 sps:$4 sm:$0xff]   ;;  %v7795_v11 = vld [vmem:[#allocation12 + $0x9e4] ss:$28 sps:$4 sm:$0xff]  }
 0x3d4   :  { %5746 = vmatprep.subr.bf16.mxu1 %v7720_v12  ;;  %5918 = vmatprep.subr.bf16.mxu0 %v7723_v13  ;;  %v1104_v12 = vrot.slane %v8632_v16, %v1103_v4  ;;  %v1112_v13 = vrot.slane %v8632_v16, %v1111_v5 }
 0x3d7   :  { %5747 = vmatpush1.bf16.msra.mxu1 %v7718_v14  ;;  %5919 = vmatpush1.bf16.msra.mxu0 %v7721_v17  ;;  %v1108_v14 = vrot.slane %v8632_v16, %v1107_v6  ;;  %v7790_v17 = vld [vmem:[#allocation12 + $0x9d8] ss:$28 sps:$4 sm:$0xff]  }
 0x3d8   :  { %5748 = vmatprep.subr.bf16.mxu1 %v7726_v15  ;;  %5920 = vmatprep.subr.bf16.mxu0 %v7729_v45  ;;  %v7793_v15 = vld [vmem:[#allocation12 + $0x9e0] ss:$28 sps:$4 sm:$0xff]   ;;  %v1116_v45 = vrot.slane %v8632_v16, %v1115_v9 }
 0x3db   :  { %5749 = vmatpush1.bf16.msra.mxu1 %v7724_v18  ;;  %5921 = vmatpush1.bf16.msra.mxu0 %v7727_v22  ;;  %v7798_v22 = vld [vmem:[#allocation12 + $0xa14] ss:$28 sps:$4 sm:$0xff]  }
 0x3dc   :  { %5750 = vmatprep.subr.bf16.mxu1 %v7732_v23  ;;  %5922 = vmatprep.subr.bf16.mxu0 %v7735_v25  ;;  %v7801_v23 = vld [vmem:[#allocation12 + $0xa1c] ss:$28 sps:$4 sm:$0xff]  }
 0x3df   :  { %5751 = vmatpush1.bf16.msra.mxu1 %v7730_v28  ;;  %5923 = vmatpush1.bf16.msra.mxu0 %v7733_v29 }
 0x3e0   :  { %5752 = vmatprep.subr.bf16.mxu1 %v7738_v30  ;;  %5924 = vmatprep.subr.bf16.mxu0 %v7741_v48 }
 0x3e3   :  { %5753 = vmatpush1.bf16.msra.mxu1 %v7736_v46  ;;  %5925 = vmatpush1.bf16.msra.mxu0 %v7739_v59 }
 0x3e4   :  { %5754 = vmatprep.subr.bf16.mxu1 %v7744_v31  ;;  %5926 = vmatprep.subr.bf16.mxu0 %v7747_v33  ;;  %v7796_v31 = vld [vmem:[#allocation12 + $0xa10] ss:$28 sps:$4 sm:$0xff]  }
 0x3e7   :  { %5755 = vmatpush1.bf16.msra.mxu1 %v7742_v34  ;;  %5927 = vmatpush1.bf16.msra.mxu0 %v7745_v35 }
 0x3e8   :  { %5756 = vmatprep.subr.bf16.mxu1 %v7750_v36  ;;  %5928 = vmatprep.subr.bf16.mxu0 %v7753_v53  ;;  %v7799_v53 = vld [vmem:[#allocation12 + $0xa18] ss:$28 sps:$4 sm:$0xff]  }
 0x3eb   :  { %5757 = vmatpush1.bf16.msra.mxu1 %v7748_v38  ;;  %5929 = vmatpush1.bf16.msra.mxu0 %v7751_v39  ;;  %v7804_v38 = vld [vmem:[#allocation12 + $0xa4c] ss:$28 sps:$4 sm:$0xff]   ;;  %v7807_v39 = vld [vmem:[#allocation12 + $0xa54] ss:$28 sps:$4 sm:$0xff]  }
 0x3ec   :  { %5758 = vmatprep.subr.bf16.mxu1 %v7756_v40  ;;  %5930 = vmatprep.subr.bf16.mxu0 %v7759_v42 }
 0x3ef   :  { %5759 = vmatpush1.bf16.msra.mxu1 %v7754_v19  ;;  %5931 = vmatpush1.bf16.msra.mxu0 %v7757_v20  ;;  %v7802_v19 = vld [vmem:[#allocation12 + $0xa48] ss:$28 sps:$4 sm:$0xff]   ;;  %v7805_v20 = vld [vmem:[#allocation12 + $0xa50] ss:$28 sps:$4 sm:$0xff]  }
 0x3f0   :  { %5760 = vmatprep.subr.bf16.mxu1 %v7762_v21  ;;  %5932 = vmatprep.subr.bf16.mxu0 %v7765_v24 }
 0x3f3   :  { %5761 = vmatpush1.bf16.msra.mxu1 %v7760_v26  ;;  %5933 = vmatpush1.bf16.msra.mxu0 %v7763_v27 }
 0x3f4   :  { %5762 = vmatprep.subr.bf16.mxu1 %v7768_v43  ;;  %5934 = vmatprep.subr.bf16.mxu0 %v7771_v44 }
 0x3f7   :  { %5763 = vmatpush1.bf16.msra.mxu1 %v7766_v47  ;;  %5935 = vmatpush1.bf16.msra.mxu0 %v7769_v49  ;;  %v7810_v47 = vld [vmem:[#allocation12 + $0xa84] ss:$28 sps:$4 sm:$0xff]   ;;  %v7813_v49 = vld [vmem:[#allocation12 + $0xa8c] ss:$28 sps:$4 sm:$0xff]  }
 0x3f8   :  { %5764 = vmatprep.subr.bf16.mxu1 %v7774_v50  ;;  %5936 = vmatprep.subr.bf16.mxu0 %v7777_v51 }
 0x3fb   :  { %5765 = vmatpush1.bf16.msra.mxu1 %v7772_v52  ;;  %5937 = vmatpush1.bf16.msra.mxu0 %v7775_v54 }
 0x3fc   :  { %5766 = vmatprep.subr.bf16.mxu1 %v7780_v57  ;;  %5938 = vmatprep.subr.bf16.mxu0 %v7783_v58 }
 0x3ff   :  { %5767 = vmatpush1.bf16.msra.mxu1 %v7778_v63  ;;  %5939 = vmatpush1.bf16.msra.mxu0 %v7781_v0 }
 0x400   :  { %5768 = vmatprep.subr.bf16.mxu1 %v7786_v2  ;;  %5940 = vmatprep.subr.bf16.mxu0 %v7789_v3 }
 0x403   :  { %5769 = vmatpush1.bf16.msra.mxu1 %v7784_v7  ;;  %5941 = vmatpush1.bf16.msra.mxu0 %v7787_v8 }
 0x404   :  { %5770 = vmatprep.subr.bf16.mxu1 %v7792_v10  ;;  %5942 = vmatprep.subr.bf16.mxu0 %v7795_v11  ;;  %v2654_v18 = vpop.f32.mrb[4].mxu1  ;;  %v7808_v11 = vld [vmem:[#allocation12 + $0xa80] ss:$28 sps:$4 sm:$0xff]  }
 0x405   :  { %v7310_v25 = vadd.f32 %v2654_v18, %v1104_v12  ;;  %v2740_v28 = vpop.f32.mrb[16].mxu0  ;;  %v2656_v29 = vpop.f32.mrb[5].mxu1  ;;  %v7822_v18 = vld [vmem:[#allocation12 + $0xaf4] ss:$28 sps:$4 sm:$0xff]  }
 0x406   :  { %v7314_v30 = vadd.f32 %v2740_v28, %v1112_v13  ;;  %v7311_v48 = vadd.f32 %v2656_v29, %v1108_v14  ;;  %v2742_v46 = vpop.f32.mrb[17].mxu0  ;;  %v2658_v59 = vpop.f32.mrb[6].mxu1  ;;  %v7828_v28 = vld [vmem:[#allocation12 + $0xb2c] ss:$28 sps:$4 sm:$0xff]   ;;  %v7831_v29 = vld [vmem:[#allocation12 + $0xb34] ss:$28 sps:$4 sm:$0xff]  }
 0x407   :  { %v2769_v33 = vmul.f32 0.2, %v7310_v25  ;;  %5771 = vmatpush1.bf16.msra.mxu1 %v7790_v17  ;;  %5943 = vmatpush1.bf16.msra.mxu0 %v7793_v15  ;;  %v7315_v34 = vadd.f32 %v2742_v46, %v1116_v45  ;;  %v7312_v35 = vadd.f32 %v2658_v59, %v1104_v12  ;;  %v2744_v36 = vpop.f32.mrb[18].mxu0  ;;  %v2660_v16 = vpop.f32.mrb[7].mxu1  ;;  %vm2753_vm4 = vcmp.gt.f32.partialorder %v7310_v25, 0.0 }
 0x408   :  { %5772 = vmatprep.subr.bf16.mxu1 %v7798_v22  ;;  %5944 = vmatprep.subr.bf16.mxu0 %v7801_v23  ;;  %vm2755_vm5 = vcmp.gt.f32.partialorder %v7314_v30, 0.0  ;;  %v2771_v40 = vmul.f32 0.2, %v7314_v30  ;;  %v2746_v42 = vpop.f32.mrb[19].mxu0  ;;  %vm2754_vm7 = vcmp.gt.f32.partialorder %v7311_v48, 0.0  ;;  %v7316_v26 = vadd.f32 %v2744_v36, %v1112_v13 }
 0x409   :  { %vm2761_vm6 = vcmp.gt.f32.partialorder %v7312_v35, 0.0  ;;  %v2770_v21 = vmul.f32 0.2, %v7311_v48  ;;  %v2777_v24 = vmul.f32 0.2, %v7312_v35  ;;  %v2785_v27 = vsel %vm2753_vm4, %v7310_v25, %v2769_v33 }
 0x40a   :  { %vm2756_vm8 = vcmp.gt.f32.partialorder %v7315_v34, 0.0  ;;  %v7313_v43 = vadd.f32 %v2660_v16, %v1108_v14  ;;  %v7317_v44 = vadd.f32 %v2746_v42, %v1116_v45  ;;  %v2772_v50 = vmul.f32 0.2, %v7315_v34  ;;  %v7811_v12 = vld [vmem:[#allocation12 + $0xa88] ss:$28 sps:$4 sm:$0xff]  }
 0x40b   :  { %5773 = vmatpush1.bf16.msra.mxu1 %v7796_v31  ;;  %5945 = vmatpush1.bf16.msra.mxu0 %v7799_v53  ;;  %v2793_v51 = vsel %vm2761_vm6, %v7312_v35, %v2777_v24  ;;  %vm2763_vm9 = vcmp.gt.f32.partialorder %v7316_v26, 0.0  ;;  %v2779_v52 = vmul.f32 0.2, %v7316_v26  ;;  %v2787_v58 = vsel %vm2755_vm5, %v7314_v30, %v2771_v40  ;;  %v7816_v14 = vld [vmem:[#allocation12 + $0xabc] ss:$28 sps:$4 sm:$0xff]  }
 0x40c   :  { %5774 = vmatprep.subr.bf16.mxu1 %v7804_v38  ;;  %5946 = vmatprep.subr.bf16.mxu0 %v7807_v39  ;;  %v8675_v54 = vpack.c.bf16 %v2793_v51, %v2785_v27  ;;  %vm2762_vm10 = vcmp.gt.f32.partialorder %v7313_v43, 0.0  ;;  %v2778_v57 = vmul.f32 0.2, %v7313_v43  ;;  %vm2764_vm11 = vcmp.gt.f32.partialorder %v7317_v44, 0.0  ;;  %v7819_v17 = vld [vmem:[#allocation12 + $0xac4] ss:$28 sps:$4 sm:$0xff]  }
 0x40d   :  { %v2795_v63 = vsel %vm2763_vm9, %v7316_v26, %v2779_v52  ;;  %v2780_v0 = vmul.f32 0.2, %v7317_v44  ;;  %v2786_v2 = vsel %vm2754_vm7, %v7311_v48, %v2770_v21  ;;  %v2788_v8 = vsel %vm2756_vm8, %v7315_v34, %v2772_v50  ;;  %v7814_v15 = vld [vmem:[#allocation12 + $0xab8] ss:$28 sps:$4 sm:$0xff]   ;;  %v7817_v45 = vld [vmem:[#allocation12 + $0xac0] ss:$28 sps:$4 sm:$0xff]  }
 0x40e   :  { %v8679_v3 = vpack.c.bf16 %v2795_v63, %v2787_v58  ;;  %v2794_v7 = vsel %vm2762_vm10, %v7313_v43, %v2778_v57  ;;  %v7825_v22 = vld [vmem:[#allocation12 + $0xafc] ss:$28 sps:$4 sm:$0xff]   ;;  %v7820_v23 = vld [vmem:[#allocation12 + $0xaf0] ss:$28 sps:$4 sm:$0xff]   ;;  %v7826_v30 = vld [vmem:[#allocation12 + $0xb28] ss:$28 sps:$4 sm:$0xff]  }
 0x40f   :  { %5775 = vmatpush1.bf16.msra.mxu1 %v7802_v19  ;;  %5947 = vmatpush1.bf16.msra.mxu0 %v7805_v20  ;;  %v8682_v9 = vpack.c.bf16 %v2794_v7, %v2786_v2  ;;  %v2796_v10 = vsel %vm2764_vm11, %v7317_v44, %v2780_v0  ;;  %v7823_v25 = vld [vmem:[#allocation12 + $0xaf8] ss:$28 sps:$4 sm:$0xff]   ;;  %v7829_v48 = vld [vmem:[#allocation12 + $0xb30] ss:$28 sps:$4 sm:$0xff]   ;;  %v7834_v46 = vld [vmem:[#allocation12 + $0xb64] ss:$28 sps:$4 sm:$0xff]  }
 0x410   :  { %5787 = vmatprep.subr.bf16.mxu1 %v7810_v47  ;;  %5959 = vmatprep.subr.bf16.mxu0 %v7813_v49  ;;  %v8684_v13 = vpack.c.bf16 %v2796_v10, %v2788_v8  ;;  %v7837_v59 = vld [vmem:[#allocation12 + $0xb6c] ss:$28 sps:$4 sm:$0xff]   ;;  %v7832_v31 = vld [vmem:[#allocation12 + $0xb60] ss:$28 sps:$4 sm:$0xff]   ;;  %v7838_v36 = vld [vmem:[#allocation12 + $0xb98] ss:$28 sps:$4 sm:$0xff]  }
 0x411   :  { %5776 = vmatprep.mubr.bf16.mxu1 %v8682_v9  ;;  %5948 = vmatprep.mubr.bf16.mxu0 %v8682_v9  ;;  %v7835_v33 = vld [vmem:[#allocation12 + $0xb68] ss:$28 sps:$4 sm:$0xff]   ;;  %v7840_v34 = vld [vmem:[#allocation12 + $0xb9c] ss:$28 sps:$4 sm:$0xff]   ;;  %v7846_v53 = vld [vmem:[#allocation12 + $0xbd4] ss:$28 sps:$4 sm:$0xff]  }
 0x412   :  { %5777 = vmatmul.mubr.bf16.vlgmr.msra.gmra.mrb[8].mxu1 %v8675_v54  ;;  %5949 = vmatmul.mubr.bf16.vlgmr.msra.gmra.mrb[20].mxu0 %v8675_v54  ;;  %v7843_v35 = vld [vmem:[#allocation12 + $0xba4] ss:$28 sps:$4 sm:$0xff]   ;;  %v7849_v38 = vld [vmem:[#allocation12 + $0xbdc] ss:$28 sps:$4 sm:$0xff]   ;;  %v7844_v39 = vld [vmem:[#allocation12 + $0xbd0] ss:$28 sps:$4 sm:$0xff]  }
 0x413   :  { %5788 = vmatpush1.bf16.msra.mxu1 %v7808_v11  ;;  %5960 = vmatpush1.bf16.msra.mxu0 %v7811_v12  ;;  %v7841_v16 = vld [vmem:[#allocation12 + $0xba0] ss:$28 sps:$4 sm:$0xff]   ;;  %v7847_v40 = vld [vmem:[#allocation12 + $0xbd8] ss:$28 sps:$4 sm:$0xff]   ;;  %v7852_v42 = vld [vmem:[#allocation12 + $0xc0c] ss:$28 sps:$4 sm:$0xff]  }
 0x414   :  { %5819 = vmatprep.mubr.bf16.mxu1 %v8684_v13  ;;  %5991 = vmatprep.mubr.bf16.mxu0 %v8684_v13  ;;  %v7855_v19 = vld [vmem:[#allocation12 + $0xc14] ss:$28 sps:$4 sm:$0xff]   ;;  %v7850_v20 = vld [vmem:[#allocation12 + $0xc08] ss:$28 sps:$4 sm:$0xff]   ;;  %v7856_v27 = vld [vmem:[#allocation12 + $0xc40] ss:$28 sps:$4 sm:$0xff]  }
 0x415   :  { %5789 = vmatprep.subr.bf16.mxu1 %v7816_v14  ;;  %5961 = vmatprep.subr.bf16.mxu0 %v7819_v17  ;;  %v7853_v21 = vld [vmem:[#allocation12 + $0xc10] ss:$28 sps:$4 sm:$0xff]   ;;  %v7858_v24 = vld [vmem:[#allocation12 + $0xc44] ss:$28 sps:$4 sm:$0xff]   ;;  %v7864_v44 = vld [vmem:[#allocation12 + $0xc7c] ss:$28 sps:$4 sm:$0xff]  }
 0x416   :  { %v7861_v26 = vld [vmem:[#allocation12 + $0xc4c] ss:$28 sps:$4 sm:$0xff]   ;;  %v7867_v47 = vld [vmem:[#allocation12 + $0xc84] ss:$28 sps:$4 sm:$0xff]   ;;  %v7862_v49 = vld [vmem:[#allocation12 + $0xc78] ss:$28 sps:$4 sm:$0xff]  }
 0x417   :  { %5790 = vmatpush1.bf16.msra.mxu1 %v7814_v15  ;;  %5962 = vmatpush1.bf16.msra.mxu0 %v7817_v45  ;;  %v7859_v43 = vld [vmem:[#allocation12 + $0xc48] ss:$28 sps:$4 sm:$0xff]   ;;  %v7865_v50 = vld [vmem:[#allocation12 + $0xc80] ss:$28 sps:$4 sm:$0xff]   ;;  %v7870_v51 = vld [vmem:[#allocation12 + $0xcb4] ss:$28 sps:$4 sm:$0xff]  }
 0x418   :  { %5791 = vmatprep.subr.bf16.mxu1 %v7822_v18  ;;  %5963 = vmatprep.subr.bf16.mxu0 %v7825_v22  ;;  %v7873_v52 = vld [vmem:[#allocation12 + $0xcbc] ss:$28 sps:$4 sm:$0xff]   ;;  %v7868_v57 = vld [vmem:[#allocation12 + $0xcb0] ss:$28 sps:$4 sm:$0xff]   ;;  %v7874_v2 = vld [vmem:[#allocation12 + $0xce8] ss:$28 sps:$4 sm:$0xff]  }
 0x419   :  { %v7871_v58 = vld [vmem:[#allocation12 + $0xcb8] ss:$28 sps:$4 sm:$0xff]   ;;  %v7876_v63 = vld [vmem:[#allocation12 + $0xcec] ss:$28 sps:$4 sm:$0xff]   ;;  %v7882_v8 = vld [vmem:[#allocation12 + $0xd24] ss:$28 sps:$4 sm:$0xff]  }
 0x41a   :  { %v7879_v0 = vld [vmem:[#allocation12 + $0xcf4] ss:$28 sps:$4 sm:$0xff]   ;;  %v7885_v10 = vld [vmem:[#allocation12 + $0xd2c] ss:$28 sps:$4 sm:$0xff]   ;;  %v7880_v11 = vld [vmem:[#allocation12 + $0xd20] ss:$28 sps:$4 sm:$0xff]  }
 0x41b   :  { %5792 = vmatpush1.bf16.msra.mxu1 %v7820_v23  ;;  %5964 = vmatpush1.bf16.msra.mxu0 %v7823_v25  ;;  %v7877_v7 = vld [vmem:[#allocation12 + $0xcf0] ss:$28 sps:$4 sm:$0xff]   ;;  %v7883_v12 = vld [vmem:[#allocation12 + $0xd28] ss:$28 sps:$4 sm:$0xff]   ;;  %v7888_v14 = vld [vmem:[#allocation12 + $0xd5c] ss:$28 sps:$4 sm:$0xff]  }
 0x41c   :  { %5793 = vmatprep.subr.bf16.mxu1 %v7828_v28  ;;  %5965 = vmatprep.subr.bf16.mxu0 %v7831_v29  ;;  %v7891_v17 = vld [vmem:[#allocation12 + $0xd64] ss:$28 sps:$4 sm:$0xff]   ;;  %v7886_v15 = vld [vmem:[#allocation12 + $0xd58] ss:$28 sps:$4 sm:$0xff]   ;;  %v7892_v23 = vld [vmem:[#allocation12 + $0xd90] ss:$28 sps:$4 sm:$0xff]  }
 0x41d   :  { %v7889_v45 = vld [vmem:[#allocation12 + $0xd60] ss:$28 sps:$4 sm:$0xff]   ;;  %v7894_v18 = vld [vmem:[#allocation12 + $0xd94] ss:$28 sps:$4 sm:$0xff]   ;;  %v7900_v28 = vld [vmem:[#allocation12 + $0xdcc] ss:$28 sps:$4 sm:$0xff]  }
 0x41e   :  { %v7897_v22 = vld [vmem:[#allocation12 + $0xd9c] ss:$28 sps:$4 sm:$0xff]   ;;  %v7903_v29 = vld [vmem:[#allocation12 + $0xdd4] ss:$28 sps:$4 sm:$0xff]  }
 0x41f   :  { %5794 = vmatpush1.bf16.msra.mxu1 %v7826_v30  ;;  %5966 = vmatpush1.bf16.msra.mxu0 %v7829_v48  ;;  %v7895_v25 = vld [vmem:[#allocation12 + $0xd98] ss:$28 sps:$4 sm:$0xff]   ;;  %v7898_v30 = vld [vmem:[#allocation12 + $0xdc8] ss:$28 sps:$4 sm:$0xff]   ;;  %v7901_v48 = vld [vmem:[#allocation12 + $0xdd0] ss:$28 sps:$4 sm:$0xff]  }
 0x420   :  { %5795 = vmatprep.subr.bf16.mxu1 %v7834_v46  ;;  %5967 = vmatprep.subr.bf16.mxu0 %v7837_v59  ;;  %v7906_v46 = vld [vmem:[#allocation12 + $0x14] ss:$28 sps:$4 sm:$0xff]  }
 0x421   :  { %v7907_v59 = vld [vmem:[#allocation12 + $0x1d8] ss:$28 sps:$4 sm:$0xff]  }
 0x423   :  { %5796 = vmatpush1.bf16.msra.mxu1 %v7832_v31  ;;  %5968 = vmatpush1.bf16.msra.mxu0 %v7835_v33  ;;  %v7904_v31 = vld [vmem:[#allocation12 + $0x10] ss:$28 sps:$4 sm:$0xff]   ;;  %v7908_v33 = vld [vmem:[#allocation12 + $0x18] ss:$28 sps:$4 sm:$0xff]  }
 0x424   :  { %5797 = vmatprep.subr.bf16.mxu1 %v7840_v34  ;;  %5969 = vmatprep.subr.bf16.mxu0 %v7843_v35  ;;  %v7911_v34 = vld [vmem:[#allocation12 + $0x4c] ss:$28 sps:$4 sm:$0xff]  }
 0x425   :  { %v7912_v35 = vld [vmem:[#allocation12 + $0x210] ss:$28 sps:$4 sm:$0xff]  }
 0x427   :  { %5798 = vmatpush1.bf16.msra.mxu1 %v7838_v36  ;;  %5970 = vmatpush1.bf16.msra.mxu0 %v7841_v16  ;;  %v7909_v36 = vld [vmem:[#allocation12 + $0x48] ss:$28 sps:$4 sm:$0xff]   ;;  %v7913_v16 = vld [vmem:[#allocation12 + $0x50] ss:$28 sps:$4 sm:$0xff]  }
 0x428   :  { %5799 = vmatprep.subr.bf16.mxu1 %v7846_v53  ;;  %5971 = vmatprep.subr.bf16.mxu0 %v7849_v38  ;;  %v7916_v53 = vld [vmem:[#allocation12 + $0x84] ss:$28 sps:$4 sm:$0xff]  }
 0x429   :  { %v7917_v38 = vld [vmem:[#allocation12 + $0x248] ss:$28 sps:$4 sm:$0xff]  }
 0x42b   :  { %5800 = vmatpush1.bf16.msra.mxu1 %v7844_v39  ;;  %5972 = vmatpush1.bf16.msra.mxu0 %v7847_v40  ;;  %v7914_v39 = vld [vmem:[#allocation12 + $0x80] ss:$28 sps:$4 sm:$0xff]   ;;  %v7918_v40 = vld [vmem:[#allocation12 + $0x88] ss:$28 sps:$4 sm:$0xff]  }
 0x42c   :  { %5801 = vmatprep.subr.bf16.mxu1 %v7852_v42  ;;  %5973 = vmatprep.subr.bf16.mxu0 %v7855_v19  ;;  %v7921_v42 = vld [vmem:[#allocation12 + $0xbc] ss:$28 sps:$4 sm:$0xff]  }
 0x42d   :  { %v7922_v19 = vld [vmem:[#allocation12 + $0x280] ss:$28 sps:$4 sm:$0xff]  }
 0x42f   :  { %5802 = vmatpush1.bf16.msra.mxu1 %v7850_v20  ;;  %5974 = vmatpush1.bf16.msra.mxu0 %v7853_v21  ;;  %v7919_v20 = vld [vmem:[#allocation12 + $0xb8] ss:$28 sps:$4 sm:$0xff]   ;;  %v7923_v21 = vld [vmem:[#allocation12 + $0xc0] ss:$28 sps:$4 sm:$0xff]  }
 0x430   :  { %5803 = vmatprep.subr.bf16.mxu1 %v7858_v24  ;;  %5975 = vmatprep.subr.bf16.mxu0 %v7861_v26  ;;  %v7926_v24 = vld [vmem:[#allocation12 + $0xf4] ss:$28 sps:$4 sm:$0xff]  }
 0x431   :  { %v7924_v26 = vld [vmem:[#allocation12 + $0xf0] ss:$28 sps:$4 sm:$0xff]  }
 0x433   :  { %5804 = vmatpush1.bf16.msra.mxu1 %v7856_v27  ;;  %5976 = vmatpush1.bf16.msra.mxu0 %v7859_v43  ;;  %v7928_v27 = vld [vmem:[#allocation12 + $0xf8] ss:$28 sps:$4 sm:$0xff]   ;;  %v7931_v43 = vld [vmem:[#allocation12 + $0x12c] ss:$28 sps:$4 sm:$0xff]  }
 0x434   :  { %5805 = vmatprep.subr.bf16.mxu1 %v7864_v44  ;;  %5977 = vmatprep.subr.bf16.mxu0 %v7867_v47  ;;  %v7932_v44 = vld [vmem:[#allocation12 + $0x2f0] ss:$28 sps:$4 sm:$0xff]   ;;  %v7929_v47 = vld [vmem:[#allocation12 + $0x128] ss:$28 sps:$4 sm:$0xff]  }
 0x437   :  { %5806 = vmatpush1.bf16.msra.mxu1 %v7862_v49  ;;  %5978 = vmatpush1.bf16.msra.mxu0 %v7865_v50  ;;  %v7933_v49 = vld [vmem:[#allocation12 + $0x130] ss:$28 sps:$4 sm:$0xff]   ;;  %v7936_v50 = vld [vmem:[#allocation12 + $0x164] ss:$28 sps:$4 sm:$0xff]  }
 0x438   :  { %5807 = vmatprep.subr.bf16.mxu1 %v7870_v51  ;;  %5979 = vmatprep.subr.bf16.mxu0 %v7873_v52  ;;  %v7937_v51 = vld [vmem:[#allocation12 + $0x328] ss:$28 sps:$4 sm:$0xff]   ;;  %v7934_v52 = vld [vmem:[#allocation12 + $0x160] ss:$28 sps:$4 sm:$0xff]  }
 0x43b   :  { %5808 = vmatpush1.bf16.msra.mxu1 %v7868_v57  ;;  %5980 = vmatpush1.bf16.msra.mxu0 %v7871_v58  ;;  %v7938_v57 = vld [vmem:[#allocation12 + $0x168] ss:$28 sps:$4 sm:$0xff]   ;;  %v7941_v58 = vld [vmem:[#allocation12 + $0x19c] ss:$28 sps:$4 sm:$0xff]  }
 0x43c   :  { %5809 = vmatprep.subr.bf16.mxu1 %v7876_v63  ;;  %5981 = vmatprep.subr.bf16.mxu0 %v7879_v0  ;;  %v7942_v63 = vld [vmem:[#allocation12 + $0x360] ss:$28 sps:$4 sm:$0xff]   ;;  %v7939_v0 = vld [vmem:[#allocation12 + $0x198] ss:$28 sps:$4 sm:$0xff]  }
 0x43f   :  { %5810 = vmatpush1.bf16.msra.mxu1 %v7874_v2  ;;  %5982 = vmatpush1.bf16.msra.mxu0 %v7877_v7  ;;  %v7943_v2 = vld [vmem:[#allocation12 + $0x1a0] ss:$28 sps:$4 sm:$0xff]   ;;  %v7946_v7 = vld [vmem:[#allocation12 + $0x1d4] ss:$28 sps:$4 sm:$0xff]  }
 0x440   :  { %5811 = vmatprep.subr.bf16.mxu1 %v7882_v8  ;;  %5983 = vmatprep.subr.bf16.mxu0 %v7885_v10  ;;  %v7947_v8 = vld [vmem:[#allocation12 + $0x558] ss:$28 sps:$4 sm:$0xff]   ;;  %v7944_v10 = vld [vmem:[#allocation12 + $0x1d0] ss:$28 sps:$4 sm:$0xff]  }
 0x443   :  { %5812 = vmatpush1.bf16.msra.mxu1 %v7880_v11  ;;  %5984 = vmatpush1.bf16.msra.mxu0 %v7883_v12  ;;  %v7948_v11 = vld [vmem:[#allocation12 + $0x398] ss:$28 sps:$4 sm:$0xff]   ;;  %v7951_v12 = vld [vmem:[#allocation12 + $0x20c] ss:$28 sps:$4 sm:$0xff]  }
 0x444   :  { %5813 = vmatprep.subr.bf16.mxu1 %v7888_v14  ;;  %5985 = vmatprep.subr.bf16.mxu0 %v7891_v17  ;;  %v7952_v14 = vld [vmem:[#allocation12 + $0x590] ss:$28 sps:$4 sm:$0xff]   ;;  %v7949_v17 = vld [vmem:[#allocation12 + $0x208] ss:$28 sps:$4 sm:$0xff]  }
 0x447   :  { %5814 = vmatpush1.bf16.msra.mxu1 %v7886_v15  ;;  %5986 = vmatpush1.bf16.msra.mxu0 %v7889_v45  ;;  %v7953_v15 = vld [vmem:[#allocation12 + $0x3d0] ss:$28 sps:$4 sm:$0xff]   ;;  %v7956_v45 = vld [vmem:[#allocation12 + $0x244] ss:$28 sps:$4 sm:$0xff]  }
 0x448   :  { %5815 = vmatprep.subr.bf16.mxu1 %v7894_v18  ;;  %5987 = vmatprep.subr.bf16.mxu0 %v7897_v22  ;;  %v7957_v18 = vld [vmem:[#allocation12 + $0x5c8] ss:$28 sps:$4 sm:$0xff]   ;;  %v7954_v22 = vld [vmem:[#allocation12 + $0x240] ss:$28 sps:$4 sm:$0xff]  }
 0x44b   :  { %5816 = vmatpush1.bf16.msra.mxu1 %v7892_v23  ;;  %5988 = vmatpush1.bf16.msra.mxu0 %v7895_v25  ;;  %v7958_v23 = vld [vmem:[#allocation12 + $0x408] ss:$28 sps:$4 sm:$0xff]   ;;  %v7961_v25 = vld [vmem:[#allocation12 + $0x27c] ss:$28 sps:$4 sm:$0xff]  }
 0x44c   :  { %5817 = vmatprep.subr.bf16.mxu1 %v7900_v28  ;;  %5989 = vmatprep.subr.bf16.mxu0 %v7903_v29  ;;  %v7962_v28 = vld [vmem:[#allocation12 + $0x600] ss:$28 sps:$4 sm:$0xff]   ;;  %v7959_v29 = vld [vmem:[#allocation12 + $0x278] ss:$28 sps:$4 sm:$0xff]  }
 0x44f   :  { %5818 = vmatpush1.bf16.msra.mxu1 %v7898_v30  ;;  %5990 = vmatpush1.bf16.msra.mxu0 %v7901_v48  ;;  %v7963_v30 = vld [vmem:[#allocation12 + $0x440] ss:$28 sps:$4 sm:$0xff]   ;;  %v7966_v48 = vld [vmem:[#allocation12 + $0x2b4] ss:$28 sps:$4 sm:$0xff]  }
 0x450   :  { %6002 = vmatprep.subr.bf16.mxu1 %v7906_v46  ;;  %7214 = vmatprep.subr.bf16.mxu0 %v7907_v59  ;;  %v7967_v46 = vld [vmem:[#allocation12 + $0x638] ss:$28 sps:$4 sm:$0xff]   ;;  %v7964_v59 = vld [vmem:[#allocation12 + $0x2b0] ss:$28 sps:$4 sm:$0xff]  }
 0x452   :  { %5820 = vmatmul.mubr.bf16.vlgmr.msra.gmra.mrb[8].mxu1 %v8679_v3  ;;  %5992 = vmatmul.mubr.bf16.vlgmr.msra.gmra.mrb[20].mxu0 %v8679_v3 }
 0x453   :  { %6003 = vmatpush1.bf16.msra.mxu1 %v7904_v31  ;;  %6034 = vmatprep.mubr.bf16.mxu1 %v8648_v60  ;;  %v7968_v31 = vld [vmem:[#allocation12 + $0x478] ss:$28 sps:$4 sm:$0xff]  }
 0x454   :  { %7215 = vmatpush3.bf16.msra.mxu0 %v7908_v33  ;;  %6206 = vmatprep.mubr.bf16.mxu0 %v8648_v60  ;;  %v7927_v60 = vld [vmem:[#allocation12 + $0x2b8] ss:$28 sps:$4 sm:$0xff]   ;;  %v7971_v33 = vld [vmem:[#allocation12 + $0x2ec] ss:$28 sps:$4 sm:$0xff]  }
 0x455   :  { %6004 = vmatprep.subr.bf16.mxu1 %v7911_v34  ;;  %7216 = vmatprep.subr.bf16.mxu0 %v7912_v35  ;;  %v7972_v34 = vld [vmem:[#allocation12 + $0x670] ss:$28 sps:$4 sm:$0xff]   ;;  %v7969_v35 = vld [vmem:[#allocation12 + $0x2e8] ss:$28 sps:$4 sm:$0xff]  }
 0x457   :  { %6005 = vmatpush1.bf16.msra.mxu1 %v7909_v36  ;;  %v7973_v36 = vld [vmem:[#allocation12 + $0x4b0] ss:$28 sps:$4 sm:$0xff]  }
 0x458   :  { %7217 = vmatpush3.bf16.msra.mxu0 %v7913_v16  ;;  %6006 = vmatprep.subr.bf16.mxu1 %v7916_v53  ;;  %v7976_v16 = vld [vmem:[#allocation12 + $0x324] ss:$28 sps:$4 sm:$0xff]  }
 0x459   :  { %7218 = vmatprep.subr.bf16.mxu0 %v7917_v38  ;;  %v7977_v53 = vld [vmem:[#allocation12 + $0x6a8] ss:$28 sps:$4 sm:$0xff]   ;;  %v7974_v38 = vld [vmem:[#allocation12 + $0x320] ss:$28 sps:$4 sm:$0xff]  }
 0x45b   :  { %6007 = vmatpush1.bf16.msra.mxu1 %v7914_v39  ;;  %v7978_v39 = vld [vmem:[#allocation12 + $0x4e8] ss:$28 sps:$4 sm:$0xff]  }
 0x45c   :  { %7219 = vmatpush3.bf16.msra.mxu0 %v7918_v40  ;;  %6008 = vmatprep.subr.bf16.mxu1 %v7921_v42  ;;  %v7981_v40 = vld [vmem:[#allocation12 + $0x35c] ss:$28 sps:$4 sm:$0xff]  }
 0x45d   :  { %7220 = vmatprep.subr.bf16.mxu0 %v7922_v19  ;;  %v7982_v42 = vld [vmem:[#allocation12 + $0x6e0] ss:$28 sps:$4 sm:$0xff]   ;;  %v7979_v19 = vld [vmem:[#allocation12 + $0x358] ss:$28 sps:$4 sm:$0xff]  }
 0x45f   :  { %6009 = vmatpush1.bf16.msra.mxu1 %v7919_v20  ;;  %v7983_v20 = vld [vmem:[#allocation12 + $0x520] ss:$28 sps:$4 sm:$0xff]  }
 0x460   :  { %7221 = vmatpush3.bf16.msra.mxu0 %v7923_v21  ;;  %6010 = vmatprep.subr.bf16.mxu1 %v7926_v24  ;;  %v7986_v21 = vld [vmem:[#allocation12 + $0x394] ss:$28 sps:$4 sm:$0xff]  }
 0x461   :  { %7222 = vmatprep.subr.bf16.mxu0 %v7927_v60  ;;  %v7987_v24 = vld [vmem:[#allocation12 + $0x8d8] ss:$28 sps:$4 sm:$0xff]   ;;  %v7984_v60 = vld [vmem:[#allocation12 + $0x390] ss:$28 sps:$4 sm:$0xff]  }
 0x463   :  { %6011 = vmatpush1.bf16.msra.mxu1 %v7924_v26  ;;  %v7988_v26 = vld [vmem:[#allocation12 + $0x718] ss:$28 sps:$4 sm:$0xff]  }
 0x464   :  { %7223 = vmatpush3.bf16.msra.mxu0 %v7928_v27  ;;  %6012 = vmatprep.subr.bf16.mxu1 %v7931_v43  ;;  %v7991_v27 = vld [vmem:[#allocation12 + $0x3cc] ss:$28 sps:$4 sm:$0xff]  }
 0x465   :  { %7224 = vmatprep.subr.bf16.mxu0 %v7932_v44  ;;  %v7992_v43 = vld [vmem:[#allocation12 + $0x910] ss:$28 sps:$4 sm:$0xff]   ;;  %v7989_v44 = vld [vmem:[#allocation12 + $0x3c8] ss:$28 sps:$4 sm:$0xff]  }
 0x467   :  { %6013 = vmatpush1.bf16.msra.mxu1 %v7929_v47  ;;  %v7993_v47 = vld [vmem:[#allocation12 + $0x750] ss:$28 sps:$4 sm:$0xff]  }
 0x468   :  { %7225 = vmatpush3.bf16.msra.mxu0 %v7933_v49  ;;  %6014 = vmatprep.subr.bf16.mxu1 %v7936_v50  ;;  %v7996_v49 = vld [vmem:[#allocation12 + $0x404] ss:$28 sps:$4 sm:$0xff]  }
 0x469   :  { %7226 = vmatprep.subr.bf16.mxu0 %v7937_v51  ;;  %v7997_v50 = vld [vmem:[#allocation12 + $0x948] ss:$28 sps:$4 sm:$0xff]   ;;  %v7994_v51 = vld [vmem:[#allocation12 + $0x400] ss:$28 sps:$4 sm:$0xff]  }
 0x46b   :  { %6015 = vmatpush1.bf16.msra.mxu1 %v7934_v52  ;;  %v8001_v52 = vld [vmem:[#allocation12 + $0x43c] ss:$28 sps:$4 sm:$0xff]  }
 0x46c   :  { %7227 = vmatpush3.bf16.msra.mxu0 %v7938_v57  ;;  %6016 = vmatprep.subr.bf16.mxu1 %v7941_v58  ;;  %v8002_v57 = vld [vmem:[#allocation12 + $0x980] ss:$28 sps:$4 sm:$0xff]   ;;  %v7999_v58 = vld [vmem:[#allocation12 + $0x438] ss:$28 sps:$4 sm:$0xff]  }
 0x46d   :  { %7228 = vmatprep.subr.bf16.mxu0 %v7942_v63  ;;  %v8006_v63 = vld [vmem:[#allocation12 + $0x474] ss:$28 sps:$4 sm:$0xff]  }
 0x46f   :  { %6017 = vmatpush1.bf16.msra.mxu1 %v7939_v0  ;;  %v8007_v0 = vld [vmem:[#allocation12 + $0x9b8] ss:$28 sps:$4 sm:$0xff]  }
 0x470   :  { %7229 = vmatpush3.bf16.msra.mxu0 %v7943_v2  ;;  %6018 = vmatprep.subr.bf16.mxu1 %v7946_v7  ;;  %v8004_v2 = vld [vmem:[#allocation12 + $0x470] ss:$28 sps:$4 sm:$0xff]   ;;  %v8008_v7 = vld [vmem:[#allocation12 + $0x7f8] ss:$28 sps:$4 sm:$0xff]  }
 0x471   :  { %7236 = vmatprep.subr.bf16.mxu0 %v7947_v8  ;;  %v8011_v8 = vld [vmem:[#allocation12 + $0x4ac] ss:$28 sps:$4 sm:$0xff]  }
 0x473   :  { %6207 = vmatmul.mubr.bf16.vlgmr.msra.gmra.mrb[24].mxu0 %v8644_v55  ;;  %6019 = vmatpush1.bf16.msra.mxu1 %v7944_v10  ;;  %v8012_v10 = vld [vmem:[#allocation12 + $0x9f0] ss:$28 sps:$4 sm:$0xff]  }
 0x474   :  { %7237 = vmatpush3.bf16.msra.mxu0 %v7948_v11  ;;  %6247 = vmatprep.mubr.bf16.mxu0 %v8650_v61  ;;  %v8009_v11 = vld [vmem:[#allocation12 + $0x4a8] ss:$28 sps:$4 sm:$0xff]  }
 0x475   :  { %6020 = vmatprep.subr.bf16.mxu1 %v7951_v12  ;;  %7238 = vmatprep.subr.bf16.mxu0 %v7952_v14  ;;  %v8013_v12 = vld [vmem:[#allocation12 + $0x830] ss:$28 sps:$4 sm:$0xff]   ;;  %v8016_v14 = vld [vmem:[#allocation12 + $0x4e4] ss:$28 sps:$4 sm:$0xff]  }
 0x477   :  { %6021 = vmatpush1.bf16.msra.mxu1 %v7949_v17  ;;  %v8017_v17 = vld [vmem:[#allocation12 + $0xa28] ss:$28 sps:$4 sm:$0xff]  }
 0x478   :  { %7239 = vmatpush3.bf16.msra.mxu0 %v7953_v15  ;;  %6022 = vmatprep.subr.bf16.mxu1 %v7956_v45  ;;  %v8014_v15 = vld [vmem:[#allocation12 + $0x4e0] ss:$28 sps:$4 sm:$0xff]   ;;  %v8018_v45 = vld [vmem:[#allocation12 + $0x868] ss:$28 sps:$4 sm:$0xff]  }
 0x479   :  { %7240 = vmatprep.subr.bf16.mxu0 %v7957_v18  ;;  %v8021_v18 = vld [vmem:[#allocation12 + $0x51c] ss:$28 sps:$4 sm:$0xff]  }
 0x47b   :  { %6023 = vmatpush1.bf16.msra.mxu1 %v7954_v22  ;;  %v8022_v22 = vld [vmem:[#allocation12 + $0xa60] ss:$28 sps:$4 sm:$0xff]  }
 0x47c   :  { %7241 = vmatpush3.bf16.msra.mxu0 %v7958_v23  ;;  %6024 = vmatprep.subr.bf16.mxu1 %v7961_v25  ;;  %v8019_v23 = vld [vmem:[#allocation12 + $0x518] ss:$28 sps:$4 sm:$0xff]   ;;  %v8023_v25 = vld [vmem:[#allocation12 + $0x8a0] ss:$28 sps:$4 sm:$0xff]  }
 0x47d   :  { %7242 = vmatprep.subr.bf16.mxu0 %v7962_v28  ;;  %v8026_v28 = vld [vmem:[#allocation12 + $0x554] ss:$28 sps:$4 sm:$0xff]  }
 0x47f   :  { %6025 = vmatpush1.bf16.msra.mxu1 %v7959_v29  ;;  %v8027_v29 = vld [vmem:[#allocation12 + $0xc58] ss:$28 sps:$4 sm:$0xff]  }
 0x480   :  { %7243 = vmatpush3.bf16.msra.mxu0 %v7963_v30  ;;  %6026 = vmatprep.subr.bf16.mxu1 %v7966_v48  ;;  %v8024_v30 = vld [vmem:[#allocation12 + $0x550] ss:$28 sps:$4 sm:$0xff]   ;;  %v8028_v48 = vld [vmem:[#allocation12 + $0xa98] ss:$28 sps:$4 sm:$0xff]  }
 0x481   :  { %7244 = vmatprep.subr.bf16.mxu0 %v7967_v46  ;;  %v8031_v46 = vld [vmem:[#allocation12 + $0x58c] ss:$28 sps:$4 sm:$0xff]  }
 0x483   :  { %6027 = vmatpush1.bf16.msra.mxu1 %v7964_v59  ;;  %v8032_v59 = vld [vmem:[#allocation12 + $0xc90] ss:$28 sps:$4 sm:$0xff]  }
 0x484   :  { %7245 = vmatpush3.bf16.msra.mxu0 %v7968_v31  ;;  %6028 = vmatprep.subr.bf16.mxu1 %v7971_v33  ;;  %v8029_v31 = vld [vmem:[#allocation12 + $0x588] ss:$28 sps:$4 sm:$0xff]   ;;  %v8033_v33 = vld [vmem:[#allocation12 + $0xad0] ss:$28 sps:$4 sm:$0xff]  }
 0x485   :  { %7246 = vmatprep.subr.bf16.mxu0 %v7972_v34  ;;  %v8036_v34 = vld [vmem:[#allocation12 + $0x5c4] ss:$28 sps:$4 sm:$0xff]  }
 0x487   :  { %6029 = vmatpush1.bf16.msra.mxu1 %v7969_v35  ;;  %v8037_v35 = vld [vmem:[#allocation12 + $0xcc8] ss:$28 sps:$4 sm:$0xff]  }
 0x488   :  { %7247 = vmatpush3.bf16.msra.mxu0 %v7973_v36  ;;  %6030 = vmatprep.subr.bf16.mxu1 %v7976_v16  ;;  %v8034_v36 = vld [vmem:[#allocation12 + $0x5c0] ss:$28 sps:$4 sm:$0xff]   ;;  %v8038_v16 = vld [vmem:[#allocation12 + $0xb08] ss:$28 sps:$4 sm:$0xff]  }
 0x489   :  { %7248 = vmatprep.subr.bf16.mxu0 %v7977_v53  ;;  %v8041_v53 = vld [vmem:[#allocation12 + $0x5fc] ss:$28 sps:$4 sm:$0xff]  }
 0x48b   :  { %6031 = vmatpush1.bf16.msra.mxu1 %v7974_v38  ;;  %v8042_v38 = vld [vmem:[#allocation12 + $0xd00] ss:$28 sps:$4 sm:$0xff]  }
 0x48c   :  { %7249 = vmatpush3.bf16.msra.mxu0 %v7978_v39  ;;  %6032 = vmatprep.subr.bf16.mxu1 %v7981_v40  ;;  %v8039_v39 = vld [vmem:[#allocation12 + $0x5f8] ss:$28 sps:$4 sm:$0xff]   ;;  %v8043_v40 = vld [vmem:[#allocation12 + $0xb40] ss:$28 sps:$4 sm:$0xff]  }
 0x48d   :  { %7250 = vmatprep.subr.bf16.mxu0 %v7982_v42  ;;  %v8046_v42 = vld [vmem:[#allocation12 + $0x634] ss:$28 sps:$4 sm:$0xff]  }
 0x48f   :  { %6033 = vmatpush1.bf16.msra.mxu1 %v7979_v19  ;;  %v8047_v19 = vld [vmem:[#allocation12 + $0xd38] ss:$28 sps:$4 sm:$0xff]  }
 0x490   :  { %7251 = vmatpush3.bf16.msra.mxu0 %v7983_v20  ;;  %6045 = vmatprep.subr.bf16.mxu1 %v7986_v21  ;;  %v8044_v20 = vld [vmem:[#allocation12 + $0x630] ss:$28 sps:$4 sm:$0xff]   ;;  %v8048_v21 = vld [vmem:[#allocation12 + $0xb78] ss:$28 sps:$4 sm:$0xff]  }
 0x491   :  { %7258 = vmatprep.subr.bf16.mxu0 %v7987_v24  ;;  %v8051_v24 = vld [vmem:[#allocation12 + $0x66c] ss:$28 sps:$4 sm:$0xff]  }
 0x492   :  { %6035 = vmatmul.mubr.bf16.vlgmr.msra.gmra.mrb[12].mxu1 %v8644_v55  ;;  %v7998_v55 = vld [vmem:[#allocation12 + $0x788] ss:$28 sps:$4 sm:$0xff]  }
 0x493   :  { %6248 = vmatmul.mubr.bf16.vlgmr.msra.gmra.mrb[28].mxu0 %v8646_v56  ;;  %6046 = vmatpush1.bf16.msra.mxu1 %v7984_v60  ;;  %v8052_v60 = vld [vmem:[#allocation12 + $0xd70] ss:$28 sps:$4 sm:$0xff]  }
 0x494   :  { %6077 = vmatprep.mubr.bf16.mxu1 %v8650_v61  ;;  %7259 = vmatpush3.bf16.msra.mxu0 %v7988_v26  ;;  %v8003_v61 = vld [vmem:[#allocation12 + $0x7c0] ss:$28 sps:$4 sm:$0xff]   ;;  %v8049_v26 = vld [vmem:[#allocation12 + $0x668] ss:$28 sps:$4 sm:$0xff]  }
 0x495   :  { %6288 = vmatprep.mubr.bf16.mxu0 %v8682_v9  ;;  %6047 = vmatprep.subr.bf16.mxu1 %v7991_v27  ;;  %v8053_v27 = vld [vmem:[#allocation12 + $0xbb0] ss:$28 sps:$4 sm:$0xff]  }
 0x496   :  { %7260 = vmatprep.subr.bf16.mxu0 %v7992_v43  ;;  %v8056_v43 = vld [vmem:[#allocation12 + $0x6a4] ss:$28 sps:$4 sm:$0xff]  }
 0x497   :  { %6048 = vmatpush1.bf16.msra.mxu1 %v7989_v44  ;;  %v8057_v44 = vld [vmem:[#allocation12 + $0xda8] ss:$28 sps:$4 sm:$0xff]  }
 0x498   :  { %7261 = vmatpush3.bf16.msra.mxu0 %v7993_v47  ;;  %6049 = vmatprep.subr.bf16.mxu1 %v7996_v49  ;;  %v8054_v47 = vld [vmem:[#allocation12 + $0x6a0] ss:$28 sps:$4 sm:$0xff]   ;;  %v8058_v49 = vld [vmem:[#allocation12 + $0xbe8] ss:$28 sps:$4 sm:$0xff]  }
 0x499   :  { %7262 = vmatprep.subr.bf16.mxu0 %v7997_v50  ;;  %v8061_v50 = vld [vmem:[#allocation12 + $0x6dc] ss:$28 sps:$4 sm:$0xff]  }
 0x49b   :  { %6050 = vmatpush1.bf16.msra.mxu1 %v7994_v51  ;;  %v8062_v51 = vld [vmem:[#allocation12 + $0xde0] ss:$28 sps:$4 sm:$0xff]  }
 0x49c   :  { %7263 = vmatpush3.bf16.msra.mxu0 %v7998_v55  ;;  %6051 = vmatprep.subr.bf16.mxu1 %v8001_v52  ;;  %v8059_v55 = vld [vmem:[#allocation12 + $0x6d8] ss:$28 sps:$4 sm:$0xff]   ;;  %v8063_v52 = vld [vmem:[#allocation12 + $0xc20] ss:$28 sps:$4 sm:$0xff]  }
 0x49d   :  { %7264 = vmatprep.subr.bf16.mxu0 %v8002_v57  ;;  %v8066_v57 = vld [vmem:[#allocation12 + $0x714] ss:$28 sps:$4 sm:$0xff]  }
 0x49f   :  { %6052 = vmatpush1.bf16.msra.mxu1 %v7999_v58  ;;  %v8064_v58 = vld [vmem:[#allocation12 + $0x710] ss:$28 sps:$4 sm:$0xff]  }
 0x4a0   :  { %7265 = vmatpush3.bf16.msra.mxu0 %v8003_v61  ;;  %6053 = vmatprep.subr.bf16.mxu1 %v8006_v63  ;;  %v8069_v61 = vld [vmem:[#allocation12 + $0x74c] ss:$28 sps:$4 sm:$0xff]  }
 0x4a1   :  { %7266 = vmatprep.subr.bf16.mxu0 %v8007_v0  ;;  %v8067_v63 = vld [vmem:[#allocation12 + $0x748] ss:$28 sps:$4 sm:$0xff]  }
 0x4a2   :  { %v8072_v0 = vld [vmem:[#allocation12 + $0x784] ss:$28 sps:$4 sm:$0xff]  }
 0x4a3   :  { %6054 = vmatpush1.bf16.msra.mxu1 %v8004_v2  ;;  %v8070_v2 = vld [vmem:[#allocation12 + $0x780] ss:$28 sps:$4 sm:$0xff]  }
 0x4a4   :  { %7267 = vmatpush3.bf16.msra.mxu0 %v8008_v7  ;;  %6055 = vmatprep.subr.bf16.mxu1 %v8011_v8  ;;  %v8075_v7 = vld [vmem:[#allocation12 + $0x7bc] ss:$28 sps:$4 sm:$0xff]  }
 0x4a5   :  { %7268 = vmatprep.subr.bf16.mxu0 %v8012_v10  ;;  %v8073_v8 = vld [vmem:[#allocation12 + $0x7b8] ss:$28 sps:$4 sm:$0xff]  }
 0x4a6   :  { %v8078_v10 = vld [vmem:[#allocation12 + $0x7f4] ss:$28 sps:$4 sm:$0xff]  }
 0x4a7   :  { %6056 = vmatpush1.bf16.msra.mxu1 %v8009_v11  ;;  %v8076_v11 = vld [vmem:[#allocation12 + $0x7f0] ss:$28 sps:$4 sm:$0xff]  }
 0x4a8   :  { %7269 = vmatpush3.bf16.msra.mxu0 %v8013_v12  ;;  %6057 = vmatprep.subr.bf16.mxu1 %v8016_v14  ;;  %v8079_v12 = vld [vmem:[#allocation12 + $0x828] ss:$28 sps:$4 sm:$0xff]  }
 0x4a9   :  { %7270 = vmatprep.subr.bf16.mxu0 %v8017_v17  ;;  %v8084_v14 = vld [vmem:[#allocation12 + $0x864] ss:$28 sps:$4 sm:$0xff]   ;;  %v8087_v17 = vld [vmem:[#allocation12 + $0x89c] ss:$28 sps:$4 sm:$0xff]  }
 0x4ab   :  { %6058 = vmatpush1.bf16.msra.mxu1 %v8014_v15  ;;  %v8085_v15 = vld [vmem:[#allocation12 + $0x898] ss:$28 sps:$4 sm:$0xff]  }
 0x4ac   :  { %7271 = vmatpush3.bf16.msra.mxu0 %v8018_v45  ;;  %6059 = vmatprep.subr.bf16.mxu1 %v8021_v18  ;;  %v8090_v45 = vld [vmem:[#allocation12 + $0x8d4] ss:$28 sps:$4 sm:$0xff]  }
 0x4ad   :  { %7272 = vmatprep.subr.bf16.mxu0 %v8022_v22  ;;  %v8088_v18 = vld [vmem:[#allocation12 + $0x8d0] ss:$28 sps:$4 sm:$0xff]  }
 0x4ae   :  { %v8093_v22 = vld [vmem:[#allocation12 + $0x90c] ss:$28 sps:$4 sm:$0xff]  }
 0x4af   :  { %6060 = vmatpush1.bf16.msra.mxu1 %v8019_v23  ;;  %v8091_v23 = vld [vmem:[#allocation12 + $0x908] ss:$28 sps:$4 sm:$0xff]  }
 0x4b0   :  { %7273 = vmatpush3.bf16.msra.mxu0 %v8023_v25  ;;  %6061 = vmatprep.subr.bf16.mxu1 %v8026_v28  ;;  %v8096_v25 = vld [vmem:[#allocation12 + $0x944] ss:$28 sps:$4 sm:$0xff]  }
 0x4b1   :  { %7280 = vmatprep.subr.bf16.mxu0 %v8027_v29  ;;  %v8094_v28 = vld [vmem:[#allocation12 + $0x940] ss:$28 sps:$4 sm:$0xff]  }
 0x4b2   :  { %v8099_v29 = vld [vmem:[#allocation12 + $0x97c] ss:$28 sps:$4 sm:$0xff]  }
 0x4b3   :  { %6289 = vmatmul.mubr.bf16.vlgmr.msra.gmra.mrb[32].mxu0 %v8675_v54  ;;  %6062 = vmatpush1.bf16.msra.mxu1 %v8024_v30  ;;  %v8097_v30 = vld [vmem:[#allocation12 + $0x978] ss:$28 sps:$4 sm:$0xff]  }
 0x4b4   :  { %7281 = vmatpush3.bf16.msra.mxu0 %v8028_v48  ;;  %6329 = vmatprep.mubr.bf16.mxu0 %v8684_v13  ;;  %v8102_v48 = vld [vmem:[#allocation12 + $0x9b4] ss:$28 sps:$4 sm:$0xff]  }
 0x4b5   :  { %6063 = vmatprep.subr.bf16.mxu1 %v8031_v46  ;;  %7282 = vmatprep.subr.bf16.mxu0 %v8032_v59  ;;  %v8100_v46 = vld [vmem:[#allocation12 + $0x9b0] ss:$28 sps:$4 sm:$0xff]  }
 0x4b6   :  { %v8105_v59 = vld [vmem:[#allocation12 + $0x9ec] ss:$28 sps:$4 sm:$0xff]  }
 0x4b7   :  { %6064 = vmatpush1.bf16.msra.mxu1 %v8029_v31  ;;  %v8103_v31 = vld [vmem:[#allocation12 + $0x9e8] ss:$28 sps:$4 sm:$0xff]  }
 0x4b8   :  { %7283 = vmatpush3.bf16.msra.mxu0 %v8033_v33  ;;  %6065 = vmatprep.subr.bf16.mxu1 %v8036_v34  ;;  %v8108_v33 = vld [vmem:[#allocation12 + $0xa24] ss:$28 sps:$4 sm:$0xff]  }
 0x4b9   :  { %7284 = vmatprep.subr.bf16.mxu0 %v8037_v35  ;;  %v8106_v34 = vld [vmem:[#allocation12 + $0xa20] ss:$28 sps:$4 sm:$0xff]  }
 0x4ba   :  { %v8111_v35 = vld [vmem:[#allocation12 + $0xa5c] ss:$28 sps:$4 sm:$0xff]  }
 0x4bb   :  { %6066 = vmatpush1.bf16.msra.mxu1 %v8034_v36  ;;  %v8109_v36 = vld [vmem:[#allocation12 + $0xa58] ss:$28 sps:$4 sm:$0xff]  }
 0x4bc   :  { %7285 = vmatpush3.bf16.msra.mxu0 %v8038_v16  ;;  %6067 = vmatprep.subr.bf16.mxu1 %v8041_v53  ;;  %v8114_v16 = vld [vmem:[#allocation12 + $0xa94] ss:$28 sps:$4 sm:$0xff]  }
 0x4bd   :  { %7286 = vmatprep.subr.bf16.mxu0 %v8042_v38  ;;  %v8112_v53 = vld [vmem:[#allocation12 + $0xa90] ss:$28 sps:$4 sm:$0xff]  }
 0x4be   :  { %v8117_v38 = vld [vmem:[#allocation12 + $0xacc] ss:$28 sps:$4 sm:$0xff]  }
 0x4bf   :  { %6068 = vmatpush1.bf16.msra.mxu1 %v8039_v39  ;;  %v8115_v39 = vld [vmem:[#allocation12 + $0xac8] ss:$28 sps:$4 sm:$0xff]  }
 0x4c0   :  { %7287 = vmatpush3.bf16.msra.mxu0 %v8043_v40  ;;  %6069 = vmatprep.subr.bf16.mxu1 %v8046_v42  ;;  %v8120_v40 = vld [vmem:[#allocation12 + $0xb04] ss:$28 sps:$4 sm:$0xff]  }
 0x4c1   :  { %7288 = vmatprep.subr.bf16.mxu0 %v8047_v19  ;;  %v8118_v42 = vld [vmem:[#allocation12 + $0xb00] ss:$28 sps:$4 sm:$0xff]  }
 0x4c2   :  { %v8123_v19 = vld [vmem:[#allocation12 + $0xb3c] ss:$28 sps:$4 sm:$0xff]  }
 0x4c3   :  { %6070 = vmatpush1.bf16.msra.mxu1 %v8044_v20  ;;  %v8121_v20 = vld [vmem:[#allocation12 + $0xb38] ss:$28 sps:$4 sm:$0xff]  }
 0x4c4   :  { %7289 = vmatpush3.bf16.msra.mxu0 %v8048_v21  ;;  %6071 = vmatprep.subr.bf16.mxu1 %v8051_v24  ;;  %v8126_v21 = vld [vmem:[#allocation12 + $0xb74] ss:$28 sps:$4 sm:$0xff]  }
 0x4c5   :  { %7290 = vmatprep.subr.bf16.mxu0 %v8052_v60  ;;  %v8124_v24 = vld [vmem:[#allocation12 + $0xb70] ss:$28 sps:$4 sm:$0xff]   ;;  %v8709_v60 = vld [vmem:[#allocation13] sm:$0xff] }
 0x4c7   :  { %6072 = vmatpush1.bf16.msra.mxu1 %v8049_v26  ;;  %v3330_v26 = vrot.slane %v8709_v60, %v8606_v62 }
 0x4c8   :  { %7291 = vmatpush3.bf16.msra.mxu0 %v8053_v27  ;;  %6073 = vmatprep.subr.bf16.mxu1 %v8056_v43  ;;  %v3326_v27 = vrot.slane %v8709_v60, %v8553_v41  ;;  %v3334_v43 = vrot.slane %v8709_v60, %v8609_v1  ;;  %v8135_v1 = vld [vmem:[#allocation12 + $0xc1c] ss:$28 sps:$4 sm:$0xff]  }
 0x4c9   :  { %7292 = vmatprep.subr.bf16.mxu0 %v8057_v44  ;;  %v8127_v44 = vld [vmem:[#allocation12 + $0xba8] ss:$28 sps:$4 sm:$0xff]  }
 0x4cb   :  { %6074 = vmatpush1.bf16.msra.mxu1 %v8054_v47  ;;  %v8132_v47 = vld [vmem:[#allocation12 + $0xbe4] ss:$28 sps:$4 sm:$0xff]  }
 0x4cc   :  { %7293 = vmatpush3.bf16.msra.mxu0 %v8058_v49  ;;  %6075 = vmatprep.subr.bf16.mxu1 %v8061_v50 }
 0x4cd   :  { %7294 = vmatprep.subr.bf16.mxu0 %v8062_v51 }
 0x4cf   :  { %6076 = vmatpush1.bf16.msra.mxu1 %v8059_v55 }
 0x4d0   :  { %7295 = vmatpush3.bf16.msra.mxu0 %v8063_v52  ;;  %6088 = vmatprep.subr.bf16.mxu1 %v8066_v57 }
 0x4d2   :  { %6078 = vmatmul.mubr.bf16.vlgmr.msra.gmra.mrb[12].mxu1 %v8646_v56  ;;  %v8081_v56 = vld [vmem:[#allocation12 + $0x82c] ss:$28 sps:$4 sm:$0xff]  }
 0x4d3   :  { %6330 = vmatmul.mubr.bf16.vlgmr.msra.gmra.mrb[36].mxu0 %v8679_v3  ;;  %6089 = vmatpush1.bf16.msra.mxu1 %v8064_v58 }
 0x4d4   :  { %6120 = vmatprep.mubr.bf16.mxu1 %v8682_v9  ;;  %6090 = vmatprep.subr.bf16.mxu1 %v8069_v61  ;;  %v8082_v9 = vld [vmem:[#allocation12 + $0x860] ss:$28 sps:$4 sm:$0xff]  }
 0x4d7   :  { %6091 = vmatpush1.bf16.msra.mxu1 %v8067_v63  ;;  %v8130_v63 = vld [vmem:[#allocation12 + $0xbe0] ss:$28 sps:$4 sm:$0xff]  }
 0x4d8   :  { %6092 = vmatprep.subr.bf16.mxu1 %v8072_v0 }
 0x4db   :  { %6093 = vmatpush1.bf16.msra.mxu1 %v8070_v2 }
 0x4dc   :  { %6094 = vmatprep.subr.bf16.mxu1 %v8075_v7 }
 0x4df   :  { %6095 = vmatpush1.bf16.msra.mxu1 %v8073_v8 }
 0x4e0   :  { %6096 = vmatprep.subr.bf16.mxu1 %v8078_v10 }
 0x4e3   :  { %6097 = vmatpush1.bf16.msra.mxu1 %v8076_v11  ;;  %v8133_v11 = vld [vmem:[#allocation12 + $0xc18] ss:$28 sps:$4 sm:$0xff]  }
 0x4e4   :  { %6098 = vmatprep.subr.bf16.mxu1 %v8081_v56  ;;  %v8138_v56 = vld [vmem:[#allocation12 + $0xc54] ss:$28 sps:$4 sm:$0xff]  }
 0x4e7   :  { %6099 = vmatpush1.bf16.msra.mxu1 %v8079_v12  ;;  %v8136_v12 = vld [vmem:[#allocation12 + $0xc50] ss:$28 sps:$4 sm:$0xff]  }
 0x4e8   :  { %6100 = vmatprep.subr.bf16.mxu1 %v8084_v14  ;;  %v8141_v14 = vld [vmem:[#allocation12 + $0xc8c] ss:$28 sps:$4 sm:$0xff]  }
 0x4eb   :  { %6101 = vmatpush1.bf16.msra.mxu1 %v8082_v9 }
 0x4ec   :  { %6102 = vmatprep.subr.bf16.mxu1 %v8087_v17 }
 0x4ef   :  { %6103 = vmatpush1.bf16.msra.mxu1 %v8085_v15  ;;  %v8139_v15 = vld [vmem:[#allocation12 + $0xc88] ss:$28 sps:$4 sm:$0xff]  }
 0x4f0   :  { %6104 = vmatprep.subr.bf16.mxu1 %v8090_v45 }
 0x4f3   :  { %6105 = vmatpush1.bf16.msra.mxu1 %v8088_v18  ;;  %v8144_v18 = vld [vmem:[#allocation12 + $0xcc4] ss:$28 sps:$4 sm:$0xff]  }
 0x4f4   :  { %6106 = vmatprep.subr.bf16.mxu1 %v8093_v22 }
 0x4f7   :  { %6107 = vmatpush1.bf16.msra.mxu1 %v8091_v23 }
 0x4f8   :  { %6108 = vmatprep.subr.bf16.mxu1 %v8096_v25 }
 0x4fb   :  { %6109 = vmatpush1.bf16.msra.mxu1 %v8094_v28 }
 0x4fc   :  { %6110 = vmatprep.subr.bf16.mxu1 %v8099_v29 }
 0x4ff   :  { %6111 = vmatpush1.bf16.msra.mxu1 %v8097_v30  ;;  %v8142_v30 = vld [vmem:[#allocation12 + $0xcc0] ss:$28 sps:$4 sm:$0xff]  }
 0x500   :  { %6112 = vmatprep.subr.bf16.mxu1 %v8102_v48 }
 0x503   :  { %6113 = vmatpush1.bf16.msra.mxu1 %v8100_v46  ;;  %v8147_v46 = vld [vmem:[#allocation12 + $0xcfc] ss:$28 sps:$4 sm:$0xff]  }
 0x504   :  { %6114 = vmatprep.subr.bf16.mxu1 %v8105_v59 }
 0x507   :  { %6115 = vmatpush1.bf16.msra.mxu1 %v8103_v31 }
 0x508   :  { %6116 = vmatprep.subr.bf16.mxu1 %v8108_v33 }
 0x50b   :  { %6117 = vmatpush1.bf16.msra.mxu1 %v8106_v34  ;;  %v8145_v34 = vld [vmem:[#allocation12 + $0xcf8] ss:$28 sps:$4 sm:$0xff]  }
 0x50c   :  { %6118 = vmatprep.subr.bf16.mxu1 %v8111_v35  ;;  %v8150_v35 = vld [vmem:[#allocation12 + $0xd34] ss:$28 sps:$4 sm:$0xff]  }
 0x50f   :  { %6119 = vmatpush1.bf16.msra.mxu1 %v8109_v36  ;;  %v8148_v36 = vld [vmem:[#allocation12 + $0xd30] ss:$28 sps:$4 sm:$0xff]  }
 0x510   :  { %6131 = vmatprep.subr.bf16.mxu1 %v8114_v16  ;;  %v8153_v16 = vld [vmem:[#allocation12 + $0xd6c] ss:$28 sps:$4 sm:$0xff]  }
 0x512   :  { %6121 = vmatmul.mubr.bf16.vlgmr.msra.gmra.mrb[12].mxu1 %v8675_v54  ;;  %v8129_v54 = vld [vmem:[#allocation12 + $0xbac] ss:$28 sps:$4 sm:$0xff]  }
 0x513   :  { %6132 = vmatpush1.bf16.msra.mxu1 %v8112_v53  ;;  %6163 = vmatprep.mubr.bf16.mxu1 %v8684_v13  ;;  %v3322_v13 = vrot.slane %v8709_v60, %v8550_v37  ;;  %v8151_v53 = vld [vmem:[#allocation12 + $0xd68] ss:$28 sps:$4 sm:$0xff]  }
 0x514   :  { %6133 = vmatprep.subr.bf16.mxu1 %v8117_v38  ;;  %v8156_v38 = vld [vmem:[#allocation12 + $0xda4] ss:$28 sps:$4 sm:$0xff]  }
 0x517   :  { %6134 = vmatpush1.bf16.msra.mxu1 %v8115_v39 }
 0x518   :  { %6135 = vmatprep.subr.bf16.mxu1 %v8120_v40 }
 0x51b   :  { %6136 = vmatpush1.bf16.msra.mxu1 %v8118_v42  ;;  %v8154_v42 = vld [vmem:[#allocation12 + $0xda0] ss:$28 sps:$4 sm:$0xff]  }
 0x51c   :  { %6137 = vmatprep.subr.bf16.mxu1 %v8123_v19 }
 0x51f   :  { %6138 = vmatpush1.bf16.msra.mxu1 %v8121_v20 }
 0x520   :  { %6139 = vmatprep.subr.bf16.mxu1 %v8126_v21  ;;  %v8159_v21 = vld [vmem:[#allocation12 + $0xddc] ss:$28 sps:$4 sm:$0xff]  }
 0x523   :  { %6140 = vmatpush1.bf16.msra.mxu1 %v8124_v24 }
 0x524   :  { %6141 = vmatprep.subr.bf16.mxu1 %v8129_v54 }
 0x525   :  { %v5821_v49 = vpop.f32.mrb[8].mxu1  ;;  %v5993_v50 = vpop.f32.mrb[20].mxu0 }
 0x526   :  { %v7318_v51 = vadd.f32 %v5821_v49, %v3322_v13  ;;  %v7322_v55 = vadd.f32 %v5993_v50, %v3330_v26  ;;  %v5823_v52 = vpop.f32.mrb[9].mxu1  ;;  %v5995_v57 = vpop.f32.mrb[21].mxu0 }
 0x527   :  { %v7319_v37 = vadd.f32 %v5823_v52, %v3326_v27  ;;  %v7323_v58 = vadd.f32 %v5995_v57, %v3334_v43  ;;  %v5825_v61 = vpop.f32.mrb[10].mxu1  ;;  %v5997_v62 = vpop.f32.mrb[22].mxu0  ;;  %6142 = vmatpush1.bf16.msra.mxu1 %v8127_v44 }
 0x528   :  { %8160 = vtanh.f32 %v7318_v51  ;;  %v7320_v41 = vadd.f32 %v5825_v61, %v3322_v13  ;;  %v5827_v0 = vpop.f32.mrb[11].mxu1  ;;  %v5999_v2 = vpop.f32.mrb[23].mxu0  ;;  %6143 = vmatprep.subr.bf16.mxu1 %v8132_v47  ;;  %v7324_v7 = vadd.f32 %v5997_v62, %v3330_v26  ;;  %v8157_v13 = vld [vmem:[#allocation12 + $0xdd8] ss:$28 sps:$4 sm:$0xff]   ;;  %v3346_v26 = vrot.slane %v8709_v60, %v1111_v5 }
 0x529   :  { %8162 = vtanh.f32 %v7322_v55  ;;  %v7321_v8 = vadd.f32 %v5827_v0, %v3326_v27  ;;  %v7325_v10 = vadd.f32 %v5999_v2, %v3334_v43 }
 0x52a   :  { %8164 = vtanh.f32 %v7319_v37 }
 0x52b   :  { %8166 = vtanh.f32 %v7323_v58  ;;  %6144 = vmatpush1.bf16.msra.mxu1 %v8130_v63 }
 0x52c   :  { %8168 = vtanh.f32 %v7320_v41  ;;  %6145 = vmatprep.subr.bf16.mxu1 %v8135_v1 }
 0x52d   :  { %8170 = vtanh.f32 %v7324_v7 }
 0x52e   :  { %8172 = vtanh.f32 %v7321_v8 }
 0x52f   :  { %8174 = vtanh.f32 %v7325_v10  ;;  %6146 = vmatpush1.bf16.msra.mxu1 %v8133_v11 }
 0x530   :  { %6147 = vmatprep.subr.bf16.mxu1 %v8138_v56 }
 0x532   :  { %v8161_v9 = vpop.eup %8160 }
 0x533   :  { %v8163_v17 = vpop.eup %8162  ;;  %6148 = vmatpush1.bf16.msra.mxu1 %v8136_v12 }
 0x534   :  { %v8165_v45 = vpop.eup %8164  ;;  %6149 = vmatprep.subr.bf16.mxu1 %v8141_v14 }
 0x535   :  { %v8167_v22 = vpop.eup %8166  ;;  %v7206_v23 = vpack.c.bf16 %v8165_v45, %v8161_v9  ;;  %v3342_v45 = vrot.slane %v8709_v60, %v1107_v6 }
 0x536   :  { %v8169_v25 = vpop.eup %8168  ;;  %v7207_v28 = vpack.c.bf16 %v8167_v22, %v8163_v17 }
 0x537   :  { %v8171_v29 = vpop.eup %8170  ;;  %6396 = vst [vmem:[%s8762_s9] sm:$0xff] %v7206_v23  ;;  %6150 = vmatpush1.bf16.msra.mxu1 %v8139_v15  ;;  %v3338_v15 = vrot.slane %v8709_v60, %v1103_v4 }
 0x538   :  { %v8173_v48 = vpop.eup %8172  ;;  %6397 = vst [vmem:[%s8762_s9 + $0x8] sm:$0xff] %v7207_v28  ;;  %6151 = vmatprep.subr.bf16.mxu1 %v8144_v18 }
 0x539   :  { %v8175_v59 = vpop.eup %8174  ;;  %v7210_v31 = vpack.c.bf16 %v8173_v48, %v8169_v25 }
 0x53a   :  { %v7211_v33 = vpack.c.bf16 %v8175_v59, %v8171_v29 }
 0x53b   :  { %6400 = vst [vmem:[%s8762_s9 + $0x1c] sm:$0xff] %v7210_v31  ;;  %6152 = vmatpush1.bf16.msra.mxu1 %v8142_v30 }
 0x53c   :  { %6401 = vst [vmem:[%s8762_s9 + $0x24] sm:$0xff] %v7211_v33  ;;  %6153 = vmatprep.subr.bf16.mxu1 %v8147_v46 }
 0x53f   :  { %6154 = vmatpush1.bf16.msra.mxu1 %v8145_v34 }
 0x540   :  { %6155 = vmatprep.subr.bf16.mxu1 %v8150_v35 }
 0x543   :  { %6156 = vmatpush1.bf16.msra.mxu1 %v8148_v36 }
 0x544   :  { %6157 = vmatprep.subr.bf16.mxu1 %v8153_v16 }
 0x546   :  { %v7230_v39 = vpop.f32.mrb[24].mxu0 }
 0x547   :  { %v7231_v40 = vpop.f32.mrb[25].mxu0  ;;  %6158 = vmatpush1.bf16.msra.mxu1 %v8151_v53 }
 0x548   :  { %v7232_v19 = vadd.f32 %v7231_v40, %v7230_v39  ;;  %v7233_v20 = vpop.f32.mrb[26].mxu0  ;;  %6159 = vmatprep.subr.bf16.mxu1 %v8156_v38 }
 0x549   :  { %v7234_v24 = vpop.f32.mrb[27].mxu0 }
 0x54a   :  { %v7235_v54 = vadd.f32 %v7234_v24, %v7233_v20  ;;  %v6209_v44 = vadd.f32 %v7232_v19, %v3346_v26 }
 0x54b   :  { %6160 = vmatpush1.bf16.msra.mxu1 %v8154_v42 }
 0x54c   :  { %6161 = vmatprep.subr.bf16.mxu1 %v8159_v21  ;;  %v6212_v51 = vadd.f32 %v7235_v54, %v3346_v26 }
 0x54f   :  { %6162 = vmatpush1.bf16.msra.mxu1 %v8157_v13 }
 0x552   :  { %6164 = vmatmul.mubr.bf16.vlgmr.msra.gmra.mrb[12].mxu1 %v8679_v3 }
 0x566   :  { %v7252_v27 = vpop.f32.mrb[28].mxu0 }
 0x567   :  { %v7253_v43 = vpop.f32.mrb[29].mxu0 }
 0x568   :  { %v7254_v47 = vadd.f32 %v7253_v43, %v7252_v27  ;;  %v7255_v49 = vpop.f32.mrb[30].mxu0 }
 0x569   :  { %v7256_v50 = vpop.f32.mrb[31].mxu0 }
 0x56a   :  { %v6250_v55 = vadd.f32 %v7254_v47, %v6209_v44  ;;  %v7257_v52 = vadd.f32 %v7256_v50, %v7255_v49 }
 0x56c   :  { %v6253_v57 = vadd.f32 %v7257_v52, %v6212_v51 }
 0x586   :  { %v7274_v37 = vpop.f32.mrb[32].mxu0 }
 0x587   :  { %v7275_v58 = vpop.f32.mrb[33].mxu0 }
 0x588   :  { %v7276_v61 = vadd.f32 %v7275_v58, %v7274_v37  ;;  %v7277_v62 = vpop.f32.mrb[34].mxu0 }
 0x589   :  { %v7278_v63 = vpop.f32.mrb[35].mxu0 }
 0x58a   :  { %v6291_v3 = vadd.f32 %v7276_v61, %v6250_v55  ;;  %v7279_v41 = vadd.f32 %v7278_v63, %v7277_v62 }
 0x58c   :  { %v6294_v0 = vadd.f32 %v7279_v41, %v6253_v57 }
 0x5a6   :  { %v7296_v2 = vpop.f32.mrb[36].mxu0 }
 0x5a7   :  { %v7297_v5 = vpop.f32.mrb[37].mxu0 }
 0x5a8   :  { %v7298_v1 = vadd.f32 %v7297_v5, %v7296_v2  ;;  %v7299_v7 = vpop.f32.mrb[38].mxu0 }
 0x5a9   :  { %v7300_v8 = vpop.f32.mrb[39].mxu0 }
 0x5aa   :  { %v6332_v10 = vadd.f32 %v7298_v1, %v6291_v3  ;;  %v7301_v11 = vadd.f32 %v7300_v8, %v7299_v7 }
 0x5ac   :  { %8176 = vtanh.f32 %v6332_v10  ;;  %v6335_v56 = vadd.f32 %v7301_v11, %v6294_v0 }
 0x5ae   :  { %8178 = vtanh.f32 %v6335_v56 }
 0x5b6   :  { %v8177_v12 = vpop.eup %8176 }
 0x5b7   :  { %v7209_v14 = vpack.c.bf16 %v8177_v12, %v8177_v12 }
 0x5b8   :  { %v8179_v9 = vpop.eup %8178 }
 0x5b9   :  { %6399 = vst [vmem:[%s8762_s9 + $0x18] sm:$0xf] %v7209_v14  ;;  %v7213_v17 = vpack.c.bf16 %v8179_v9, %v8179_v9 }
 0x5bb   :  { %6403 = vst [vmem:[%s8762_s9 + $0x34] sm:$0xf] %v7213_v17 }
 0x625   :  { %v6165_v18 = vpop.f32.mrb[12].mxu1 }
 0x626   :  { %v7326_v22 = vadd.f32 %v6165_v18, %v3338_v15  ;;  %v6167_v23 = vpop.f32.mrb[13].mxu1 }
 0x627   :  { %v7327_v25 = vadd.f32 %v6167_v23, %v3342_v45  ;;  %v6169_v28 = vpop.f32.mrb[14].mxu1 }
 0x628   :  { %8180 = vtanh.f32 %v7326_v22  ;;  %v7328_v29 = vadd.f32 %v6169_v28, %v3338_v15  ;;  %v6171_v30 = vpop.f32.mrb[15].mxu1 }
 0x629   :  { %8182 = vtanh.f32 %v7327_v25  ;;  %v7329_v48 = vadd.f32 %v6171_v30, %v3342_v45 }
 0x62a   :  { %8184 = vtanh.f32 %v7328_v29 }
 0x62b   :  { %8186 = vtanh.f32 %v7329_v48 }
 0x632   :  { %v8181_v46 = vpop.eup %8180 }
 0x633   :  { %v8183_v59 = vpop.eup %8182 }
 0x634   :  { %v8185_v31 = vpop.eup %8184  ;;  %v7208_v4 = vpack.c.bf16 %v8183_v59, %v8181_v46 }
 0x635   :  { %v8187_v33 = vpop.eup %8186 }
 0x636   :  { %6398 = vst [vmem:[%s8762_s9 + $0x10] sm:$0xff] %v7208_v4  ;;  %v7212_v32 = vpack.c.bf16 %v8187_v33, %v8185_v31 }
 0x638   :  { %6402 = vst [vmem:[%s8762_s9 + $0x2c] sm:$0xff] %v7212_v32 }
 0x639   :  { %6408 = vsyncpa [#allocation3], 1 }
 0x63a   :  { %6409 = vsyncpa [#allocation5], 1 }
 0x63b   :  { %6410 = vsyncpa [#allocation8], 1 }
 0x63c   :  { %6411 = vsyncpa [#allocation11], 1 }
 0x63d   :  { %6412 = vsyncpa [#allocation14], 1 }

</bundles_post_ra>
